<compile_context>
chip_gen: v5e
topology: v5e:2x2
jax: 0.10.0
libtpu: 0.0.40
codegen_flags: <defaults>
</compile_context>

<pallas_src>
import functools
import math

import jax
import jax.numpy as jnp
from jax.experimental import pallas as pl
from jax.experimental.pallas import tpu as pltpu

BLOCKSIZE = 4
AREA = BLOCKSIZE * BLOCKSIZE     # 16 pixels per block
NCH = 12                         # hidden width of each PixelPred MLP
C = 3                            # three Predictors (one per image channel)


def _leaky(h):
    # nn.functional.leaky_relu, default negative_slope=0.01
    return jnp.where(h > 0, h, 0.01 * h)


def predictor_kernel(x_ref, w0, b0, w1, b1, w2, b2, w3, b3, err_ref, ss_ref,
                     *, n_valid, tm):
    """One grid step: one channel (grid dim 0) x one tile of TM block-rows.

    x_ref / err_ref : (AREA, TM)   block pixels on sublanes, rows on lanes
    w0              : (AREA, NCH, AREA)   zero-padded, transposed layer-0 W
    w1, w2          : (AREA, NCH, NCH)    transposed hidden W
    b0, b1, b2      : (AREA, NCH, 1)
    w3              : (AREA, 1, NCH)      transposed output W
    b3              : (AREA, 1, 1)
    ss_ref          : (8, 128)     per-(channel, tile) partial sum of squares
    """
    # err_ref doubles as the working buffer: rows < k hold residuals, rows >= k
    # still hold the raw pixels, exactly torch.cat((errors, x[..., k+1:])).
    err_ref[...] = x_ref[...]

    for k in range(AREA):                                  # static, unrolled
        buf = err_ref[...]                                 # (AREA, TM)
        # Layer 0 uses the full 16-wide buffer; w0[k] has a zero column at k,
        # so the (still raw) own pixel does not contribute.
        h = _leaky(jnp.dot(w0[k], buf,
                           preferred_element_type=jnp.float32) + b0[k])
        h = _leaky(jnp.dot(w1[k], h,
                           preferred_element_type=jnp.float32) + b1[k])
        h = _leaky(jnp.dot(w2[k], h,
                           preferred_element_type=jnp.float32) + b2[k])
        p = jnp.clip(jnp.dot(w3[k], h,
                             preferred_element_type=jnp.float32) + b3[k],
                     -1.0, 1.0)                            # (1, TM) lane-dense

        delta = buf[k:k + 1, :] - p                        # raw pixel k - pred
        # torch.fmod(delta + 1, 2) - 1   (delta bounded to [-2, 2] by the clip)
        delta = delta - jnp.where(delta >= 1.0, 2.0, 0.0)
        err_ref[pl.ds(k, 1), :] = delta

    # Per-tile partial sum of squared residuals (mask the padded lanes).
    e = err_ref[...]
    per_lane = jnp.sum(e * e, axis=0, keepdims=True)                  # (1, TM)
    col = jax.lax.broadcasted_iota(jnp.int32, (1, tm), 1) + pl.program_id(1) * tm
    per_lane = jnp.where(col < n_valid, per_lane, 0.0)
    total = jnp.sum(per_lane, axis=1, keepdims=True)                  # (1, 1)
    ss_ref[...] = jnp.broadcast_to(total, (8, 128))


def run_predictors(xk, prep, n_valid, tm):
    """xk: (C, AREA, N_pad) f32 (N_pad multiple of tm, tm multiple of 128).

    Returns (errors (C, AREA, N_pad), ss_partials (C, N_pad//tm, 8, 128))."""
    c, area, n_pad = xk.shape
    assert c == C and area == AREA and n_pad % tm == 0 and tm % 128 == 0
    nt = n_pad // tm
    W0T, b0T, W1T, b1T, W2T, b2T, W3T, b3 = prep

    wmap = lambda ci, ni: (ci, 0, 0, 0)
    xmap = lambda ci, ni: (ci, 0, ni)
    kernel = functools.partial(predictor_kernel, n_valid=n_valid, tm=tm)

    return pl.pallas_call(
        kernel,
        out_shape=(
            jax.ShapeDtypeStruct((C, AREA, n_pad), jnp.float32),
            jax.ShapeDtypeStruct((C, nt, 8, 128), jnp.float32),
        ),
        grid_spec=pltpu.PrefetchScalarGridSpec(
            num_scalar_prefetch=0,
            grid=(C, nt),
            in_specs=[
                pl.BlockSpec((None, AREA, tm), xmap),
                pl.BlockSpec((None, AREA, NCH, AREA), wmap),
                pl.BlockSpec((None, AREA, NCH, 1), wmap),
                pl.BlockSpec((None, AREA, NCH, NCH), wmap),
                pl.BlockSpec((None, AREA, NCH, 1), wmap),
                pl.BlockSpec((None, AREA, NCH, NCH), wmap),
                pl.BlockSpec((None, AREA, NCH, 1), wmap),
                pl.BlockSpec((None, AREA, 1, NCH), wmap),
                pl.BlockSpec((None, AREA, 1, 1), wmap),
            ],
            out_specs=(
                pl.BlockSpec((None, AREA, tm), xmap),
                pl.BlockSpec((None, None, 8, 128), lambda ci, ni: (ci, ni, 0, 0)),
            ),
        ),
        compiler_params=pltpu.CompilerParams(
            dimension_semantics=("parallel", "parallel"),
            vmem_limit_bytes=32 * 1024 * 1024),
    )(xk, W0T, b0T, W1T, b1T, W2T, b2T, W3T, b3)


# ------------------------- parameters / host-side prep ----------------------

def init_params(key):
    """Deterministic per-(channel, pixel) MLP weights; W stored as (in, out)."""
    dims = [(AREA - 1, NCH), (NCH, NCH), (NCH, NCH), (NCH, 1)]
    params = []
    for fan_in, fan_out in dims:
        key, kw, kb = jax.random.split(key, 3)
        bound = 1.0 / math.sqrt(fan_in)
        W = jax.random.uniform(kw, (C, AREA, fan_in, fan_out),
                               minval=-bound, maxval=bound, dtype=jnp.float32)
        b = jax.random.uniform(kb, (C, AREA, 1, fan_out),
                               minval=-bound, maxval=bound, dtype=jnp.float32)
        params += [W, b]
    return params


def prepare_params(params):
    """Zero-pad layer-0 weights and transpose everything for W^T @ buf."""
    W0, b0, W1, b1, W2, b2, W3, b3 = params
    rows = []
    for k in range(AREA):
        wk = W0[:, k]                                        # (C, 15, NCH)
        zk = jnp.zeros((C, 1, NCH), W0.dtype)
        rows.append(jnp.concatenate([wk[:, :k], zk, wk[:, k:]], axis=1))
    W0p = jnp.stack(rows, axis=1)                            # (C, AREA, 16, NCH)
    tr = lambda w: jnp.swapaxes(w, 2, 3)
    return (tr(W0p), tr(b0), tr(W1), tr(b1), tr(W2), tr(b2), tr(W3), b3)


# ------------------------- plain-JAX glue / metrics -------------------------

def images_to_blocks(x):
    """NCHW -> (b, c, nblocks, 16), matching torch unfold(2,4,4).unfold(3,4,4)."""
    b, c, h, w = x.shape
    xb = x.reshape(b, c, h // BLOCKSIZE, BLOCKSIZE, w // BLOCKSIZE, BLOCKSIZE)
    return xb.transpose(0, 1, 2, 4, 3, 5).reshape(b, c, -1, AREA)


def _row_tile(n):
    if n >= 1024:
        return 1024
    return ((n + 127) // 128) * 128


@jax.jit
def codec_loss(x, prep):
    """Hot path: returns (loss1, deltas).  Diagnostics are computed elsewhere."""
    x = x.astype(jnp.float32)
    b, c, h, w = x.shape
    assert c == C and h % BLOCKSIZE == 0 and w % BLOCKSIZE == 0
    xb = images_to_blocks(x)                                 # (b, c, nb, 16)
    nb = xb.shape[2]
    N = b * nb

    xk = xb.transpose(1, 3, 0, 2).reshape(c, AREA, N)        # rows on lanes
    tm = _row_tile(N)
    n_pad = ((N + tm - 1) // tm) * tm
    xk = jnp.pad(xk, ((0, 0), (0, 0), (0, n_pad - N)))

    err, ss = run_predictors(xk, prep, N, tm)

    deltas = err[:, :, :N].reshape(c, AREA, b, nb).transpose(2, 0, 3, 1)
    ss_total = jnp.sum(ss[:, :, 0, 0])
    loss1 = 255.0 * jnp.sqrt(ss_total / (c * AREA * N))      # calc_RMSE(deltas)
    return loss1, deltas


def calc_invCR(v):
    # torch.histc(v[k], 256, -1, 1) per (b*c) channel; out-of-range ignored.
    nch = v.shape[0] * v.shape[1]
    flat = v.reshape(nch, -1)
    res, bins, lo, hi = flat.shape[1], 256, -1.0, 1.0
    idx = jnp.floor((flat - lo) * bins / (hi - lo)).astype(jnp.int32)
    idx = jnp.where(flat >= hi, bins - 1, idx)
    valid = (flat >= lo) & (flat <= hi)
    idx = jnp.clip(idx, 0, bins - 1)
    wts = jnp.where(valid, 1.0, 0.0)
    counts = jnp.zeros((nch, bins), jnp.float32).at[
        jnp.arange(nch)[:, None], idx].add(wts)
    prob = counts / res
    ent = jnp.sum(jnp.where(prob > 0, -prob * jnp.log2(prob), 0.0))
    return ent / (8 * nch)


def safe_inv(x):
    return 1.0 / x if x != 0 else math.inf


class Codec:
    """Mirrors the PyTorch Codec's forward + running stats."""

    def __init__(self, key):
        self.params = init_params(key)
        self.prep = prepare_params(self.params)
        self.epoch_start()

    def epoch_start(self):
        self.esum1 = 0.0
        self.count = 0

    def forward(self, x, verbose=False):
        b = x.shape[0]
        loss1, deltas = codec_loss(x, self.prep)
        if verbose:
            xb = images_to_blocks(x.astype(jnp.float32))
            loss0 = 255.0 * jnp.sqrt(jnp.mean(jnp.square(xb)))
            msg = 'RMSE%7.2lf ->%7.2f  CR%7.2f ->%7.2f' % (
                float(loss0), float(loss1),
                safe_inv(float(calc_invCR(xb))),
                safe_inv(float(calc_invCR(deltas))))
        else:
            msg = ''
        # running stats kept lazily (no per-step host sync)
        self.esum1 = self.esum1 + loss1 * b
        self.count += b
        return loss1, msg


if __name__ == "__main__":
    key = jax.random.PRNGKey(0)
    x = jax.random.uniform(key, (2, 3, 16, 16), dtype=jnp.float32,
                           minval=-1.0, maxval=1.0)
    codec = Codec(jax.random.PRNGKey(42))
    loss1, msg = codec.forward(x)
    jax.block_until_ready(loss1)
    print("KERNEL_OK")
</pallas_src>

<mosaic_0001>
module attributes {stable_mosaic.version = 11 : i64} {
  func.func @predictor_kernel(%arg0: i32, %arg1: i32, %arg2: memref<1x16x128xf32, #tpu.memory_space<vmem>>, %arg3: memref<1x16x12x16xf32, #tpu.memory_space<vmem>>, %arg4: memref<1x16x12x1xf32, #tpu.memory_space<vmem>>, %arg5: memref<1x16x12x12xf32, #tpu.memory_space<vmem>>, %arg6: memref<1x16x12x1xf32, #tpu.memory_space<vmem>>, %arg7: memref<1x16x12x12xf32, #tpu.memory_space<vmem>>, %arg8: memref<1x16x12x1xf32, #tpu.memory_space<vmem>>, %arg9: memref<1x16x1x12xf32, #tpu.memory_space<vmem>>, %arg10: memref<1x16x1x1xf32, #tpu.memory_space<vmem>>, %arg11: memref<1x16x128xf32, #tpu.memory_space<vmem>>, %arg12: memref<1x1x8x128xf32, #tpu.memory_space<vmem>>) attributes {dimension_semantics = [#tpu.dimension_semantics<parallel>, #tpu.dimension_semantics<parallel>], iteration_bounds = array<i64: 3, 1>, scalar_prefetch = 0 : i64, scratch_operands = 0 : i64, tpu.core_type = #tpu.core_type<tc>, window_params = [{transform_indices = @transform_0, window_bounds = array<i64: 1, 16, 128>}, {transform_indices = @transform_1, window_bounds = array<i64: 1, 16, 12, 16>}, {transform_indices = @transform_2, window_bounds = array<i64: 1, 16, 12, 1>}, {transform_indices = @transform_3, window_bounds = array<i64: 1, 16, 12, 12>}, {transform_indices = @transform_4, window_bounds = array<i64: 1, 16, 12, 1>}, {transform_indices = @transform_5, window_bounds = array<i64: 1, 16, 12, 12>}, {transform_indices = @transform_6, window_bounds = array<i64: 1, 16, 12, 1>}, {transform_indices = @transform_7, window_bounds = array<i64: 1, 16, 1, 12>}, {transform_indices = @transform_8, window_bounds = array<i64: 1, 16, 1, 1>}, {transform_indices = @transform_9, window_bounds = array<i64: 1, 16, 128>}, {transform_indices = @transform_10, window_bounds = array<i64: 1, 1, 8, 128>}]} {
    %c0 = arith.constant 0 : index
    %c0_0 = arith.constant 0 : index
    %c0_1 = arith.constant 0 : index
    %0 = vector.load %arg2[%c0, %c0_0, %c0_1] : memref<1x16x128xf32, #tpu.memory_space<vmem>>, vector<1x16x128xf32>
    %1 = vector.shape_cast %0 : vector<1x16x128xf32> to vector<16x128xf32>
    %c0_2 = arith.constant 0 : index
    %c0_3 = arith.constant 0 : index
    %c0_4 = arith.constant 0 : index
    %2 = vector.load %arg11[%c0_2, %c0_3, %c0_4] : memref<1x16x128xf32, #tpu.memory_space<vmem>>, vector<1x16x128xf32>
    %3 = vector.shape_cast %2 : vector<1x16x128xf32> to vector<16x128xf32>
    %4 = vector.shape_cast %1 : vector<16x128xf32> to vector<1x16x128xf32>
    tpu.vector_store %arg11[%c0_2, %c0_3, %c0_4], %4 {strides = array<i32>} : memref<1x16x128xf32, #tpu.memory_space<vmem>>, vector<1x16x128xf32>,
    %c0_5 = arith.constant 0 : index
    %c0_6 = arith.constant 0 : index
    %c0_7 = arith.constant 0 : index
    %5 = vector.load %arg11[%c0_5, %c0_6, %c0_7] : memref<1x16x128xf32, #tpu.memory_space<vmem>>, vector<1x16x128xf32>
    %6 = vector.shape_cast %5 : vector<1x16x128xf32> to vector<16x128xf32>
    %c0_8 = arith.constant 0 : index
    %c0_9 = arith.constant 0 : index
    %c0_10 = arith.constant 0 : index
    %c0_11 = arith.constant 0 : index
    %7 = vector.load %arg3[%c0_8, %c0_9, %c0_10, %c0_11] : memref<1x16x12x16xf32, #tpu.memory_space<vmem>>, vector<1x1x12x16xf32>
    %8 = vector.shape_cast %7 : vector<1x1x12x16xf32> to vector<12x16xf32>
    %cst = arith.constant dense<0.000000e+00> : vector<12x128xf32>
    %9 = tpu.matmul %8, %6, %cst {dimension_numbers = #tpu.dot_dimension_numbers<[1], [0], [0], [1], [0, 0, 1, 1], [], []>} : vector<12x16xf32>, vector<16x128xf32>, vector<12x128xf32> -> vector<12x128xf32>
    %c0_12 = arith.constant 0 : index
    %c0_13 = arith.constant 0 : index
    %c0_14 = arith.constant 0 : index
    %c0_15 = arith.constant 0 : index
    %10 = vector.load %arg4[%c0_12, %c0_13, %c0_14, %c0_15] : memref<1x16x12x1xf32, #tpu.memory_space<vmem>>, vector<1x1x12x1xf32>
    %11 = vector.shape_cast %10 : vector<1x1x12x1xf32> to vector<12x1xf32>
    %12 = vector.broadcast %11 : vector<12x1xf32> to vector<12x128xf32>
    %13 = arith.addf %9, %12 : vector<12x128xf32>
    %cst_16 = arith.constant 0.000000e+00 : f32
    %14 = vector.broadcast %cst_16 : f32 to vector<12x128xf32>
    %15 = arith.cmpf ogt, %13, %14 : vector<12x128xf32>
    %cst_17 = arith.constant 0.00999999977 : f32
    %16 = vector.broadcast %cst_17 : f32 to vector<12x128xf32>
    %17 = arith.mulf %16, %13 : vector<12x128xf32>
    %18 = arith.select %15, %13, %17 : vector<12x128xi1>, vector<12x128xf32>
    %c0_18 = arith.constant 0 : index
    %c0_19 = arith.constant 0 : index
    %c0_20 = arith.constant 0 : index
    %c0_21 = arith.constant 0 : index
    %19 = vector.load %arg5[%c0_18, %c0_19, %c0_20, %c0_21] : memref<1x16x12x12xf32, #tpu.memory_space<vmem>>, vector<1x1x12x12xf32>
    %20 = vector.shape_cast %19 : vector<1x1x12x12xf32> to vector<12x12xf32>
    %cst_22 = arith.constant dense<0.000000e+00> : vector<12x128xf32>
    %21 = tpu.matmul %20, %18, %cst_22 {dimension_numbers = #tpu.dot_dimension_numbers<[1], [0], [0], [1], [0, 0, 1, 1], [], []>} : vector<12x12xf32>, vector<12x128xf32>, vector<12x128xf32> -> vector<12x128xf32>
    %c0_23 = arith.constant 0 : index
    %c0_24 = arith.constant 0 : index
    %c0_25 = arith.constant 0 : index
    %c0_26 = arith.constant 0 : index
    %22 = vector.load %arg6[%c0_23, %c0_24, %c0_25, %c0_26] : memref<1x16x12x1xf32, #tpu.memory_space<vmem>>, vector<1x1x12x1xf32>
    %23 = vector.shape_cast %22 : vector<1x1x12x1xf32> to vector<12x1xf32>
    %24 = vector.broadcast %23 : vector<12x1xf32> to vector<12x128xf32>
    %25 = arith.addf %21, %24 : vector<12x128xf32>
    %cst_27 = arith.constant 0.000000e+00 : f32
    %26 = vector.broadcast %cst_27 : f32 to vector<12x128xf32>
    %27 = arith.cmpf ogt, %25, %26 : vector<12x128xf32>
    %cst_28 = arith.constant 0.00999999977 : f32
    %28 = vector.broadcast %cst_28 : f32 to vector<12x128xf32>
    %29 = arith.mulf %28, %25 : vector<12x128xf32>
    %30 = arith.select %27, %25, %29 : vector<12x128xi1>, vector<12x128xf32>
    %c0_29 = arith.constant 0 : index
    %c0_30 = arith.constant 0 : index
    %c0_31 = arith.constant 0 : index
    %c0_32 = arith.constant 0 : index
    %31 = vector.load %arg7[%c0_29, %c0_30, %c0_31, %c0_32] : memref<1x16x12x12xf32, #tpu.memory_space<vmem>>, vector<1x1x12x12xf32>
    %32 = vector.shape_cast %31 : vector<1x1x12x12xf32> to vector<12x12xf32>
    %cst_33 = arith.constant dense<0.000000e+00> : vector<12x128xf32>
    %33 = tpu.matmul %32, %30, %cst_33 {dimension_numbers = #tpu.dot_dimension_numbers<[1], [0], [0], [1], [0, 0, 1, 1], [], []>} : vector<12x12xf32>, vector<12x128xf32>, vector<12x128xf32> -> vector<12x128xf32>
    %c0_34 = arith.constant 0 : index
    %c0_35 = arith.constant 0 : index
    %c0_36 = arith.constant 0 : index
    %c0_37 = arith.constant 0 : index
    %34 = vector.load %arg8[%c0_34, %c0_35, %c0_36, %c0_37] : memref<1x16x12x1xf32, #tpu.memory_space<vmem>>, vector<1x1x12x1xf32>
    %35 = vector.shape_cast %34 : vector<1x1x12x1xf32> to vector<12x1xf32>
    %36 = vector.broadcast %35 : vector<12x1xf32> to vector<12x128xf32>
    %37 = arith.addf %33, %36 : vector<12x128xf32>
    %cst_38 = arith.constant 0.000000e+00 : f32
    %38 = vector.broadcast %cst_38 : f32 to vector<12x128xf32>
    %39 = arith.cmpf ogt, %37, %38 : vector<12x128xf32>
    %cst_39 = arith.constant 0.00999999977 : f32
    %40 = vector.broadcast %cst_39 : f32 to vector<12x128xf32>
    %41 = arith.mulf %40, %37 : vector<12x128xf32>
    %42 = arith.select %39, %37, %41 : vector<12x128xi1>, vector<12x128xf32>
    %c0_40 = arith.constant 0 : index
    %c0_41 = arith.constant 0 : index
    %c0_42 = arith.constant 0 : index
    %c0_43 = arith.constant 0 : index
    %43 = vector.load %arg9[%c0_40, %c0_41, %c0_42, %c0_43] : memref<1x16x1x12xf32, #tpu.memory_space<vmem>>, vector<1x1x1x12xf32>
    %44 = vector.shape_cast %43 : vector<1x1x1x12xf32> to vector<1x12xf32>
    %cst_44 = arith.constant dense<0.000000e+00> : vector<1x128xf32>
    %45 = tpu.matmul %44, %42, %cst_44 {dimension_numbers = #tpu.dot_dimension_numbers<[1], [0], [0], [1], [0, 0, 1, 1], [], []>} : vector<1x12xf32>, vector<12x128xf32>, vector<1x128xf32> -> vector<1x128xf32>
    %c0_45 = arith.constant 0 : index
    %c0_46 = arith.constant 0 : index
    %c0_47 = arith.constant 0 : index
    %c0_48 = arith.constant 0 : index
    %46 = vector.load %arg10[%c0_45, %c0_46, %c0_47, %c0_48] : memref<1x16x1x1xf32, #tpu.memory_space<vmem>>, vector<1x1x1x1xf32>
    %47 = vector.shape_cast %46 : vector<1x1x1x1xf32> to vector<1x1xf32>
    %48 = vector.broadcast %47 : vector<1x1xf32> to vector<1x128xf32>
    %49 = arith.addf %45, %48 : vector<1x128xf32>
    %cst_49 = arith.constant -1.000000e+00 : f32
    %cst_50 = arith.constant 1.000000e+00 : f32
    %50 = vector.broadcast %cst_49 : f32 to vector<1x128xf32>
    %51 = arith.maximumf %50, %49 : vector<1x128xf32>
    %52 = vector.broadcast %cst_50 : f32 to vector<1x128xf32>
    %53 = arith.minimumf %52, %51 : vector<1x128xf32>
    %54 = vector.extract_strided_slice %6 {offsets = [0, 0], sizes = [1, 128], strides = [1, 1]} : vector<16x128xf32> to vector<1x128xf32>
    %55 = arith.subf %54, %53 : vector<1x128xf32>
    %cst_51 = arith.constant 1.000000e+00 : f32
    %56 = vector.broadcast %cst_51 : f32 to vector<1x128xf32>
    %57 = arith.cmpf oge, %55, %56 : vector<1x128xf32>
    %cst_52 = arith.constant 2.000000e+00 : f32
    %cst_53 = arith.constant 0.000000e+00 : f32
    %58 = vector.broadcast %cst_52 : f32 to vector<1x128xf32>
    %59 = vector.broadcast %cst_53 : f32 to vector<1x128xf32>
    %60 = arith.select %57, %58, %59 : vector<1x128xi1>, vector<1x128xf32>
    %61 = arith.subf %55, %60 : vector<1x128xf32>
    %c0_54 = arith.constant 0 : index
    %c0_55 = arith.constant 0 : index
    %c0_56 = arith.constant 0 : index
    %62 = vector.load %arg11[%c0_54, %c0_55, %c0_56] : memref<1x16x128xf32, #tpu.memory_space<vmem>>, vector<1x1x128xf32>
    %63 = vector.shape_cast %62 : vector<1x1x128xf32> to vector<1x128xf32>
    %64 = vector.shape_cast %61 : vector<1x128xf32> to vector<1x1x128xf32>
    tpu.vector_store %arg11[%c0_54, %c0_55, %c0_56], %64 {strides = array<i32>} : memref<1x16x128xf32, #tpu.memory_space<vmem>>, vector<1x1x128xf32>,
    %c0_57 = arith.constant 0 : index
    %c0_58 = arith.constant 0 : index
    %c0_59 = arith.constant 0 : index
    %65 = vector.load %arg11[%c0_57, %c0_58, %c0_59] : memref<1x16x128xf32, #tpu.memory_space<vmem>>, vector<1x16x128xf32>
    %66 = vector.shape_cast %65 : vector<1x16x128xf32> to vector<16x128xf32>
    %c0_60 = arith.constant 0 : index
    %c1 = arith.constant 1 : index
    %c0_61 = arith.constant 0 : index
    %c0_62 = arith.constant 0 : index
    %67 = vector.load %arg3[%c0_60, %c1, %c0_61, %c0_62] : memref<1x16x12x16xf32, #tpu.memory_space<vmem>>, vector<1x1x12x16xf32>
    %68 = vector.shape_cast %67 : vector<1x1x12x16xf32> to vector<12x16xf32>
    %cst_63 = arith.constant dense<0.000000e+00> : vector<12x128xf32>
    %69 = tpu.matmul %68, %66, %cst_63 {dimension_numbers = #tpu.dot_dimension_numbers<[1], [0], [0], [1], [0, 0, 1, 1], [], []>} : vector<12x16xf32>, vector<16x128xf32>, vector<12x128xf32> -> vector<12x128xf32>
    %c0_64 = arith.constant 0 : index
    %c1_65 = arith.constant 1 : index
    %c0_66 = arith.constant 0 : index
    %c0_67 = arith.constant 0 : index
    %70 = vector.load %arg4[%c0_64, %c1_65, %c0_66, %c0_67] : memref<1x16x12x1xf32, #tpu.memory_space<vmem>>, vector<1x1x12x1xf32>
    %71 = vector.shape_cast %70 : vector<1x1x12x1xf32> to vector<12x1xf32>
    %72 = vector.broadcast %71 : vector<12x1xf32> to vector<12x128xf32>
    %73 = arith.addf %69, %72 : vector<12x128xf32>
    %cst_68 = arith.constant 0.000000e+00 : f32
    %74 = vector.broadcast %cst_68 : f32 to vector<12x128xf32>
    %75 = arith.cmpf ogt, %73, %74 : vector<12x128xf32>
    %cst_69 = arith.constant 0.00999999977 : f32
    %76 = vector.broadcast %cst_69 : f32 to vector<12x128xf32>
    %77 = arith.mulf %76, %73 : vector<12x128xf32>
    %78 = arith.select %75, %73, %77 : vector<12x128xi1>, vector<12x128xf32>
    %c0_70 = arith.constant 0 : index
    %c1_71 = arith.constant 1 : index
    %c0_72 = arith.constant 0 : index
    %c0_73 = arith.constant 0 : index
    %79 = vector.load %arg5[%c0_70, %c1_71, %c0_72, %c0_73] : memref<1x16x12x12xf32, #tpu.memory_space<vmem>>, vector<1x1x12x12xf32>
    %80 = vector.shape_cast %79 : vector<1x1x12x12xf32> to vector<12x12xf32>
    %cst_74 = arith.constant dense<0.000000e+00> : vector<12x128xf32>
    %81 = tpu.matmul %80, %78, %cst_74 {dimension_numbers = #tpu.dot_dimension_numbers<[1], [0], [0], [1], [0, 0, 1, 1], [], []>} : vector<12x12xf32>, vector<12x128xf32>, vector<12x128xf32> -> vector<12x128xf32>
    %c0_75 = arith.constant 0 : index
    %c1_76 = arith.constant 1 : index
    %c0_77 = arith.constant 0 : index
    %c0_78 = arith.constant 0 : index
    %82 = vector.load %arg6[%c0_75, %c1_76, %c0_77, %c0_78] : memref<1x16x12x1xf32, #tpu.memory_space<vmem>>, vector<1x1x12x1xf32>
    %83 = vector.shape_cast %82 : vector<1x1x12x1xf32> to vector<12x1xf32>
    %84 = vector.broadcast %83 : vector<12x1xf32> to vector<12x128xf32>
    %85 = arith.addf %81, %84 : vector<12x128xf32>
    %cst_79 = arith.constant 0.000000e+00 : f32
    %86 = vector.broadcast %cst_79 : f32 to vector<12x128xf32>
    %87 = arith.cmpf ogt, %85, %86 : vector<12x128xf32>
    %cst_80 = arith.constant 0.00999999977 : f32
    %88 = vector.broadcast %cst_80 : f32 to vector<12x128xf32>
    %89 = arith.mulf %88, %85 : vector<12x128xf32>
    %90 = arith.select %87, %85, %89 : vector<12x128xi1>, vector<12x128xf32>
    %c0_81 = arith.constant 0 : index
    %c1_82 = arith.constant 1 : index
    %c0_83 = arith.constant 0 : index
    %c0_84 = arith.constant 0 : index
    %91 = vector.load %arg7[%c0_81, %c1_82, %c0_83, %c0_84] : memref<1x16x12x12xf32, #tpu.memory_space<vmem>>, vector<1x1x12x12xf32>
    %92 = vector.shape_cast %91 : vector<1x1x12x12xf32> to vector<12x12xf32>
    %cst_85 = arith.constant dense<0.000000e+00> : vector<12x128xf32>
    %93 = tpu.matmul %92, %90, %cst_85 {dimension_numbers = #tpu.dot_dimension_numbers<[1], [0], [0], [1], [0, 0, 1, 1], [], []>} : vector<12x12xf32>, vector<12x128xf32>, vector<12x128xf32> -> vector<12x128xf32>
    %c0_86 = arith.constant 0 : index
    %c1_87 = arith.constant 1 : index
    %c0_88 = arith.constant 0 : index
    %c0_89 = arith.constant 0 : index
    %94 = vector.load %arg8[%c0_86, %c1_87, %c0_88, %c0_89] : memref<1x16x12x1xf32, #tpu.memory_space<vmem>>, vector<1x1x12x1xf32>
    %95 = vector.shape_cast %94 : vector<1x1x12x1xf32> to vector<12x1xf32>
    %96 = vector.broadcast %95 : vector<12x1xf32> to vector<12x128xf32>
    %97 = arith.addf %93, %96 : vector<12x128xf32>
    %cst_90 = arith.constant 0.000000e+00 : f32
    %98 = vector.broadcast %cst_90 : f32 to vector<12x128xf32>
    %99 = arith.cmpf ogt, %97, %98 : vector<12x128xf32>
    %cst_91 = arith.constant 0.00999999977 : f32
    %100 = vector.broadcast %cst_91 : f32 to vector<12x128xf32>
    %101 = arith.mulf %100, %97 : vector<12x128xf32>
    %102 = arith.select %99, %97, %101 : vector<12x128xi1>, vector<12x128xf32>
    %c0_92 = arith.constant 0 : index
    %c1_93 = arith.constant 1 : index
    %c0_94 = arith.constant 0 : index
    %c0_95 = arith.constant 0 : index
    %103 = vector.load %arg9[%c0_92, %c1_93, %c0_94, %c0_95] : memref<1x16x1x12xf32, #tpu.memory_space<vmem>>, vector<1x1x1x12xf32>
    %104 = vector.shape_cast %103 : vector<1x1x1x12xf32> to vector<1x12xf32>
    %cst_96 = arith.constant dense<0.000000e+00> : vector<1x128xf32>
    %105 = tpu.matmul %104, %102, %cst_96 {dimension_numbers = #tpu.dot_dimension_numbers<[1], [0], [0], [1], [0, 0, 1, 1], [], []>} : vector<1x12xf32>, vector<12x128xf32>, vector<1x128xf32> -> vector<1x128xf32>
    %c0_97 = arith.constant 0 : index
    %c1_98 = arith.constant 1 : index
    %c0_99 = arith.constant 0 : index
    %c0_100 = arith.constant 0 : index
    %106 = vector.load %arg10[%c0_97, %c1_98, %c0_99, %c0_100] : memref<1x16x1x1xf32, #tpu.memory_space<vmem>>, vector<1x1x1x1xf32>
    %107 = vector.shape_cast %106 : vector<1x1x1x1xf32> to vector<1x1xf32>
    %108 = vector.broadcast %107 : vector<1x1xf32> to vector<1x128xf32>
    %109 = arith.addf %105, %108 : vector<1x128xf32>
    %cst_101 = arith.constant -1.000000e+00 : f32
    %cst_102 = arith.constant 1.000000e+00 : f32
    %110 = vector.broadcast %cst_101 : f32 to vector<1x128xf32>
    %111 = arith.maximumf %110, %109 : vector<1x128xf32>
    %112 = vector.broadcast %cst_102 : f32 to vector<1x128xf32>
    %113 = arith.minimumf %112, %111 : vector<1x128xf32>
    %114 = vector.extract_strided_slice %66 {offsets = [1, 0], sizes = [1, 128], strides = [1, 1]} : vector<16x128xf32> to vector<1x128xf32>
    %115 = arith.subf %114, %113 : vector<1x128xf32>
    %cst_103 = arith.constant 1.000000e+00 : f32
    %116 = vector.broadcast %cst_103 : f32 to vector<1x128xf32>
    %117 = arith.cmpf oge, %115, %116 : vector<1x128xf32>
    %cst_104 = arith.constant 2.000000e+00 : f32
    %cst_105 = arith.constant 0.000000e+00 : f32
    %118 = vector.broadcast %cst_104 : f32 to vector<1x128xf32>
    %119 = vector.broadcast %cst_105 : f32 to vector<1x128xf32>
    %120 = arith.select %117, %118, %119 : vector<1x128xi1>, vector<1x128xf32>
    %121 = arith.subf %115, %120 : vector<1x128xf32>
    %c0_106 = arith.constant 0 : index
    %c1_107 = arith.constant 1 : index
    %c0_108 = arith.constant 0 : index
    %122 = vector.load %arg11[%c0_106, %c1_107, %c0_108] : memref<1x16x128xf32, #tpu.memory_space<vmem>>, vector<1x1x128xf32>
    %123 = vector.shape_cast %122 : vector<1x1x128xf32> to vector<1x128xf32>
    %124 = vector.shape_cast %121 : vector<1x128xf32> to vector<1x1x128xf32>
    tpu.vector_store %arg11[%c0_106, %c1_107, %c0_108], %124 {strides = array<i32>} : memref<1x16x128xf32, #tpu.memory_space<vmem>>, vector<1x1x128xf32>,
    %c0_109 = arith.constant 0 : index
    %c0_110 = arith.constant 0 : index
    %c0_111 = arith.constant 0 : index
    %125 = vector.load %arg11[%c0_109, %c0_110, %c0_111] : memref<1x16x128xf32, #tpu.memory_space<vmem>>, vector<1x16x128xf32>
    %126 = vector.shape_cast %125 : vector<1x16x128xf32> to vector<16x128xf32>
    %c0_112 = arith.constant 0 : index
    %c2 = arith.constant 2 : index
    %c0_113 = arith.constant 0 : index
    %c0_114 = arith.constant 0 : index
    %127 = vector.load %arg3[%c0_112, %c2, %c0_113, %c0_114] : memref<1x16x12x16xf32, #tpu.memory_space<vmem>>, vector<1x1x12x16xf32>
    %128 = vector.shape_cast %127 : vector<1x1x12x16xf32> to vector<12x16xf32>
    %cst_115 = arith.constant dense<0.000000e+00> : vector<12x128xf32>
    %129 = tpu.matmul %128, %126, %cst_115 {dimension_numbers = #tpu.dot_dimension_numbers<[1], [0], [0], [1], [0, 0, 1, 1], [], []>} : vector<12x16xf32>, vector<16x128xf32>, vector<12x128xf32> -> vector<12x128xf32>
    %c0_116 = arith.constant 0 : index
    %c2_117 = arith.constant 2 : index
    %c0_118 = arith.constant 0 : index
    %c0_119 = arith.constant 0 : index
    %130 = vector.load %arg4[%c0_116, %c2_117, %c0_118, %c0_119] : memref<1x16x12x1xf32, #tpu.memory_space<vmem>>, vector<1x1x12x1xf32>
    %131 = vector.shape_cast %130 : vector<1x1x12x1xf32> to vector<12x1xf32>
    %132 = vector.broadcast %131 : vector<12x1xf32> to vector<12x128xf32>
    %133 = arith.addf %129, %132 : vector<12x128xf32>
    %cst_120 = arith.constant 0.000000e+00 : f32
    %134 = vector.broadcast %cst_120 : f32 to vector<12x128xf32>
    %135 = arith.cmpf ogt, %133, %134 : vector<12x128xf32>
    %cst_121 = arith.constant 0.00999999977 : f32
    %136 = vector.broadcast %cst_121 : f32 to vector<12x128xf32>
    %137 = arith.mulf %136, %133 : vector<12x128xf32>
    %138 = arith.select %135, %133, %137 : vector<12x128xi1>, vector<12x128xf32>
    %c0_122 = arith.constant 0 : index
    %c2_123 = arith.constant 2 : index
    %c0_124 = arith.constant 0 : index
    %c0_125 = arith.constant 0 : index
    %139 = vector.load %arg5[%c0_122, %c2_123, %c0_124, %c0_125] : memref<1x16x12x12xf32, #tpu.memory_space<vmem>>, vector<1x1x12x12xf32>
    %140 = vector.shape_cast %139 : vector<1x1x12x12xf32> to vector<12x12xf32>
    %cst_126 = arith.constant dense<0.000000e+00> : vector<12x128xf32>
    %141 = tpu.matmul %140, %138, %cst_126 {dimension_numbers = #tpu.dot_dimension_numbers<[1], [0], [0], [1], [0, 0, 1, 1], [], []>} : vector<12x12xf32>, vector<12x128xf32>, vector<12x128xf32> -> vector<12x128xf32>
    %c0_127 = arith.constant 0 : index
    %c2_128 = arith.constant 2 : index
    %c0_129 = arith.constant 0 : index
    %c0_130 = arith.constant 0 : index
    %142 = vector.load %arg6[%c0_127, %c2_128, %c0_129, %c0_130] : memref<1x16x12x1xf32, #tpu.memory_space<vmem>>, vector<1x1x12x1xf32>
    %143 = vector.shape_cast %142 : vector<1x1x12x1xf32> to vector<12x1xf32>
    %144 = vector.broadcast %143 : vector<12x1xf32> to vector<12x128xf32>
    %145 = arith.addf %141, %144 : vector<12x128xf32>
    %cst_131 = arith.constant 0.000000e+00 : f32
    %146 = vector.broadcast %cst_131 : f32 to vector<12x128xf32>
    %147 = arith.cmpf ogt, %145, %146 : vector<12x128xf32>
    %cst_132 = arith.constant 0.00999999977 : f32
    %148 = vector.broadcast %cst_132 : f32 to vector<12x128xf32>
    %149 = arith.mulf %148, %145 : vector<12x128xf32>
    %150 = arith.select %147, %145, %149 : vector<12x128xi1>, vector<12x128xf32>
    %c0_133 = arith.constant 0 : index
    %c2_134 = arith.constant 2 : index
    %c0_135 = arith.constant 0 : index
    %c0_136 = arith.constant 0 : index
    %151 = vector.load %arg7[%c0_133, %c2_134, %c0_135, %c0_136] : memref<1x16x12x12xf32, #tpu.memory_space<vmem>>, vector<1x1x12x12xf32>
    %152 = vector.shape_cast %151 : vector<1x1x12x12xf32> to vector<12x12xf32>
    %cst_137 = arith.constant dense<0.000000e+00> : vector<12x128xf32>
    %153 = tpu.matmul %152, %150, %cst_137 {dimension_numbers = #tpu.dot_dimension_numbers<[1], [0], [0], [1], [0, 0, 1, 1], [], []>} : vector<12x12xf32>, vector<12x128xf32>, vector<12x128xf32> -> vector<12x128xf32>
    %c0_138 = arith.constant 0 : index
    %c2_139 = arith.constant 2 : index
    %c0_140 = arith.constant 0 : index
    %c0_141 = arith.constant 0 : index
    %154 = vector.load %arg8[%c0_138, %c2_139, %c0_140, %c0_141] : memref<1x16x12x1xf32, #tpu.memory_space<vmem>>, vector<1x1x12x1xf32>
    %155 = vector.shape_cast %154 : vector<1x1x12x1xf32> to vector<12x1xf32>
    %156 = vector.broadcast %155 : vector<12x1xf32> to vector<12x128xf32>
    %157 = arith.addf %153, %156 : vector<12x128xf32>
    %cst_142 = arith.constant 0.000000e+00 : f32
    %158 = vector.broadcast %cst_142 : f32 to vector<12x128xf32>
    %159 = arith.cmpf ogt, %157, %158 : vector<12x128xf32>
    %cst_143 = arith.constant 0.00999999977 : f32
    %160 = vector.broadcast %cst_143 : f32 to vector<12x128xf32>
    %161 = arith.mulf %160, %157 : vector<12x128xf32>
    %162 = arith.select %159, %157, %161 : vector<12x128xi1>, vector<12x128xf32>
    %c0_144 = arith.constant 0 : index
    %c2_145 = arith.constant 2 : index
    %c0_146 = arith.constant 0 : index
    %c0_147 = arith.constant 0 : index
    %163 = vector.load %arg9[%c0_144, %c2_145, %c0_146, %c0_147] : memref<1x16x1x12xf32, #tpu.memory_space<vmem>>, vector<1x1x1x12xf32>
    %164 = vector.shape_cast %163 : vector<1x1x1x12xf32> to vector<1x12xf32>
    %cst_148 = arith.constant dense<0.000000e+00> : vector<1x128xf32>
    %165 = tpu.matmul %164, %162, %cst_148 {dimension_numbers = #tpu.dot_dimension_numbers<[1], [0], [0], [1], [0, 0, 1, 1], [], []>} : vector<1x12xf32>, vector<12x128xf32>, vector<1x128xf32> -> vector<1x128xf32>
    %c0_149 = arith.constant 0 : index
    %c2_150 = arith.constant 2 : index
    %c0_151 = arith.constant 0 : index
    %c0_152 = arith.constant 0 : index
    %166 = vector.load %arg10[%c0_149, %c2_150, %c0_151, %c0_152] : memref<1x16x1x1xf32, #tpu.memory_space<vmem>>, vector<1x1x1x1xf32>
    %167 = vector.shape_cast %166 : vector<1x1x1x1xf32> to vector<1x1xf32>
    %168 = vector.broadcast %167 : vector<1x1xf32> to vector<1x128xf32>
    %169 = arith.addf %165, %168 : vector<1x128xf32>
    %cst_153 = arith.constant -1.000000e+00 : f32
    %cst_154 = arith.constant 1.000000e+00 : f32
    %170 = vector.broadcast %cst_153 : f32 to vector<1x128xf32>
    %171 = arith.maximumf %170, %169 : vector<1x128xf32>
    %172 = vector.broadcast %cst_154 : f32 to vector<1x128xf32>
    %173 = arith.minimumf %172, %171 : vector<1x128xf32>
    %174 = vector.extract_strided_slice %126 {offsets = [2, 0], sizes = [1, 128], strides = [1, 1]} : vector<16x128xf32> to vector<1x128xf32>
    %175 = arith.subf %174, %173 : vector<1x128xf32>
    %cst_155 = arith.constant 1.000000e+00 : f32
    %176 = vector.broadcast %cst_155 : f32 to vector<1x128xf32>
    %177 = arith.cmpf oge, %175, %176 : vector<1x128xf32>
    %cst_156 = arith.constant 2.000000e+00 : f32
    %cst_157 = arith.constant 0.000000e+00 : f32
    %178 = vector.broadcast %cst_156 : f32 to vector<1x128xf32>
    %179 = vector.broadcast %cst_157 : f32 to vector<1x128xf32>
    %180 = arith.select %177, %178, %179 : vector<1x128xi1>, vector<1x128xf32>
    %181 = arith.subf %175, %180 : vector<1x128xf32>
    %c0_158 = arith.constant 0 : index
    %c2_159 = arith.constant 2 : index
    %c0_160 = arith.constant 0 : index
    %182 = vector.load %arg11[%c0_158, %c2_159, %c0_160] : memref<1x16x128xf32, #tpu.memory_space<vmem>>, vector<1x1x128xf32>
    %183 = vector.shape_cast %182 : vector<1x1x128xf32> to vector<1x128xf32>
    %184 = vector.shape_cast %181 : vector<1x128xf32> to vector<1x1x128xf32>
    tpu.vector_store %arg11[%c0_158, %c2_159, %c0_160], %184 {strides = array<i32>} : memref<1x16x128xf32, #tpu.memory_space<vmem>>, vector<1x1x128xf32>,
    %c0_161 = arith.constant 0 : index
    %c0_162 = arith.constant 0 : index
    %c0_163 = arith.constant 0 : index
    %185 = vector.load %arg11[%c0_161, %c0_162, %c0_163] : memref<1x16x128xf32, #tpu.memory_space<vmem>>, vector<1x16x128xf32>
    %186 = vector.shape_cast %185 : vector<1x16x128xf32> to vector<16x128xf32>
    %c0_164 = arith.constant 0 : index
    %c3 = arith.constant 3 : index
    %c0_165 = arith.constant 0 : index
    %c0_166 = arith.constant 0 : index
    %187 = vector.load %arg3[%c0_164, %c3, %c0_165, %c0_166] : memref<1x16x12x16xf32, #tpu.memory_space<vmem>>, vector<1x1x12x16xf32>
    %188 = vector.shape_cast %187 : vector<1x1x12x16xf32> to vector<12x16xf32>
    %cst_167 = arith.constant dense<0.000000e+00> : vector<12x128xf32>
    %189 = tpu.matmul %188, %186, %cst_167 {dimension_numbers = #tpu.dot_dimension_numbers<[1], [0], [0], [1], [0, 0, 1, 1], [], []>} : vector<12x16xf32>, vector<16x128xf32>, vector<12x128xf32> -> vector<12x128xf32>
    %c0_168 = arith.constant 0 : index
    %c3_169 = arith.constant 3 : index
    %c0_170 = arith.constant 0 : index
    %c0_171 = arith.constant 0 : index
    %190 = vector.load %arg4[%c0_168, %c3_169, %c0_170, %c0_171] : memref<1x16x12x1xf32, #tpu.memory_space<vmem>>, vector<1x1x12x1xf32>
    %191 = vector.shape_cast %190 : vector<1x1x12x1xf32> to vector<12x1xf32>
    %192 = vector.broadcast %191 : vector<12x1xf32> to vector<12x128xf32>
    %193 = arith.addf %189, %192 : vector<12x128xf32>
    %cst_172 = arith.constant 0.000000e+00 : f32
    %194 = vector.broadcast %cst_172 : f32 to vector<12x128xf32>
    %195 = arith.cmpf ogt, %193, %194 : vector<12x128xf32>
    %cst_173 = arith.constant 0.00999999977 : f32
    %196 = vector.broadcast %cst_173 : f32 to vector<12x128xf32>
    %197 = arith.mulf %196, %193 : vector<12x128xf32>
    %198 = arith.select %195, %193, %197 : vector<12x128xi1>, vector<12x128xf32>
    %c0_174 = arith.constant 0 : index
    %c3_175 = arith.constant 3 : index
    %c0_176 = arith.constant 0 : index
    %c0_177 = arith.constant 0 : index
    %199 = vector.load %arg5[%c0_174, %c3_175, %c0_176, %c0_177] : memref<1x16x12x12xf32, #tpu.memory_space<vmem>>, vector<1x1x12x12xf32>
    %200 = vector.shape_cast %199 : vector<1x1x12x12xf32> to vector<12x12xf32>
    %cst_178 = arith.constant dense<0.000000e+00> : vector<12x128xf32>
    %201 = tpu.matmul %200, %198, %cst_178 {dimension_numbers = #tpu.dot_dimension_numbers<[1], [0], [0], [1], [0, 0, 1, 1], [], []>} : vector<12x12xf32>, vector<12x128xf32>, vector<12x128xf32> -> vector<12x128xf32>
    %c0_179 = arith.constant 0 : index
    %c3_180 = arith.constant 3 : index
    %c0_181 = arith.constant 0 : index
    %c0_182 = arith.constant 0 : index
    %202 = vector.load %arg6[%c0_179, %c3_180, %c0_181, %c0_182] : memref<1x16x12x1xf32, #tpu.memory_space<vmem>>, vector<1x1x12x1xf32>
    %203 = vector.shape_cast %202 : vector<1x1x12x1xf32> to vector<12x1xf32>
    %204 = vector.broadcast %203 : vector<12x1xf32> to vector<12x128xf32>
    %205 = arith.addf %201, %204 : vector<12x128xf32>
    %cst_183 = arith.constant 0.000000e+00 : f32
    %206 = vector.broadcast %cst_183 : f32 to vector<12x128xf32>
    %207 = arith.cmpf ogt, %205, %206 : vector<12x128xf32>
    %cst_184 = arith.constant 0.00999999977 : f32
    %208 = vector.broadcast %cst_184 : f32 to vector<12x128xf32>
    %209 = arith.mulf %208, %205 : vector<12x128xf32>
    %210 = arith.select %207, %205, %209 : vector<12x128xi1>, vector<12x128xf32>
    %c0_185 = arith.constant 0 : index
    %c3_186 = arith.constant 3 : index
    %c0_187 = arith.constant 0 : index
    %c0_188 = arith.constant 0 : index
    %211 = vector.load %arg7[%c0_185, %c3_186, %c0_187, %c0_188] : memref<1x16x12x12xf32, #tpu.memory_space<vmem>>, vector<1x1x12x12xf32>
    %212 = vector.shape_cast %211 : vector<1x1x12x12xf32> to vector<12x12xf32>
    %cst_189 = arith.constant dense<0.000000e+00> : vector<12x128xf32>
    %213 = tpu.matmul %212, %210, %cst_189 {dimension_numbers = #tpu.dot_dimension_numbers<[1], [0], [0], [1], [0, 0, 1, 1], [], []>} : vector<12x12xf32>, vector<12x128xf32>, vector<12x128xf32> -> vector<12x128xf32>
    %c0_190 = arith.constant 0 : index
    %c3_191 = arith.constant 3 : index
    %c0_192 = arith.constant 0 : index
    %c0_193 = arith.constant 0 : index
    %214 = vector.load %arg8[%c0_190, %c3_191, %c0_192, %c0_193] : memref<1x16x12x1xf32, #tpu.memory_space<vmem>>, vector<1x1x12x1xf32>
    %215 = vector.shape_cast %214 : vector<1x1x12x1xf32> to vector<12x1xf32>
    %216 = vector.broadcast %215 : vector<12x1xf32> to vector<12x128xf32>
    %217 = arith.addf %213, %216 : vector<12x128xf32>
    %cst_194 = arith.constant 0.000000e+00 : f32
    %218 = vector.broadcast %cst_194 : f32 to vector<12x128xf32>
    %219 = arith.cmpf ogt, %217, %218 : vector<12x128xf32>
    %cst_195 = arith.constant 0.00999999977 : f32
    %220 = vector.broadcast %cst_195 : f32 to vector<12x128xf32>
    %221 = arith.mulf %220, %217 : vector<12x128xf32>
    %222 = arith.select %219, %217, %221 : vector<12x128xi1>, vector<12x128xf32>
    %c0_196 = arith.constant 0 : index
    %c3_197 = arith.constant 3 : index
    %c0_198 = arith.constant 0 : index
    %c0_199 = arith.constant 0 : index
    %223 = vector.load %arg9[%c0_196, %c3_197, %c0_198, %c0_199] : memref<1x16x1x12xf32, #tpu.memory_space<vmem>>, vector<1x1x1x12xf32>
    %224 = vector.shape_cast %223 : vector<1x1x1x12xf32> to vector<1x12xf32>
    %cst_200 = arith.constant dense<0.000000e+00> : vector<1x128xf32>
    %225 = tpu.matmul %224, %222, %cst_200 {dimension_numbers = #tpu.dot_dimension_numbers<[1], [0], [0], [1], [0, 0, 1, 1], [], []>} : vector<1x12xf32>, vector<12x128xf32>, vector<1x128xf32> -> vector<1x128xf32>
    %c0_201 = arith.constant 0 : index
    %c3_202 = arith.constant 3 : index
    %c0_203 = arith.constant 0 : index
    %c0_204 = arith.constant 0 : index
    %226 = vector.load %arg10[%c0_201, %c3_202, %c0_203, %c0_204] : memref<1x16x1x1xf32, #tpu.memory_space<vmem>>, vector<1x1x1x1xf32>
    %227 = vector.shape_cast %226 : vector<1x1x1x1xf32> to vector<1x1xf32>
    %228 = vector.broadcast %227 : vector<1x1xf32> to vector<1x128xf32>
    %229 = arith.addf %225, %228 : vector<1x128xf32>
    %cst_205 = arith.constant -1.000000e+00 : f32
    %cst_206 = arith.constant 1.000000e+00 : f32
    %230 = vector.broadcast %cst_205 : f32 to vector<1x128xf32>
    %231 = arith.maximumf %230, %229 : vector<1x128xf32>
    %232 = vector.broadcast %cst_206 : f32 to vector<1x128xf32>
    %233 = arith.minimumf %232, %231 : vector<1x128xf32>
    %234 = vector.extract_strided_slice %186 {offsets = [3, 0], sizes = [1, 128], strides = [1, 1]} : vector<16x128xf32> to vector<1x128xf32>
    %235 = arith.subf %234, %233 : vector<1x128xf32>
    %cst_207 = arith.constant 1.000000e+00 : f32
    %236 = vector.broadcast %cst_207 : f32 to vector<1x128xf32>
    %237 = arith.cmpf oge, %235, %236 : vector<1x128xf32>
    %cst_208 = arith.constant 2.000000e+00 : f32
    %cst_209 = arith.constant 0.000000e+00 : f32
    %238 = vector.broadcast %cst_208 : f32 to vector<1x128xf32>
    %239 = vector.broadcast %cst_209 : f32 to vector<1x128xf32>
    %240 = arith.select %237, %238, %239 : vector<1x128xi1>, vector<1x128xf32>
    %241 = arith.subf %235, %240 : vector<1x128xf32>
    %c0_210 = arith.constant 0 : index
    %c3_211 = arith.constant 3 : index
    %c0_212 = arith.constant 0 : index
    %242 = vector.load %arg11[%c0_210, %c3_211, %c0_212] : memref<1x16x128xf32, #tpu.memory_space<vmem>>, vector<1x1x128xf32>
    %243 = vector.shape_cast %242 : vector<1x1x128xf32> to vector<1x128xf32>
    %244 = vector.shape_cast %241 : vector<1x128xf32> to vector<1x1x128xf32>
    tpu.vector_store %arg11[%c0_210, %c3_211, %c0_212], %244 {strides = array<i32>} : memref<1x16x128xf32, #tpu.memory_space<vmem>>, vector<1x1x128xf32>,
    %c0_213 = arith.constant 0 : index
    %c0_214 = arith.constant 0 : index
    %c0_215 = arith.constant 0 : index
    %245 = vector.load %arg11[%c0_213, %c0_214, %c0_215] : memref<1x16x128xf32, #tpu.memory_space<vmem>>, vector<1x16x128xf32>
    %246 = vector.shape_cast %245 : vector<1x16x128xf32> to vector<16x128xf32>
    %c0_216 = arith.constant 0 : index
    %c4 = arith.constant 4 : index
    %c0_217 = arith.constant 0 : index
    %c0_218 = arith.constant 0 : index
    %247 = vector.load %arg3[%c0_216, %c4, %c0_217, %c0_218] : memref<1x16x12x16xf32, #tpu.memory_space<vmem>>, vector<1x1x12x16xf32>
    %248 = vector.shape_cast %247 : vector<1x1x12x16xf32> to vector<12x16xf32>
    %cst_219 = arith.constant dense<0.000000e+00> : vector<12x128xf32>
    %249 = tpu.matmul %248, %246, %cst_219 {dimension_numbers = #tpu.dot_dimension_numbers<[1], [0], [0], [1], [0, 0, 1, 1], [], []>} : vector<12x16xf32>, vector<16x128xf32>, vector<12x128xf32> -> vector<12x128xf32>
    %c0_220 = arith.constant 0 : index
    %c4_221 = arith.constant 4 : index
    %c0_222 = arith.constant 0 : index
    %c0_223 = arith.constant 0 : index
    %250 = vector.load %arg4[%c0_220, %c4_221, %c0_222, %c0_223] : memref<1x16x12x1xf32, #tpu.memory_space<vmem>>, vector<1x1x12x1xf32>
    %251 = vector.shape_cast %250 : vector<1x1x12x1xf32> to vector<12x1xf32>
    %252 = vector.broadcast %251 : vector<12x1xf32> to vector<12x128xf32>
    %253 = arith.addf %249, %252 : vector<12x128xf32>
    %cst_224 = arith.constant 0.000000e+00 : f32
    %254 = vector.broadcast %cst_224 : f32 to vector<12x128xf32>
    %255 = arith.cmpf ogt, %253, %254 : vector<12x128xf32>
    %cst_225 = arith.constant 0.00999999977 : f32
    %256 = vector.broadcast %cst_225 : f32 to vector<12x128xf32>
    %257 = arith.mulf %256, %253 : vector<12x128xf32>
    %258 = arith.select %255, %253, %257 : vector<12x128xi1>, vector<12x128xf32>
    %c0_226 = arith.constant 0 : index
    %c4_227 = arith.constant 4 : index
    %c0_228 = arith.constant 0 : index
    %c0_229 = arith.constant 0 : index
    %259 = vector.load %arg5[%c0_226, %c4_227, %c0_228, %c0_229] : memref<1x16x12x12xf32, #tpu.memory_space<vmem>>, vector<1x1x12x12xf32>
    %260 = vector.shape_cast %259 : vector<1x1x12x12xf32> to vector<12x12xf32>
    %cst_230 = arith.constant dense<0.000000e+00> : vector<12x128xf32>
    %261 = tpu.matmul %260, %258, %cst_230 {dimension_numbers = #tpu.dot_dimension_numbers<[1], [0], [0], [1], [0, 0, 1, 1], [], []>} : vector<12x12xf32>, vector<12x128xf32>, vector<12x128xf32> -> vector<12x128xf32>
    %c0_231 = arith.constant 0 : index
    %c4_232 = arith.constant 4 : index
    %c0_233 = arith.constant 0 : index
    %c0_234 = arith.constant 0 : index
    %262 = vector.load %arg6[%c0_231, %c4_232, %c0_233, %c0_234] : memref<1x16x12x1xf32, #tpu.memory_space<vmem>>, vector<1x1x12x1xf32>
    %263 = vector.shape_cast %262 : vector<1x1x12x1xf32> to vector<12x1xf32>
    %264 = vector.broadcast %263 : vector<12x1xf32> to vector<12x128xf32>
    %265 = arith.addf %261, %264 : vector<12x128xf32>
    %cst_235 = arith.constant 0.000000e+00 : f32
    %266 = vector.broadcast %cst_235 : f32 to vector<12x128xf32>
    %267 = arith.cmpf ogt, %265, %266 : vector<12x128xf32>
    %cst_236 = arith.constant 0.00999999977 : f32
    %268 = vector.broadcast %cst_236 : f32 to vector<12x128xf32>
    %269 = arith.mulf %268, %265 : vector<12x128xf32>
    %270 = arith.select %267, %265, %269 : vector<12x128xi1>, vector<12x128xf32>
    %c0_237 = arith.constant 0 : index
    %c4_238 = arith.constant 4 : index
    %c0_239 = arith.constant 0 : index
    %c0_240 = arith.constant 0 : index
    %271 = vector.load %arg7[%c0_237, %c4_238, %c0_239, %c0_240] : memref<1x16x12x12xf32, #tpu.memory_space<vmem>>, vector<1x1x12x12xf32>
    %272 = vector.shape_cast %271 : vector<1x1x12x12xf32> to vector<12x12xf32>
    %cst_241 = arith.constant dense<0.000000e+00> : vector<12x128xf32>
    %273 = tpu.matmul %272, %270, %cst_241 {dimension_numbers = #tpu.dot_dimension_numbers<[1], [0], [0], [1], [0, 0, 1, 1], [], []>} : vector<12x12xf32>, vector<12x128xf32>, vector<12x128xf32> -> vector<12x128xf32>
    %c0_242 = arith.constant 0 : index
    %c4_243 = arith.constant 4 : index
    %c0_244 = arith.constant 0 : index
    %c0_245 = arith.constant 0 : index
    %274 = vector.load %arg8[%c0_242, %c4_243, %c0_244, %c0_245] : memref<1x16x12x1xf32, #tpu.memory_space<vmem>>, vector<1x1x12x1xf32>
    %275 = vector.shape_cast %274 : vector<1x1x12x1xf32> to vector<12x1xf32>
    %276 = vector.broadcast %275 : vector<12x1xf32> to vector<12x128xf32>
    %277 = arith.addf %273, %276 : vector<12x128xf32>
    %cst_246 = arith.constant 0.000000e+00 : f32
    %278 = vector.broadcast %cst_246 : f32 to vector<12x128xf32>
    %279 = arith.cmpf ogt, %277, %278 : vector<12x128xf32>
    %cst_247 = arith.constant 0.00999999977 : f32
    %280 = vector.broadcast %cst_247 : f32 to vector<12x128xf32>
    %281 = arith.mulf %280, %277 : vector<12x128xf32>
    %282 = arith.select %279, %277, %281 : vector<12x128xi1>, vector<12x128xf32>
    %c0_248 = arith.constant 0 : index
    %c4_249 = arith.constant 4 : index
    %c0_250 = arith.constant 0 : index
    %c0_251 = arith.constant 0 : index
    %283 = vector.load %arg9[%c0_248, %c4_249, %c0_250, %c0_251] : memref<1x16x1x12xf32, #tpu.memory_space<vmem>>, vector<1x1x1x12xf32>
    %284 = vector.shape_cast %283 : vector<1x1x1x12xf32> to vector<1x12xf32>
    %cst_252 = arith.constant dense<0.000000e+00> : vector<1x128xf32>
    %285 = tpu.matmul %284, %282, %cst_252 {dimension_numbers = #tpu.dot_dimension_numbers<[1], [0], [0], [1], [0, 0, 1, 1], [], []>} : vector<1x12xf32>, vector<12x128xf32>, vector<1x128xf32> -> vector<1x128xf32>
    %c0_253 = arith.constant 0 : index
    %c4_254 = arith.constant 4 : index
    %c0_255 = arith.constant 0 : index
    %c0_256 = arith.constant 0 : index
    %286 = vector.load %arg10[%c0_253, %c4_254, %c0_255, %c0_256] : memref<1x16x1x1xf32, #tpu.memory_space<vmem>>, vector<1x1x1x1xf32>
    %287 = vector.shape_cast %286 : vector<1x1x1x1xf32> to vector<1x1xf32>
    %288 = vector.broadcast %287 : vector<1x1xf32> to vector<1x128xf32>
    %289 = arith.addf %285, %288 : vector<1x128xf32>
    %cst_257 = arith.constant -1.000000e+00 : f32
    %cst_258 = arith.constant 1.000000e+00 : f32
    %290 = vector.broadcast %cst_257 : f32 to vector<1x128xf32>
    %291 = arith.maximumf %290, %289 : vector<1x128xf32>
    %292 = vector.broadcast %cst_258 : f32 to vector<1x128xf32>
    %293 = arith.minimumf %292, %291 : vector<1x128xf32>
    %294 = vector.extract_strided_slice %246 {offsets = [4, 0], sizes = [1, 128], strides = [1, 1]} : vector<16x128xf32> to vector<1x128xf32>
    %295 = arith.subf %294, %293 : vector<1x128xf32>
    %cst_259 = arith.constant 1.000000e+00 : f32
    %296 = vector.broadcast %cst_259 : f32 to vector<1x128xf32>
    %297 = arith.cmpf oge, %295, %296 : vector<1x128xf32>
    %cst_260 = arith.constant 2.000000e+00 : f32
    %cst_261 = arith.constant 0.000000e+00 : f32
    %298 = vector.broadcast %cst_260 : f32 to vector<1x128xf32>
    %299 = vector.broadcast %cst_261 : f32 to vector<1x128xf32>
    %300 = arith.select %297, %298, %299 : vector<1x128xi1>, vector<1x128xf32>
    %301 = arith.subf %295, %300 : vector<1x128xf32>
    %c0_262 = arith.constant 0 : index
    %c4_263 = arith.constant 4 : index
    %c0_264 = arith.constant 0 : index
    %302 = vector.load %arg11[%c0_262, %c4_263, %c0_264] : memref<1x16x128xf32, #tpu.memory_space<vmem>>, vector<1x1x128xf32>
    %303 = vector.shape_cast %302 : vector<1x1x128xf32> to vector<1x128xf32>
    %304 = vector.shape_cast %301 : vector<1x128xf32> to vector<1x1x128xf32>
    tpu.vector_store %arg11[%c0_262, %c4_263, %c0_264], %304 {strides = array<i32>} : memref<1x16x128xf32, #tpu.memory_space<vmem>>, vector<1x1x128xf32>,
    %c0_265 = arith.constant 0 : index
    %c0_266 = arith.constant 0 : index
    %c0_267 = arith.constant 0 : index
    %305 = vector.load %arg11[%c0_265, %c0_266, %c0_267] : memref<1x16x128xf32, #tpu.memory_space<vmem>>, vector<1x16x128xf32>
    %306 = vector.shape_cast %305 : vector<1x16x128xf32> to vector<16x128xf32>
    %c0_268 = arith.constant 0 : index
    %c5 = arith.constant 5 : index
    %c0_269 = arith.constant 0 : index
    %c0_270 = arith.constant 0 : index
    %307 = vector.load %arg3[%c0_268, %c5, %c0_269, %c0_270] : memref<1x16x12x16xf32, #tpu.memory_space<vmem>>, vector<1x1x12x16xf32>
    %308 = vector.shape_cast %307 : vector<1x1x12x16xf32> to vector<12x16xf32>
    %cst_271 = arith.constant dense<0.000000e+00> : vector<12x128xf32>
    %309 = tpu.matmul %308, %306, %cst_271 {dimension_numbers = #tpu.dot_dimension_numbers<[1], [0], [0], [1], [0, 0, 1, 1], [], []>} : vector<12x16xf32>, vector<16x128xf32>, vector<12x128xf32> -> vector<12x128xf32>
    %c0_272 = arith.constant 0 : index
    %c5_273 = arith.constant 5 : index
    %c0_274 = arith.constant 0 : index
    %c0_275 = arith.constant 0 : index
    %310 = vector.load %arg4[%c0_272, %c5_273, %c0_274, %c0_275] : memref<1x16x12x1xf32, #tpu.memory_space<vmem>>, vector<1x1x12x1xf32>
    %311 = vector.shape_cast %310 : vector<1x1x12x1xf32> to vector<12x1xf32>
    %312 = vector.broadcast %311 : vector<12x1xf32> to vector<12x128xf32>
    %313 = arith.addf %309, %312 : vector<12x128xf32>
    %cst_276 = arith.constant 0.000000e+00 : f32
    %314 = vector.broadcast %cst_276 : f32 to vector<12x128xf32>
    %315 = arith.cmpf ogt, %313, %314 : vector<12x128xf32>
    %cst_277 = arith.constant 0.00999999977 : f32
    %316 = vector.broadcast %cst_277 : f32 to vector<12x128xf32>
    %317 = arith.mulf %316, %313 : vector<12x128xf32>
    %318 = arith.select %315, %313, %317 : vector<12x128xi1>, vector<12x128xf32>
    %c0_278 = arith.constant 0 : index
    %c5_279 = arith.constant 5 : index
    %c0_280 = arith.constant 0 : index
    %c0_281 = arith.constant 0 : index
    %319 = vector.load %arg5[%c0_278, %c5_279, %c0_280, %c0_281] : memref<1x16x12x12xf32, #tpu.memory_space<vmem>>, vector<1x1x12x12xf32>
    %320 = vector.shape_cast %319 : vector<1x1x12x12xf32> to vector<12x12xf32>
    %cst_282 = arith.constant dense<0.000000e+00> : vector<12x128xf32>
    %321 = tpu.matmul %320, %318, %cst_282 {dimension_numbers = #tpu.dot_dimension_numbers<[1], [0], [0], [1], [0, 0, 1, 1], [], []>} : vector<12x12xf32>, vector<12x128xf32>, vector<12x128xf32> -> vector<12x128xf32>
    %c0_283 = arith.constant 0 : index
    %c5_284 = arith.constant 5 : index
    %c0_285 = arith.constant 0 : index
    %c0_286 = arith.constant 0 : index
    %322 = vector.load %arg6[%c0_283, %c5_284, %c0_285, %c0_286] : memref<1x16x12x1xf32, #tpu.memory_space<vmem>>, vector<1x1x12x1xf32>
    %323 = vector.shape_cast %322 : vector<1x1x12x1xf32> to vector<12x1xf32>
    %324 = vector.broadcast %323 : vector<12x1xf32> to vector<12x128xf32>
    %325 = arith.addf %321, %324 : vector<12x128xf32>
    %cst_287 = arith.constant 0.000000e+00 : f32
    %326 = vector.broadcast %cst_287 : f32 to vector<12x128xf32>
    %327 = arith.cmpf ogt, %325, %326 : vector<12x128xf32>
    %cst_288 = arith.constant 0.00999999977 : f32
    %328 = vector.broadcast %cst_288 : f32 to vector<12x128xf32>
    %329 = arith.mulf %328, %325 : vector<12x128xf32>
    %330 = arith.select %327, %325, %329 : vector<12x128xi1>, vector<12x128xf32>
    %c0_289 = arith.constant 0 : index
    %c5_290 = arith.constant 5 : index
    %c0_291 = arith.constant 0 : index
    %c0_292 = arith.constant 0 : index
    %331 = vector.load %arg7[%c0_289, %c5_290, %c0_291, %c0_292] : memref<1x16x12x12xf32, #tpu.memory_space<vmem>>, vector<1x1x12x12xf32>
    %332 = vector.shape_cast %331 : vector<1x1x12x12xf32> to vector<12x12xf32>
    %cst_293 = arith.constant dense<0.000000e+00> : vector<12x128xf32>
    %333 = tpu.matmul %332, %330, %cst_293 {dimension_numbers = #tpu.dot_dimension_numbers<[1], [0], [0], [1], [0, 0, 1, 1], [], []>} : vector<12x12xf32>, vector<12x128xf32>, vector<12x128xf32> -> vector<12x128xf32>
    %c0_294 = arith.constant 0 : index
    %c5_295 = arith.constant 5 : index
    %c0_296 = arith.constant 0 : index
    %c0_297 = arith.constant 0 : index
    %334 = vector.load %arg8[%c0_294, %c5_295, %c0_296, %c0_297] : memref<1x16x12x1xf32, #tpu.memory_space<vmem>>, vector<1x1x12x1xf32>
    %335 = vector.shape_cast %334 : vector<1x1x12x1xf32> to vector<12x1xf32>
    %336 = vector.broadcast %335 : vector<12x1xf32> to vector<12x128xf32>
    %337 = arith.addf %333, %336 : vector<12x128xf32>
    %cst_298 = arith.constant 0.000000e+00 : f32
    %338 = vector.broadcast %cst_298 : f32 to vector<12x128xf32>
    %339 = arith.cmpf ogt, %337, %338 : vector<12x128xf32>
    %cst_299 = arith.constant 0.00999999977 : f32
    %340 = vector.broadcast %cst_299 : f32 to vector<12x128xf32>
    %341 = arith.mulf %340, %337 : vector<12x128xf32>
    %342 = arith.select %339, %337, %341 : vector<12x128xi1>, vector<12x128xf32>
    %c0_300 = arith.constant 0 : index
    %c5_301 = arith.constant 5 : index
    %c0_302 = arith.constant 0 : index
    %c0_303 = arith.constant 0 : index
    %343 = vector.load %arg9[%c0_300, %c5_301, %c0_302, %c0_303] : memref<1x16x1x12xf32, #tpu.memory_space<vmem>>, vector<1x1x1x12xf32>
    %344 = vector.shape_cast %343 : vector<1x1x1x12xf32> to vector<1x12xf32>
    %cst_304 = arith.constant dense<0.000000e+00> : vector<1x128xf32>
    %345 = tpu.matmul %344, %342, %cst_304 {dimension_numbers = #tpu.dot_dimension_numbers<[1], [0], [0], [1], [0, 0, 1, 1], [], []>} : vector<1x12xf32>, vector<12x128xf32>, vector<1x128xf32> -> vector<1x128xf32>
    %c0_305 = arith.constant 0 : index
    %c5_306 = arith.constant 5 : index
    %c0_307 = arith.constant 0 : index
    %c0_308 = arith.constant 0 : index
    %346 = vector.load %arg10[%c0_305, %c5_306, %c0_307, %c0_308] : memref<1x16x1x1xf32, #tpu.memory_space<vmem>>, vector<1x1x1x1xf32>
    %347 = vector.shape_cast %346 : vector<1x1x1x1xf32> to vector<1x1xf32>
    %348 = vector.broadcast %347 : vector<1x1xf32> to vector<1x128xf32>
    %349 = arith.addf %345, %348 : vector<1x128xf32>
    %cst_309 = arith.constant -1.000000e+00 : f32
    %cst_310 = arith.constant 1.000000e+00 : f32
    %350 = vector.broadcast %cst_309 : f32 to vector<1x128xf32>
    %351 = arith.maximumf %350, %349 : vector<1x128xf32>
    %352 = vector.broadcast %cst_310 : f32 to vector<1x128xf32>
    %353 = arith.minimumf %352, %351 : vector<1x128xf32>
    %354 = vector.extract_strided_slice %306 {offsets = [5, 0], sizes = [1, 128], strides = [1, 1]} : vector<16x128xf32> to vector<1x128xf32>
    %355 = arith.subf %354, %353 : vector<1x128xf32>
    %cst_311 = arith.constant 1.000000e+00 : f32
    %356 = vector.broadcast %cst_311 : f32 to vector<1x128xf32>
    %357 = arith.cmpf oge, %355, %356 : vector<1x128xf32>
    %cst_312 = arith.constant 2.000000e+00 : f32
    %cst_313 = arith.constant 0.000000e+00 : f32
    %358 = vector.broadcast %cst_312 : f32 to vector<1x128xf32>
    %359 = vector.broadcast %cst_313 : f32 to vector<1x128xf32>
    %360 = arith.select %357, %358, %359 : vector<1x128xi1>, vector<1x128xf32>
    %361 = arith.subf %355, %360 : vector<1x128xf32>
    %c0_314 = arith.constant 0 : index
    %c5_315 = arith.constant 5 : index
    %c0_316 = arith.constant 0 : index
    %362 = vector.load %arg11[%c0_314, %c5_315, %c0_316] : memref<1x16x128xf32, #tpu.memory_space<vmem>>, vector<1x1x128xf32>
    %363 = vector.shape_cast %362 : vector<1x1x128xf32> to vector<1x128xf32>
    %364 = vector.shape_cast %361 : vector<1x128xf32> to vector<1x1x128xf32>
    tpu.vector_store %arg11[%c0_314, %c5_315, %c0_316], %364 {strides = array<i32>} : memref<1x16x128xf32, #tpu.memory_space<vmem>>, vector<1x1x128xf32>,
    %c0_317 = arith.constant 0 : index
    %c0_318 = arith.constant 0 : index
    %c0_319 = arith.constant 0 : index
    %365 = vector.load %arg11[%c0_317, %c0_318, %c0_319] : memref<1x16x128xf32, #tpu.memory_space<vmem>>, vector<1x16x128xf32>
    %366 = vector.shape_cast %365 : vector<1x16x128xf32> to vector<16x128xf32>
    %c0_320 = arith.constant 0 : index
    %c6 = arith.constant 6 : index
    %c0_321 = arith.constant 0 : index
    %c0_322 = arith.constant 0 : index
    %367 = vector.load %arg3[%c0_320, %c6, %c0_321, %c0_322] : memref<1x16x12x16xf32, #tpu.memory_space<vmem>>, vector<1x1x12x16xf32>
    %368 = vector.shape_cast %367 : vector<1x1x12x16xf32> to vector<12x16xf32>
    %cst_323 = arith.constant dense<0.000000e+00> : vector<12x128xf32>
    %369 = tpu.matmul %368, %366, %cst_323 {dimension_numbers = #tpu.dot_dimension_numbers<[1], [0], [0], [1], [0, 0, 1, 1], [], []>} : vector<12x16xf32>, vector<16x128xf32>, vector<12x128xf32> -> vector<12x128xf32>
    %c0_324 = arith.constant 0 : index
    %c6_325 = arith.constant 6 : index
    %c0_326 = arith.constant 0 : index
    %c0_327 = arith.constant 0 : index
    %370 = vector.load %arg4[%c0_324, %c6_325, %c0_326, %c0_327] : memref<1x16x12x1xf32, #tpu.memory_space<vmem>>, vector<1x1x12x1xf32>
    %371 = vector.shape_cast %370 : vector<1x1x12x1xf32> to vector<12x1xf32>
    %372 = vector.broadcast %371 : vector<12x1xf32> to vector<12x128xf32>
    %373 = arith.addf %369, %372 : vector<12x128xf32>
    %cst_328 = arith.constant 0.000000e+00 : f32
    %374 = vector.broadcast %cst_328 : f32 to vector<12x128xf32>
    %375 = arith.cmpf ogt, %373, %374 : vector<12x128xf32>
    %cst_329 = arith.constant 0.00999999977 : f32
    %376 = vector.broadcast %cst_329 : f32 to vector<12x128xf32>
    %377 = arith.mulf %376, %373 : vector<12x128xf32>
    %378 = arith.select %375, %373, %377 : vector<12x128xi1>, vector<12x128xf32>
    %c0_330 = arith.constant 0 : index
    %c6_331 = arith.constant 6 : index
    %c0_332 = arith.constant 0 : index
    %c0_333 = arith.constant 0 : index
    %379 = vector.load %arg5[%c0_330, %c6_331, %c0_332, %c0_333] : memref<1x16x12x12xf32, #tpu.memory_space<vmem>>, vector<1x1x12x12xf32>
    %380 = vector.shape_cast %379 : vector<1x1x12x12xf32> to vector<12x12xf32>
    %cst_334 = arith.constant dense<0.000000e+00> : vector<12x128xf32>
    %381 = tpu.matmul %380, %378, %cst_334 {dimension_numbers = #tpu.dot_dimension_numbers<[1], [0], [0], [1], [0, 0, 1, 1], [], []>} : vector<12x12xf32>, vector<12x128xf32>, vector<12x128xf32> -> vector<12x128xf32>
    %c0_335 = arith.constant 0 : index
    %c6_336 = arith.constant 6 : index
    %c0_337 = arith.constant 0 : index
    %c0_338 = arith.constant 0 : index
    %382 = vector.load %arg6[%c0_335, %c6_336, %c0_337, %c0_338] : memref<1x16x12x1xf32, #tpu.memory_space<vmem>>, vector<1x1x12x1xf32>
    %383 = vector.shape_cast %382 : vector<1x1x12x1xf32> to vector<12x1xf32>
    %384 = vector.broadcast %383 : vector<12x1xf32> to vector<12x128xf32>
    %385 = arith.addf %381, %384 : vector<12x128xf32>
    %cst_339 = arith.constant 0.000000e+00 : f32
    %386 = vector.broadcast %cst_339 : f32 to vector<12x128xf32>
    %387 = arith.cmpf ogt, %385, %386 : vector<12x128xf32>
    %cst_340 = arith.constant 0.00999999977 : f32
    %388 = vector.broadcast %cst_340 : f32 to vector<12x128xf32>
    %389 = arith.mulf %388, %385 : vector<12x128xf32>
    %390 = arith.select %387, %385, %389 : vector<12x128xi1>, vector<12x128xf32>
    %c0_341 = arith.constant 0 : index
    %c6_342 = arith.constant 6 : index
    %c0_343 = arith.constant 0 : index
    %c0_344 = arith.constant 0 : index
    %391 = vector.load %arg7[%c0_341, %c6_342, %c0_343, %c0_344] : memref<1x16x12x12xf32, #tpu.memory_space<vmem>>, vector<1x1x12x12xf32>
    %392 = vector.shape_cast %391 : vector<1x1x12x12xf32> to vector<12x12xf32>
    %cst_345 = arith.constant dense<0.000000e+00> : vector<12x128xf32>
    %393 = tpu.matmul %392, %390, %cst_345 {dimension_numbers = #tpu.dot_dimension_numbers<[1], [0], [0], [1], [0, 0, 1, 1], [], []>} : vector<12x12xf32>, vector<12x128xf32>, vector<12x128xf32> -> vector<12x128xf32>
    %c0_346 = arith.constant 0 : index
    %c6_347 = arith.constant 6 : index
    %c0_348 = arith.constant 0 : index
    %c0_349 = arith.constant 0 : index
    %394 = vector.load %arg8[%c0_346, %c6_347, %c0_348, %c0_349] : memref<1x16x12x1xf32, #tpu.memory_space<vmem>>, vector<1x1x12x1xf32>
    %395 = vector.shape_cast %394 : vector<1x1x12x1xf32> to vector<12x1xf32>
    %396 = vector.broadcast %395 : vector<12x1xf32> to vector<12x128xf32>
    %397 = arith.addf %393, %396 : vector<12x128xf32>
    %cst_350 = arith.constant 0.000000e+00 : f32
    %398 = vector.broadcast %cst_350 : f32 to vector<12x128xf32>
    %399 = arith.cmpf ogt, %397, %398 : vector<12x128xf32>
    %cst_351 = arith.constant 0.00999999977 : f32
    %400 = vector.broadcast %cst_351 : f32 to vector<12x128xf32>
    %401 = arith.mulf %400, %397 : vector<12x128xf32>
    %402 = arith.select %399, %397, %401 : vector<12x128xi1>, vector<12x128xf32>
    %c0_352 = arith.constant 0 : index
    %c6_353 = arith.constant 6 : index
    %c0_354 = arith.constant 0 : index
    %c0_355 = arith.constant 0 : index
    %403 = vector.load %arg9[%c0_352, %c6_353, %c0_354, %c0_355] : memref<1x16x1x12xf32, #tpu.memory_space<vmem>>, vector<1x1x1x12xf32>
    %404 = vector.shape_cast %403 : vector<1x1x1x12xf32> to vector<1x12xf32>
    %cst_356 = arith.constant dense<0.000000e+00> : vector<1x128xf32>
    %405 = tpu.matmul %404, %402, %cst_356 {dimension_numbers = #tpu.dot_dimension_numbers<[1], [0], [0], [1], [0, 0, 1, 1], [], []>} : vector<1x12xf32>, vector<12x128xf32>, vector<1x128xf32> -> vector<1x128xf32>
    %c0_357 = arith.constant 0 : index
    %c6_358 = arith.constant 6 : index
    %c0_359 = arith.constant 0 : index
    %c0_360 = arith.constant 0 : index
    %406 = vector.load %arg10[%c0_357, %c6_358, %c0_359, %c0_360] : memref<1x16x1x1xf32, #tpu.memory_space<vmem>>, vector<1x1x1x1xf32>
    %407 = vector.shape_cast %406 : vector<1x1x1x1xf32> to vector<1x1xf32>
    %408 = vector.broadcast %407 : vector<1x1xf32> to vector<1x128xf32>
    %409 = arith.addf %405, %408 : vector<1x128xf32>
    %cst_361 = arith.constant -1.000000e+00 : f32
    %cst_362 = arith.constant 1.000000e+00 : f32
    %410 = vector.broadcast %cst_361 : f32 to vector<1x128xf32>
    %411 = arith.maximumf %410, %409 : vector<1x128xf32>
    %412 = vector.broadcast %cst_362 : f32 to vector<1x128xf32>
    %413 = arith.minimumf %412, %411 : vector<1x128xf32>
    %414 = vector.extract_strided_slice %366 {offsets = [6, 0], sizes = [1, 128], strides = [1, 1]} : vector<16x128xf32> to vector<1x128xf32>
    %415 = arith.subf %414, %413 : vector<1x128xf32>
    %cst_363 = arith.constant 1.000000e+00 : f32
    %416 = vector.broadcast %cst_363 : f32 to vector<1x128xf32>
    %417 = arith.cmpf oge, %415, %416 : vector<1x128xf32>
    %cst_364 = arith.constant 2.000000e+00 : f32
    %cst_365 = arith.constant 0.000000e+00 : f32
    %418 = vector.broadcast %cst_364 : f32 to vector<1x128xf32>
    %419 = vector.broadcast %cst_365 : f32 to vector<1x128xf32>
    %420 = arith.select %417, %418, %419 : vector<1x128xi1>, vector<1x128xf32>
    %421 = arith.subf %415, %420 : vector<1x128xf32>
    %c0_366 = arith.constant 0 : index
    %c6_367 = arith.constant 6 : index
    %c0_368 = arith.constant 0 : index
    %422 = vector.load %arg11[%c0_366, %c6_367, %c0_368] : memref<1x16x128xf32, #tpu.memory_space<vmem>>, vector<1x1x128xf32>
    %423 = vector.shape_cast %422 : vector<1x1x128xf32> to vector<1x128xf32>
    %424 = vector.shape_cast %421 : vector<1x128xf32> to vector<1x1x128xf32>
    tpu.vector_store %arg11[%c0_366, %c6_367, %c0_368], %424 {strides = array<i32>} : memref<1x16x128xf32, #tpu.memory_space<vmem>>, vector<1x1x128xf32>,
    %c0_369 = arith.constant 0 : index
    %c0_370 = arith.constant 0 : index
    %c0_371 = arith.constant 0 : index
    %425 = vector.load %arg11[%c0_369, %c0_370, %c0_371] : memref<1x16x128xf32, #tpu.memory_space<vmem>>, vector<1x16x128xf32>
    %426 = vector.shape_cast %425 : vector<1x16x128xf32> to vector<16x128xf32>
    %c0_372 = arith.constant 0 : index
    %c7 = arith.constant 7 : index
    %c0_373 = arith.constant 0 : index
    %c0_374 = arith.constant 0 : index
    %427 = vector.load %arg3[%c0_372, %c7, %c0_373, %c0_374] : memref<1x16x12x16xf32, #tpu.memory_space<vmem>>, vector<1x1x12x16xf32>
    %428 = vector.shape_cast %427 : vector<1x1x12x16xf32> to vector<12x16xf32>
    %cst_375 = arith.constant dense<0.000000e+00> : vector<12x128xf32>
    %429 = tpu.matmul %428, %426, %cst_375 {dimension_numbers = #tpu.dot_dimension_numbers<[1], [0], [0], [1], [0, 0, 1, 1], [], []>} : vector<12x16xf32>, vector<16x128xf32>, vector<12x128xf32> -> vector<12x128xf32>
    %c0_376 = arith.constant 0 : index
    %c7_377 = arith.constant 7 : index
    %c0_378 = arith.constant 0 : index
    %c0_379 = arith.constant 0 : index
    %430 = vector.load %arg4[%c0_376, %c7_377, %c0_378, %c0_379] : memref<1x16x12x1xf32, #tpu.memory_space<vmem>>, vector<1x1x12x1xf32>
    %431 = vector.shape_cast %430 : vector<1x1x12x1xf32> to vector<12x1xf32>
    %432 = vector.broadcast %431 : vector<12x1xf32> to vector<12x128xf32>
    %433 = arith.addf %429, %432 : vector<12x128xf32>
    %cst_380 = arith.constant 0.000000e+00 : f32
    %434 = vector.broadcast %cst_380 : f32 to vector<12x128xf32>
    %435 = arith.cmpf ogt, %433, %434 : vector<12x128xf32>
    %cst_381 = arith.constant 0.00999999977 : f32
    %436 = vector.broadcast %cst_381 : f32 to vector<12x128xf32>
    %437 = arith.mulf %436, %433 : vector<12x128xf32>
    %438 = arith.select %435, %433, %437 : vector<12x128xi1>, vector<12x128xf32>
    %c0_382 = arith.constant 0 : index
    %c7_383 = arith.constant 7 : index
    %c0_384 = arith.constant 0 : index
    %c0_385 = arith.constant 0 : index
    %439 = vector.load %arg5[%c0_382, %c7_383, %c0_384, %c0_385] : memref<1x16x12x12xf32, #tpu.memory_space<vmem>>, vector<1x1x12x12xf32>
    %440 = vector.shape_cast %439 : vector<1x1x12x12xf32> to vector<12x12xf32>
    %cst_386 = arith.constant dense<0.000000e+00> : vector<12x128xf32>
    %441 = tpu.matmul %440, %438, %cst_386 {dimension_numbers = #tpu.dot_dimension_numbers<[1], [0], [0], [1], [0, 0, 1, 1], [], []>} : vector<12x12xf32>, vector<12x128xf32>, vector<12x128xf32> -> vector<12x128xf32>
    %c0_387 = arith.constant 0 : index
    %c7_388 = arith.constant 7 : index
    %c0_389 = arith.constant 0 : index
    %c0_390 = arith.constant 0 : index
    %442 = vector.load %arg6[%c0_387, %c7_388, %c0_389, %c0_390] : memref<1x16x12x1xf32, #tpu.memory_space<vmem>>, vector<1x1x12x1xf32>
    %443 = vector.shape_cast %442 : vector<1x1x12x1xf32> to vector<12x1xf32>
    %444 = vector.broadcast %443 : vector<12x1xf32> to vector<12x128xf32>
    %445 = arith.addf %441, %444 : vector<12x128xf32>
    %cst_391 = arith.constant 0.000000e+00 : f32
    %446 = vector.broadcast %cst_391 : f32 to vector<12x128xf32>
    %447 = arith.cmpf ogt, %445, %446 : vector<12x128xf32>
    %cst_392 = arith.constant 0.00999999977 : f32
    %448 = vector.broadcast %cst_392 : f32 to vector<12x128xf32>
    %449 = arith.mulf %448, %445 : vector<12x128xf32>
    %450 = arith.select %447, %445, %449 : vector<12x128xi1>, vector<12x128xf32>
    %c0_393 = arith.constant 0 : index
    %c7_394 = arith.constant 7 : index
    %c0_395 = arith.constant 0 : index
    %c0_396 = arith.constant 0 : index
    %451 = vector.load %arg7[%c0_393, %c7_394, %c0_395, %c0_396] : memref<1x16x12x12xf32, #tpu.memory_space<vmem>>, vector<1x1x12x12xf32>
    %452 = vector.shape_cast %451 : vector<1x1x12x12xf32> to vector<12x12xf32>
    %cst_397 = arith.constant dense<0.000000e+00> : vector<12x128xf32>
    %453 = tpu.matmul %452, %450, %cst_397 {dimension_numbers = #tpu.dot_dimension_numbers<[1], [0], [0], [1], [0, 0, 1, 1], [], []>} : vector<12x12xf32>, vector<12x128xf32>, vector<12x128xf32> -> vector<12x128xf32>
    %c0_398 = arith.constant 0 : index
    %c7_399 = arith.constant 7 : index
    %c0_400 = arith.constant 0 : index
    %c0_401 = arith.constant 0 : index
    %454 = vector.load %arg8[%c0_398, %c7_399, %c0_400, %c0_401] : memref<1x16x12x1xf32, #tpu.memory_space<vmem>>, vector<1x1x12x1xf32>
    %455 = vector.shape_cast %454 : vector<1x1x12x1xf32> to vector<12x1xf32>
    %456 = vector.broadcast %455 : vector<12x1xf32> to vector<12x128xf32>
    %457 = arith.addf %453, %456 : vector<12x128xf32>
    %cst_402 = arith.constant 0.000000e+00 : f32
    %458 = vector.broadcast %cst_402 : f32 to vector<12x128xf32>
    %459 = arith.cmpf ogt, %457, %458 : vector<12x128xf32>
    %cst_403 = arith.constant 0.00999999977 : f32
    %460 = vector.broadcast %cst_403 : f32 to vector<12x128xf32>
    %461 = arith.mulf %460, %457 : vector<12x128xf32>
    %462 = arith.select %459, %457, %461 : vector<12x128xi1>, vector<12x128xf32>
    %c0_404 = arith.constant 0 : index
    %c7_405 = arith.constant 7 : index
    %c0_406 = arith.constant 0 : index
    %c0_407 = arith.constant 0 : index
    %463 = vector.load %arg9[%c0_404, %c7_405, %c0_406, %c0_407] : memref<1x16x1x12xf32, #tpu.memory_space<vmem>>, vector<1x1x1x12xf32>
    %464 = vector.shape_cast %463 : vector<1x1x1x12xf32> to vector<1x12xf32>
    %cst_408 = arith.constant dense<0.000000e+00> : vector<1x128xf32>
    %465 = tpu.matmul %464, %462, %cst_408 {dimension_numbers = #tpu.dot_dimension_numbers<[1], [0], [0], [1], [0, 0, 1, 1], [], []>} : vector<1x12xf32>, vector<12x128xf32>, vector<1x128xf32> -> vector<1x128xf32>
    %c0_409 = arith.constant 0 : index
    %c7_410 = arith.constant 7 : index
    %c0_411 = arith.constant 0 : index
    %c0_412 = arith.constant 0 : index
    %466 = vector.load %arg10[%c0_409, %c7_410, %c0_411, %c0_412] : memref<1x16x1x1xf32, #tpu.memory_space<vmem>>, vector<1x1x1x1xf32>
    %467 = vector.shape_cast %466 : vector<1x1x1x1xf32> to vector<1x1xf32>
    %468 = vector.broadcast %467 : vector<1x1xf32> to vector<1x128xf32>
    %469 = arith.addf %465, %468 : vector<1x128xf32>
    %cst_413 = arith.constant -1.000000e+00 : f32
    %cst_414 = arith.constant 1.000000e+00 : f32
    %470 = vector.broadcast %cst_413 : f32 to vector<1x128xf32>
    %471 = arith.maximumf %470, %469 : vector<1x128xf32>
    %472 = vector.broadcast %cst_414 : f32 to vector<1x128xf32>
    %473 = arith.minimumf %472, %471 : vector<1x128xf32>
    %474 = vector.extract_strided_slice %426 {offsets = [7, 0], sizes = [1, 128], strides = [1, 1]} : vector<16x128xf32> to vector<1x128xf32>
    %475 = arith.subf %474, %473 : vector<1x128xf32>
    %cst_415 = arith.constant 1.000000e+00 : f32
    %476 = vector.broadcast %cst_415 : f32 to vector<1x128xf32>
    %477 = arith.cmpf oge, %475, %476 : vector<1x128xf32>
    %cst_416 = arith.constant 2.000000e+00 : f32
    %cst_417 = arith.constant 0.000000e+00 : f32
    %478 = vector.broadcast %cst_416 : f32 to vector<1x128xf32>
    %479 = vector.broadcast %cst_417 : f32 to vector<1x128xf32>
    %480 = arith.select %477, %478, %479 : vector<1x128xi1>, vector<1x128xf32>
    %481 = arith.subf %475, %480 : vector<1x128xf32>
    %c0_418 = arith.constant 0 : index
    %c7_419 = arith.constant 7 : index
    %c0_420 = arith.constant 0 : index
    %482 = vector.load %arg11[%c0_418, %c7_419, %c0_420] : memref<1x16x128xf32, #tpu.memory_space<vmem>>, vector<1x1x128xf32>
    %483 = vector.shape_cast %482 : vector<1x1x128xf32> to vector<1x128xf32>
    %484 = vector.shape_cast %481 : vector<1x128xf32> to vector<1x1x128xf32>
    tpu.vector_store %arg11[%c0_418, %c7_419, %c0_420], %484 {strides = array<i32>} : memref<1x16x128xf32, #tpu.memory_space<vmem>>, vector<1x1x128xf32>,
    %c0_421 = arith.constant 0 : index
    %c0_422 = arith.constant 0 : index
    %c0_423 = arith.constant 0 : index
    %485 = vector.load %arg11[%c0_421, %c0_422, %c0_423] : memref<1x16x128xf32, #tpu.memory_space<vmem>>, vector<1x16x128xf32>
    %486 = vector.shape_cast %485 : vector<1x16x128xf32> to vector<16x128xf32>
    %c0_424 = arith.constant 0 : index
    %c8 = arith.constant 8 : index
    %c0_425 = arith.constant 0 : index
    %c0_426 = arith.constant 0 : index
    %487 = vector.load %arg3[%c0_424, %c8, %c0_425, %c0_426] : memref<1x16x12x16xf32, #tpu.memory_space<vmem>>, vector<1x1x12x16xf32>
    %488 = vector.shape_cast %487 : vector<1x1x12x16xf32> to vector<12x16xf32>
    %cst_427 = arith.constant dense<0.000000e+00> : vector<12x128xf32>
    %489 = tpu.matmul %488, %486, %cst_427 {dimension_numbers = #tpu.dot_dimension_numbers<[1], [0], [0], [1], [0, 0, 1, 1], [], []>} : vector<12x16xf32>, vector<16x128xf32>, vector<12x128xf32> -> vector<12x128xf32>
    %c0_428 = arith.constant 0 : index
    %c8_429 = arith.constant 8 : index
    %c0_430 = arith.constant 0 : index
    %c0_431 = arith.constant 0 : index
    %490 = vector.load %arg4[%c0_428, %c8_429, %c0_430, %c0_431] : memref<1x16x12x1xf32, #tpu.memory_space<vmem>>, vector<1x1x12x1xf32>
    %491 = vector.shape_cast %490 : vector<1x1x12x1xf32> to vector<12x1xf32>
    %492 = vector.broadcast %491 : vector<12x1xf32> to vector<12x128xf32>
    %493 = arith.addf %489, %492 : vector<12x128xf32>
    %cst_432 = arith.constant 0.000000e+00 : f32
    %494 = vector.broadcast %cst_432 : f32 to vector<12x128xf32>
    %495 = arith.cmpf ogt, %493, %494 : vector<12x128xf32>
    %cst_433 = arith.constant 0.00999999977 : f32
    %496 = vector.broadcast %cst_433 : f32 to vector<12x128xf32>
    %497 = arith.mulf %496, %493 : vector<12x128xf32>
    %498 = arith.select %495, %493, %497 : vector<12x128xi1>, vector<12x128xf32>
    %c0_434 = arith.constant 0 : index
    %c8_435 = arith.constant 8 : index
    %c0_436 = arith.constant 0 : index
    %c0_437 = arith.constant 0 : index
    %499 = vector.load %arg5[%c0_434, %c8_435, %c0_436, %c0_437] : memref<1x16x12x12xf32, #tpu.memory_space<vmem>>, vector<1x1x12x12xf32>
    %500 = vector.shape_cast %499 : vector<1x1x12x12xf32> to vector<12x12xf32>
    %cst_438 = arith.constant dense<0.000000e+00> : vector<12x128xf32>
    %501 = tpu.matmul %500, %498, %cst_438 {dimension_numbers = #tpu.dot_dimension_numbers<[1], [0], [0], [1], [0, 0, 1, 1], [], []>} : vector<12x12xf32>, vector<12x128xf32>, vector<12x128xf32> -> vector<12x128xf32>
    %c0_439 = arith.constant 0 : index
    %c8_440 = arith.constant 8 : index
    %c0_441 = arith.constant 0 : index
    %c0_442 = arith.constant 0 : index
    %502 = vector.load %arg6[%c0_439, %c8_440, %c0_441, %c0_442] : memref<1x16x12x1xf32, #tpu.memory_space<vmem>>, vector<1x1x12x1xf32>
    %503 = vector.shape_cast %502 : vector<1x1x12x1xf32> to vector<12x1xf32>
    %504 = vector.broadcast %503 : vector<12x1xf32> to vector<12x128xf32>
    %505 = arith.addf %501, %504 : vector<12x128xf32>
    %cst_443 = arith.constant 0.000000e+00 : f32
    %506 = vector.broadcast %cst_443 : f32 to vector<12x128xf32>
    %507 = arith.cmpf ogt, %505, %506 : vector<12x128xf32>
    %cst_444 = arith.constant 0.00999999977 : f32
    %508 = vector.broadcast %cst_444 : f32 to vector<12x128xf32>
    %509 = arith.mulf %508, %505 : vector<12x128xf32>
    %510 = arith.select %507, %505, %509 : vector<12x128xi1>, vector<12x128xf32>
    %c0_445 = arith.constant 0 : index
    %c8_446 = arith.constant 8 : index
    %c0_447 = arith.constant 0 : index
    %c0_448 = arith.constant 0 : index
    %511 = vector.load %arg7[%c0_445, %c8_446, %c0_447, %c0_448] : memref<1x16x12x12xf32, #tpu.memory_space<vmem>>, vector<1x1x12x12xf32>
    %512 = vector.shape_cast %511 : vector<1x1x12x12xf32> to vector<12x12xf32>
    %cst_449 = arith.constant dense<0.000000e+00> : vector<12x128xf32>
    %513 = tpu.matmul %512, %510, %cst_449 {dimension_numbers = #tpu.dot_dimension_numbers<[1], [0], [0], [1], [0, 0, 1, 1], [], []>} : vector<12x12xf32>, vector<12x128xf32>, vector<12x128xf32> -> vector<12x128xf32>
    %c0_450 = arith.constant 0 : index
    %c8_451 = arith.constant 8 : index
    %c0_452 = arith.constant 0 : index
    %c0_453 = arith.constant 0 : index
    %514 = vector.load %arg8[%c0_450, %c8_451, %c0_452, %c0_453] : memref<1x16x12x1xf32, #tpu.memory_space<vmem>>, vector<1x1x12x1xf32>
    %515 = vector.shape_cast %514 : vector<1x1x12x1xf32> to vector<12x1xf32>
    %516 = vector.broadcast %515 : vector<12x1xf32> to vector<12x128xf32>
    %517 = arith.addf %513, %516 : vector<12x128xf32>
    %cst_454 = arith.constant 0.000000e+00 : f32
    %518 = vector.broadcast %cst_454 : f32 to vector<12x128xf32>
    %519 = arith.cmpf ogt, %517, %518 : vector<12x128xf32>
    %cst_455 = arith.constant 0.00999999977 : f32
    %520 = vector.broadcast %cst_455 : f32 to vector<12x128xf32>
    %521 = arith.mulf %520, %517 : vector<12x128xf32>
    %522 = arith.select %519, %517, %521 : vector<12x128xi1>, vector<12x128xf32>
    %c0_456 = arith.constant 0 : index
    %c8_457 = arith.constant 8 : index
    %c0_458 = arith.constant 0 : index
    %c0_459 = arith.constant 0 : index
    %523 = vector.load %arg9[%c0_456, %c8_457, %c0_458, %c0_459] : memref<1x16x1x12xf32, #tpu.memory_space<vmem>>, vector<1x1x1x12xf32>
    %524 = vector.shape_cast %523 : vector<1x1x1x12xf32> to vector<1x12xf32>
    %cst_460 = arith.constant dense<0.000000e+00> : vector<1x128xf32>
    %525 = tpu.matmul %524, %522, %cst_460 {dimension_numbers = #tpu.dot_dimension_numbers<[1], [0], [0], [1], [0, 0, 1, 1], [], []>} : vector<1x12xf32>, vector<12x128xf32>, vector<1x128xf32> -> vector<1x128xf32>
    %c0_461 = arith.constant 0 : index
    %c8_462 = arith.constant 8 : index
    %c0_463 = arith.constant 0 : index
    %c0_464 = arith.constant 0 : index
    %526 = vector.load %arg10[%c0_461, %c8_462, %c0_463, %c0_464] : memref<1x16x1x1xf32, #tpu.memory_space<vmem>>, vector<1x1x1x1xf32>
    %527 = vector.shape_cast %526 : vector<1x1x1x1xf32> to vector<1x1xf32>
    %528 = vector.broadcast %527 : vector<1x1xf32> to vector<1x128xf32>
    %529 = arith.addf %525, %528 : vector<1x128xf32>
    %cst_465 = arith.constant -1.000000e+00 : f32
    %cst_466 = arith.constant 1.000000e+00 : f32
    %530 = vector.broadcast %cst_465 : f32 to vector<1x128xf32>
    %531 = arith.maximumf %530, %529 : vector<1x128xf32>
    %532 = vector.broadcast %cst_466 : f32 to vector<1x128xf32>
    %533 = arith.minimumf %532, %531 : vector<1x128xf32>
    %534 = vector.extract_strided_slice %486 {offsets = [8, 0], sizes = [1, 128], strides = [1, 1]} : vector<16x128xf32> to vector<1x128xf32>
    %535 = arith.subf %534, %533 : vector<1x128xf32>
    %cst_467 = arith.constant 1.000000e+00 : f32
    %536 = vector.broadcast %cst_467 : f32 to vector<1x128xf32>
    %537 = arith.cmpf oge, %535, %536 : vector<1x128xf32>
    %cst_468 = arith.constant 2.000000e+00 : f32
    %cst_469 = arith.constant 0.000000e+00 : f32
    %538 = vector.broadcast %cst_468 : f32 to vector<1x128xf32>
    %539 = vector.broadcast %cst_469 : f32 to vector<1x128xf32>
    %540 = arith.select %537, %538, %539 : vector<1x128xi1>, vector<1x128xf32>
    %541 = arith.subf %535, %540 : vector<1x128xf32>
    %c0_470 = arith.constant 0 : index
    %c8_471 = arith.constant 8 : index
    %c0_472 = arith.constant 0 : index
    %542 = vector.load %arg11[%c0_470, %c8_471, %c0_472] : memref<1x16x128xf32, #tpu.memory_space<vmem>>, vector<1x1x128xf32>
    %543 = vector.shape_cast %542 : vector<1x1x128xf32> to vector<1x128xf32>
    %544 = vector.shape_cast %541 : vector<1x128xf32> to vector<1x1x128xf32>
    tpu.vector_store %arg11[%c0_470, %c8_471, %c0_472], %544 {strides = array<i32>} : memref<1x16x128xf32, #tpu.memory_space<vmem>>, vector<1x1x128xf32>,
    %c0_473 = arith.constant 0 : index
    %c0_474 = arith.constant 0 : index
    %c0_475 = arith.constant 0 : index
    %545 = vector.load %arg11[%c0_473, %c0_474, %c0_475] : memref<1x16x128xf32, #tpu.memory_space<vmem>>, vector<1x16x128xf32>
    %546 = vector.shape_cast %545 : vector<1x16x128xf32> to vector<16x128xf32>
    %c0_476 = arith.constant 0 : index
    %c9 = arith.constant 9 : index
    %c0_477 = arith.constant 0 : index
    %c0_478 = arith.constant 0 : index
    %547 = vector.load %arg3[%c0_476, %c9, %c0_477, %c0_478] : memref<1x16x12x16xf32, #tpu.memory_space<vmem>>, vector<1x1x12x16xf32>
    %548 = vector.shape_cast %547 : vector<1x1x12x16xf32> to vector<12x16xf32>
    %cst_479 = arith.constant dense<0.000000e+00> : vector<12x128xf32>
    %549 = tpu.matmul %548, %546, %cst_479 {dimension_numbers = #tpu.dot_dimension_numbers<[1], [0], [0], [1], [0, 0, 1, 1], [], []>} : vector<12x16xf32>, vector<16x128xf32>, vector<12x128xf32> -> vector<12x128xf32>
    %c0_480 = arith.constant 0 : index
    %c9_481 = arith.constant 9 : index
    %c0_482 = arith.constant 0 : index
    %c0_483 = arith.constant 0 : index
    %550 = vector.load %arg4[%c0_480, %c9_481, %c0_482, %c0_483] : memref<1x16x12x1xf32, #tpu.memory_space<vmem>>, vector<1x1x12x1xf32>
    %551 = vector.shape_cast %550 : vector<1x1x12x1xf32> to vector<12x1xf32>
    %552 = vector.broadcast %551 : vector<12x1xf32> to vector<12x128xf32>
    %553 = arith.addf %549, %552 : vector<12x128xf32>
    %cst_484 = arith.constant 0.000000e+00 : f32
    %554 = vector.broadcast %cst_484 : f32 to vector<12x128xf32>
    %555 = arith.cmpf ogt, %553, %554 : vector<12x128xf32>
    %cst_485 = arith.constant 0.00999999977 : f32
    %556 = vector.broadcast %cst_485 : f32 to vector<12x128xf32>
    %557 = arith.mulf %556, %553 : vector<12x128xf32>
    %558 = arith.select %555, %553, %557 : vector<12x128xi1>, vector<12x128xf32>
    %c0_486 = arith.constant 0 : index
    %c9_487 = arith.constant 9 : index
    %c0_488 = arith.constant 0 : index
    %c0_489 = arith.constant 0 : index
    %559 = vector.load %arg5[%c0_486, %c9_487, %c0_488, %c0_489] : memref<1x16x12x12xf32, #tpu.memory_space<vmem>>, vector<1x1x12x12xf32>
    %560 = vector.shape_cast %559 : vector<1x1x12x12xf32> to vector<12x12xf32>
    %cst_490 = arith.constant dense<0.000000e+00> : vector<12x128xf32>
    %561 = tpu.matmul %560, %558, %cst_490 {dimension_numbers = #tpu.dot_dimension_numbers<[1], [0], [0], [1], [0, 0, 1, 1], [], []>} : vector<12x12xf32>, vector<12x128xf32>, vector<12x128xf32> -> vector<12x128xf32>
    %c0_491 = arith.constant 0 : index
    %c9_492 = arith.constant 9 : index
    %c0_493 = arith.constant 0 : index
    %c0_494 = arith.constant 0 : index
    %562 = vector.load %arg6[%c0_491, %c9_492, %c0_493, %c0_494] : memref<1x16x12x1xf32, #tpu.memory_space<vmem>>, vector<1x1x12x1xf32>
    %563 = vector.shape_cast %562 : vector<1x1x12x1xf32> to vector<12x1xf32>
    %564 = vector.broadcast %563 : vector<12x1xf32> to vector<12x128xf32>
    %565 = arith.addf %561, %564 : vector<12x128xf32>
    %cst_495 = arith.constant 0.000000e+00 : f32
    %566 = vector.broadcast %cst_495 : f32 to vector<12x128xf32>
    %567 = arith.cmpf ogt, %565, %566 : vector<12x128xf32>
    %cst_496 = arith.constant 0.00999999977 : f32
    %568 = vector.broadcast %cst_496 : f32 to vector<12x128xf32>
    %569 = arith.mulf %568, %565 : vector<12x128xf32>
    %570 = arith.select %567, %565, %569 : vector<12x128xi1>, vector<12x128xf32>
    %c0_497 = arith.constant 0 : index
    %c9_498 = arith.constant 9 : index
    %c0_499 = arith.constant 0 : index
    %c0_500 = arith.constant 0 : index
    %571 = vector.load %arg7[%c0_497, %c9_498, %c0_499, %c0_500] : memref<1x16x12x12xf32, #tpu.memory_space<vmem>>, vector<1x1x12x12xf32>
    %572 = vector.shape_cast %571 : vector<1x1x12x12xf32> to vector<12x12xf32>
    %cst_501 = arith.constant dense<0.000000e+00> : vector<12x128xf32>
    %573 = tpu.matmul %572, %570, %cst_501 {dimension_numbers = #tpu.dot_dimension_numbers<[1], [0], [0], [1], [0, 0, 1, 1], [], []>} : vector<12x12xf32>, vector<12x128xf32>, vector<12x128xf32> -> vector<12x128xf32>
    %c0_502 = arith.constant 0 : index
    %c9_503 = arith.constant 9 : index
    %c0_504 = arith.constant 0 : index
    %c0_505 = arith.constant 0 : index
    %574 = vector.load %arg8[%c0_502, %c9_503, %c0_504, %c0_505] : memref<1x16x12x1xf32, #tpu.memory_space<vmem>>, vector<1x1x12x1xf32>
    %575 = vector.shape_cast %574 : vector<1x1x12x1xf32> to vector<12x1xf32>
    %576 = vector.broadcast %575 : vector<12x1xf32> to vector<12x128xf32>
    %577 = arith.addf %573, %576 : vector<12x128xf32>
    %cst_506 = arith.constant 0.000000e+00 : f32
    %578 = vector.broadcast %cst_506 : f32 to vector<12x128xf32>
    %579 = arith.cmpf ogt, %577, %578 : vector<12x128xf32>
    %cst_507 = arith.constant 0.00999999977 : f32
    %580 = vector.broadcast %cst_507 : f32 to vector<12x128xf32>
    %581 = arith.mulf %580, %577 : vector<12x128xf32>
    %582 = arith.select %579, %577, %581 : vector<12x128xi1>, vector<12x128xf32>
    %c0_508 = arith.constant 0 : index
    %c9_509 = arith.constant 9 : index
    %c0_510 = arith.constant 0 : index
    %c0_511 = arith.constant 0 : index
    %583 = vector.load %arg9[%c0_508, %c9_509, %c0_510, %c0_511] : memref<1x16x1x12xf32, #tpu.memory_space<vmem>>, vector<1x1x1x12xf32>
    %584 = vector.shape_cast %583 : vector<1x1x1x12xf32> to vector<1x12xf32>
    %cst_512 = arith.constant dense<0.000000e+00> : vector<1x128xf32>
    %585 = tpu.matmul %584, %582, %cst_512 {dimension_numbers = #tpu.dot_dimension_numbers<[1], [0], [0], [1], [0, 0, 1, 1], [], []>} : vector<1x12xf32>, vector<12x128xf32>, vector<1x128xf32> -> vector<1x128xf32>
    %c0_513 = arith.constant 0 : index
    %c9_514 = arith.constant 9 : index
    %c0_515 = arith.constant 0 : index
    %c0_516 = arith.constant 0 : index
    %586 = vector.load %arg10[%c0_513, %c9_514, %c0_515, %c0_516] : memref<1x16x1x1xf32, #tpu.memory_space<vmem>>, vector<1x1x1x1xf32>
    %587 = vector.shape_cast %586 : vector<1x1x1x1xf32> to vector<1x1xf32>
    %588 = vector.broadcast %587 : vector<1x1xf32> to vector<1x128xf32>
    %589 = arith.addf %585, %588 : vector<1x128xf32>
    %cst_517 = arith.constant -1.000000e+00 : f32
    %cst_518 = arith.constant 1.000000e+00 : f32
    %590 = vector.broadcast %cst_517 : f32 to vector<1x128xf32>
    %591 = arith.maximumf %590, %589 : vector<1x128xf32>
    %592 = vector.broadcast %cst_518 : f32 to vector<1x128xf32>
    %593 = arith.minimumf %592, %591 : vector<1x128xf32>
    %594 = vector.extract_strided_slice %546 {offsets = [9, 0], sizes = [1, 128], strides = [1, 1]} : vector<16x128xf32> to vector<1x128xf32>
    %595 = arith.subf %594, %593 : vector<1x128xf32>
    %cst_519 = arith.constant 1.000000e+00 : f32
    %596 = vector.broadcast %cst_519 : f32 to vector<1x128xf32>
    %597 = arith.cmpf oge, %595, %596 : vector<1x128xf32>
    %cst_520 = arith.constant 2.000000e+00 : f32
    %cst_521 = arith.constant 0.000000e+00 : f32
    %598 = vector.broadcast %cst_520 : f32 to vector<1x128xf32>
    %599 = vector.broadcast %cst_521 : f32 to vector<1x128xf32>
    %600 = arith.select %597, %598, %599 : vector<1x128xi1>, vector<1x128xf32>
    %601 = arith.subf %595, %600 : vector<1x128xf32>
    %c0_522 = arith.constant 0 : index
    %c9_523 = arith.constant 9 : index
    %c0_524 = arith.constant 0 : index
    %602 = vector.load %arg11[%c0_522, %c9_523, %c0_524] : memref<1x16x128xf32, #tpu.memory_space<vmem>>, vector<1x1x128xf32>
    %603 = vector.shape_cast %602 : vector<1x1x128xf32> to vector<1x128xf32>
    %604 = vector.shape_cast %601 : vector<1x128xf32> to vector<1x1x128xf32>
    tpu.vector_store %arg11[%c0_522, %c9_523, %c0_524], %604 {strides = array<i32>} : memref<1x16x128xf32, #tpu.memory_space<vmem>>, vector<1x1x128xf32>,
    %c0_525 = arith.constant 0 : index
    %c0_526 = arith.constant 0 : index
    %c0_527 = arith.constant 0 : index
    %605 = vector.load %arg11[%c0_525, %c0_526, %c0_527] : memref<1x16x128xf32, #tpu.memory_space<vmem>>, vector<1x16x128xf32>
    %606 = vector.shape_cast %605 : vector<1x16x128xf32> to vector<16x128xf32>
    %c0_528 = arith.constant 0 : index
    %c10 = arith.constant 10 : index
    %c0_529 = arith.constant 0 : index
    %c0_530 = arith.constant 0 : index
    %607 = vector.load %arg3[%c0_528, %c10, %c0_529, %c0_530] : memref<1x16x12x16xf32, #tpu.memory_space<vmem>>, vector<1x1x12x16xf32>
    %608 = vector.shape_cast %607 : vector<1x1x12x16xf32> to vector<12x16xf32>
    %cst_531 = arith.constant dense<0.000000e+00> : vector<12x128xf32>
    %609 = tpu.matmul %608, %606, %cst_531 {dimension_numbers = #tpu.dot_dimension_numbers<[1], [0], [0], [1], [0, 0, 1, 1], [], []>} : vector<12x16xf32>, vector<16x128xf32>, vector<12x128xf32> -> vector<12x128xf32>
    %c0_532 = arith.constant 0 : index
    %c10_533 = arith.constant 10 : index
    %c0_534 = arith.constant 0 : index
    %c0_535 = arith.constant 0 : index
    %610 = vector.load %arg4[%c0_532, %c10_533, %c0_534, %c0_535] : memref<1x16x12x1xf32, #tpu.memory_space<vmem>>, vector<1x1x12x1xf32>
    %611 = vector.shape_cast %610 : vector<1x1x12x1xf32> to vector<12x1xf32>
    %612 = vector.broadcast %611 : vector<12x1xf32> to vector<12x128xf32>
    %613 = arith.addf %609, %612 : vector<12x128xf32>
    %cst_536 = arith.constant 0.000000e+00 : f32
    %614 = vector.broadcast %cst_536 : f32 to vector<12x128xf32>
    %615 = arith.cmpf ogt, %613, %614 : vector<12x128xf32>
    %cst_537 = arith.constant 0.00999999977 : f32
    %616 = vector.broadcast %cst_537 : f32 to vector<12x128xf32>
    %617 = arith.mulf %616, %613 : vector<12x128xf32>
    %618 = arith.select %615, %613, %617 : vector<12x128xi1>, vector<12x128xf32>
    %c0_538 = arith.constant 0 : index
    %c10_539 = arith.constant 10 : index
    %c0_540 = arith.constant 0 : index
    %c0_541 = arith.constant 0 : index
    %619 = vector.load %arg5[%c0_538, %c10_539, %c0_540, %c0_541] : memref<1x16x12x12xf32, #tpu.memory_space<vmem>>, vector<1x1x12x12xf32>
    %620 = vector.shape_cast %619 : vector<1x1x12x12xf32> to vector<12x12xf32>
    %cst_542 = arith.constant dense<0.000000e+00> : vector<12x128xf32>
    %621 = tpu.matmul %620, %618, %cst_542 {dimension_numbers = #tpu.dot_dimension_numbers<[1], [0], [0], [1], [0, 0, 1, 1], [], []>} : vector<12x12xf32>, vector<12x128xf32>, vector<12x128xf32> -> vector<12x128xf32>
    %c0_543 = arith.constant 0 : index
    %c10_544 = arith.constant 10 : index
    %c0_545 = arith.constant 0 : index
    %c0_546 = arith.constant 0 : index
    %622 = vector.load %arg6[%c0_543, %c10_544, %c0_545, %c0_546] : memref<1x16x12x1xf32, #tpu.memory_space<vmem>>, vector<1x1x12x1xf32>
    %623 = vector.shape_cast %622 : vector<1x1x12x1xf32> to vector<12x1xf32>
    %624 = vector.broadcast %623 : vector<12x1xf32> to vector<12x128xf32>
    %625 = arith.addf %621, %624 : vector<12x128xf32>
    %cst_547 = arith.constant 0.000000e+00 : f32
    %626 = vector.broadcast %cst_547 : f32 to vector<12x128xf32>
    %627 = arith.cmpf ogt, %625, %626 : vector<12x128xf32>
    %cst_548 = arith.constant 0.00999999977 : f32
    %628 = vector.broadcast %cst_548 : f32 to vector<12x128xf32>
    %629 = arith.mulf %628, %625 : vector<12x128xf32>
    %630 = arith.select %627, %625, %629 : vector<12x128xi1>, vector<12x128xf32>
    %c0_549 = arith.constant 0 : index
    %c10_550 = arith.constant 10 : index
    %c0_551 = arith.constant 0 : index
    %c0_552 = arith.constant 0 : index
    %631 = vector.load %arg7[%c0_549, %c10_550, %c0_551, %c0_552] : memref<1x16x12x12xf32, #tpu.memory_space<vmem>>, vector<1x1x12x12xf32>
    %632 = vector.shape_cast %631 : vector<1x1x12x12xf32> to vector<12x12xf32>
    %cst_553 = arith.constant dense<0.000000e+00> : vector<12x128xf32>
    %633 = tpu.matmul %632, %630, %cst_553 {dimension_numbers = #tpu.dot_dimension_numbers<[1], [0], [0], [1], [0, 0, 1, 1], [], []>} : vector<12x12xf32>, vector<12x128xf32>, vector<12x128xf32> -> vector<12x128xf32>
    %c0_554 = arith.constant 0 : index
    %c10_555 = arith.constant 10 : index
    %c0_556 = arith.constant 0 : index
    %c0_557 = arith.constant 0 : index
    %634 = vector.load %arg8[%c0_554, %c10_555, %c0_556, %c0_557] : memref<1x16x12x1xf32, #tpu.memory_space<vmem>>, vector<1x1x12x1xf32>
    %635 = vector.shape_cast %634 : vector<1x1x12x1xf32> to vector<12x1xf32>
    %636 = vector.broadcast %635 : vector<12x1xf32> to vector<12x128xf32>
    %637 = arith.addf %633, %636 : vector<12x128xf32>
    %cst_558 = arith.constant 0.000000e+00 : f32
    %638 = vector.broadcast %cst_558 : f32 to vector<12x128xf32>
    %639 = arith.cmpf ogt, %637, %638 : vector<12x128xf32>
    %cst_559 = arith.constant 0.00999999977 : f32
    %640 = vector.broadcast %cst_559 : f32 to vector<12x128xf32>
    %641 = arith.mulf %640, %637 : vector<12x128xf32>
    %642 = arith.select %639, %637, %641 : vector<12x128xi1>, vector<12x128xf32>
    %c0_560 = arith.constant 0 : index
    %c10_561 = arith.constant 10 : index
    %c0_562 = arith.constant 0 : index
    %c0_563 = arith.constant 0 : index
    %643 = vector.load %arg9[%c0_560, %c10_561, %c0_562, %c0_563] : memref<1x16x1x12xf32, #tpu.memory_space<vmem>>, vector<1x1x1x12xf32>
    %644 = vector.shape_cast %643 : vector<1x1x1x12xf32> to vector<1x12xf32>
    %cst_564 = arith.constant dense<0.000000e+00> : vector<1x128xf32>
    %645 = tpu.matmul %644, %642, %cst_564 {dimension_numbers = #tpu.dot_dimension_numbers<[1], [0], [0], [1], [0, 0, 1, 1], [], []>} : vector<1x12xf32>, vector<12x128xf32>, vector<1x128xf32> -> vector<1x128xf32>
    %c0_565 = arith.constant 0 : index
    %c10_566 = arith.constant 10 : index
    %c0_567 = arith.constant 0 : index
    %c0_568 = arith.constant 0 : index
    %646 = vector.load %arg10[%c0_565, %c10_566, %c0_567, %c0_568] : memref<1x16x1x1xf32, #tpu.memory_space<vmem>>, vector<1x1x1x1xf32>
    %647 = vector.shape_cast %646 : vector<1x1x1x1xf32> to vector<1x1xf32>
    %648 = vector.broadcast %647 : vector<1x1xf32> to vector<1x128xf32>
    %649 = arith.addf %645, %648 : vector<1x128xf32>
    %cst_569 = arith.constant -1.000000e+00 : f32
    %cst_570 = arith.constant 1.000000e+00 : f32
    %650 = vector.broadcast %cst_569 : f32 to vector<1x128xf32>
    %651 = arith.maximumf %650, %649 : vector<1x128xf32>
    %652 = vector.broadcast %cst_570 : f32 to vector<1x128xf32>
    %653 = arith.minimumf %652, %651 : vector<1x128xf32>
    %654 = vector.extract_strided_slice %606 {offsets = [10, 0], sizes = [1, 128], strides = [1, 1]} : vector<16x128xf32> to vector<1x128xf32>
    %655 = arith.subf %654, %653 : vector<1x128xf32>
    %cst_571 = arith.constant 1.000000e+00 : f32
    %656 = vector.broadcast %cst_571 : f32 to vector<1x128xf32>
    %657 = arith.cmpf oge, %655, %656 : vector<1x128xf32>
    %cst_572 = arith.constant 2.000000e+00 : f32
    %cst_573 = arith.constant 0.000000e+00 : f32
    %658 = vector.broadcast %cst_572 : f32 to vector<1x128xf32>
    %659 = vector.broadcast %cst_573 : f32 to vector<1x128xf32>
    %660 = arith.select %657, %658, %659 : vector<1x128xi1>, vector<1x128xf32>
    %661 = arith.subf %655, %660 : vector<1x128xf32>
    %c0_574 = arith.constant 0 : index
    %c10_575 = arith.constant 10 : index
    %c0_576 = arith.constant 0 : index
    %662 = vector.load %arg11[%c0_574, %c10_575, %c0_576] : memref<1x16x128xf32, #tpu.memory_space<vmem>>, vector<1x1x128xf32>
    %663 = vector.shape_cast %662 : vector<1x1x128xf32> to vector<1x128xf32>
    %664 = vector.shape_cast %661 : vector<1x128xf32> to vector<1x1x128xf32>
    tpu.vector_store %arg11[%c0_574, %c10_575, %c0_576], %664 {strides = array<i32>} : memref<1x16x128xf32, #tpu.memory_space<vmem>>, vector<1x1x128xf32>,
    %c0_577 = arith.constant 0 : index
    %c0_578 = arith.constant 0 : index
    %c0_579 = arith.constant 0 : index
    %665 = vector.load %arg11[%c0_577, %c0_578, %c0_579] : memref<1x16x128xf32, #tpu.memory_space<vmem>>, vector<1x16x128xf32>
    %666 = vector.shape_cast %665 : vector<1x16x128xf32> to vector<16x128xf32>
    %c0_580 = arith.constant 0 : index
    %c11 = arith.constant 11 : index
    %c0_581 = arith.constant 0 : index
    %c0_582 = arith.constant 0 : index
    %667 = vector.load %arg3[%c0_580, %c11, %c0_581, %c0_582] : memref<1x16x12x16xf32, #tpu.memory_space<vmem>>, vector<1x1x12x16xf32>
    %668 = vector.shape_cast %667 : vector<1x1x12x16xf32> to vector<12x16xf32>
    %cst_583 = arith.constant dense<0.000000e+00> : vector<12x128xf32>
    %669 = tpu.matmul %668, %666, %cst_583 {dimension_numbers = #tpu.dot_dimension_numbers<[1], [0], [0], [1], [0, 0, 1, 1], [], []>} : vector<12x16xf32>, vector<16x128xf32>, vector<12x128xf32> -> vector<12x128xf32>
    %c0_584 = arith.constant 0 : index
    %c11_585 = arith.constant 11 : index
    %c0_586 = arith.constant 0 : index
    %c0_587 = arith.constant 0 : index
    %670 = vector.load %arg4[%c0_584, %c11_585, %c0_586, %c0_587] : memref<1x16x12x1xf32, #tpu.memory_space<vmem>>, vector<1x1x12x1xf32>
    %671 = vector.shape_cast %670 : vector<1x1x12x1xf32> to vector<12x1xf32>
    %672 = vector.broadcast %671 : vector<12x1xf32> to vector<12x128xf32>
    %673 = arith.addf %669, %672 : vector<12x128xf32>
    %cst_588 = arith.constant 0.000000e+00 : f32
    %674 = vector.broadcast %cst_588 : f32 to vector<12x128xf32>
    %675 = arith.cmpf ogt, %673, %674 : vector<12x128xf32>
    %cst_589 = arith.constant 0.00999999977 : f32
    %676 = vector.broadcast %cst_589 : f32 to vector<12x128xf32>
    %677 = arith.mulf %676, %673 : vector<12x128xf32>
    %678 = arith.select %675, %673, %677 : vector<12x128xi1>, vector<12x128xf32>
    %c0_590 = arith.constant 0 : index
    %c11_591 = arith.constant 11 : index
    %c0_592 = arith.constant 0 : index
    %c0_593 = arith.constant 0 : index
    %679 = vector.load %arg5[%c0_590, %c11_591, %c0_592, %c0_593] : memref<1x16x12x12xf32, #tpu.memory_space<vmem>>, vector<1x1x12x12xf32>
    %680 = vector.shape_cast %679 : vector<1x1x12x12xf32> to vector<12x12xf32>
    %cst_594 = arith.constant dense<0.000000e+00> : vector<12x128xf32>
    %681 = tpu.matmul %680, %678, %cst_594 {dimension_numbers = #tpu.dot_dimension_numbers<[1], [0], [0], [1], [0, 0, 1, 1], [], []>} : vector<12x12xf32>, vector<12x128xf32>, vector<12x128xf32> -> vector<12x128xf32>
    %c0_595 = arith.constant 0 : index
    %c11_596 = arith.constant 11 : index
    %c0_597 = arith.constant 0 : index
    %c0_598 = arith.constant 0 : index
    %682 = vector.load %arg6[%c0_595, %c11_596, %c0_597, %c0_598] : memref<1x16x12x1xf32, #tpu.memory_space<vmem>>, vector<1x1x12x1xf32>
    %683 = vector.shape_cast %682 : vector<1x1x12x1xf32> to vector<12x1xf32>
    %684 = vector.broadcast %683 : vector<12x1xf32> to vector<12x128xf32>
    %685 = arith.addf %681, %684 : vector<12x128xf32>
    %cst_599 = arith.constant 0.000000e+00 : f32
    %686 = vector.broadcast %cst_599 : f32 to vector<12x128xf32>
    %687 = arith.cmpf ogt, %685, %686 : vector<12x128xf32>
    %cst_600 = arith.constant 0.00999999977 : f32
    %688 = vector.broadcast %cst_600 : f32 to vector<12x128xf32>
    %689 = arith.mulf %688, %685 : vector<12x128xf32>
    %690 = arith.select %687, %685, %689 : vector<12x128xi1>, vector<12x128xf32>
    %c0_601 = arith.constant 0 : index
    %c11_602 = arith.constant 11 : index
    %c0_603 = arith.constant 0 : index
    %c0_604 = arith.constant 0 : index
    %691 = vector.load %arg7[%c0_601, %c11_602, %c0_603, %c0_604] : memref<1x16x12x12xf32, #tpu.memory_space<vmem>>, vector<1x1x12x12xf32>
    %692 = vector.shape_cast %691 : vector<1x1x12x12xf32> to vector<12x12xf32>
    %cst_605 = arith.constant dense<0.000000e+00> : vector<12x128xf32>
    %693 = tpu.matmul %692, %690, %cst_605 {dimension_numbers = #tpu.dot_dimension_numbers<[1], [0], [0], [1], [0, 0, 1, 1], [], []>} : vector<12x12xf32>, vector<12x128xf32>, vector<12x128xf32> -> vector<12x128xf32>
    %c0_606 = arith.constant 0 : index
    %c11_607 = arith.constant 11 : index
    %c0_608 = arith.constant 0 : index
    %c0_609 = arith.constant 0 : index
    %694 = vector.load %arg8[%c0_606, %c11_607, %c0_608, %c0_609] : memref<1x16x12x1xf32, #tpu.memory_space<vmem>>, vector<1x1x12x1xf32>
    %695 = vector.shape_cast %694 : vector<1x1x12x1xf32> to vector<12x1xf32>
    %696 = vector.broadcast %695 : vector<12x1xf32> to vector<12x128xf32>
    %697 = arith.addf %693, %696 : vector<12x128xf32>
    %cst_610 = arith.constant 0.000000e+00 : f32
    %698 = vector.broadcast %cst_610 : f32 to vector<12x128xf32>
    %699 = arith.cmpf ogt, %697, %698 : vector<12x128xf32>
    %cst_611 = arith.constant 0.00999999977 : f32
    %700 = vector.broadcast %cst_611 : f32 to vector<12x128xf32>
    %701 = arith.mulf %700, %697 : vector<12x128xf32>
    %702 = arith.select %699, %697, %701 : vector<12x128xi1>, vector<12x128xf32>
    %c0_612 = arith.constant 0 : index
    %c11_613 = arith.constant 11 : index
    %c0_614 = arith.constant 0 : index
    %c0_615 = arith.constant 0 : index
    %703 = vector.load %arg9[%c0_612, %c11_613, %c0_614, %c0_615] : memref<1x16x1x12xf32, #tpu.memory_space<vmem>>, vector<1x1x1x12xf32>
    %704 = vector.shape_cast %703 : vector<1x1x1x12xf32> to vector<1x12xf32>
    %cst_616 = arith.constant dense<0.000000e+00> : vector<1x128xf32>
    %705 = tpu.matmul %704, %702, %cst_616 {dimension_numbers = #tpu.dot_dimension_numbers<[1], [0], [0], [1], [0, 0, 1, 1], [], []>} : vector<1x12xf32>, vector<12x128xf32>, vector<1x128xf32> -> vector<1x128xf32>
    %c0_617 = arith.constant 0 : index
    %c11_618 = arith.constant 11 : index
    %c0_619 = arith.constant 0 : index
    %c0_620 = arith.constant 0 : index
    %706 = vector.load %arg10[%c0_617, %c11_618, %c0_619, %c0_620] : memref<1x16x1x1xf32, #tpu.memory_space<vmem>>, vector<1x1x1x1xf32>
    %707 = vector.shape_cast %706 : vector<1x1x1x1xf32> to vector<1x1xf32>
    %708 = vector.broadcast %707 : vector<1x1xf32> to vector<1x128xf32>
    %709 = arith.addf %705, %708 : vector<1x128xf32>
    %cst_621 = arith.constant -1.000000e+00 : f32
    %cst_622 = arith.constant 1.000000e+00 : f32
    %710 = vector.broadcast %cst_621 : f32 to vector<1x128xf32>
    %711 = arith.maximumf %710, %709 : vector<1x128xf32>
    %712 = vector.broadcast %cst_622 : f32 to vector<1x128xf32>
    %713 = arith.minimumf %712, %711 : vector<1x128xf32>
    %714 = vector.extract_strided_slice %666 {offsets = [11, 0], sizes = [1, 128], strides = [1, 1]} : vector<16x128xf32> to vector<1x128xf32>
    %715 = arith.subf %714, %713 : vector<1x128xf32>
    %cst_623 = arith.constant 1.000000e+00 : f32
    %716 = vector.broadcast %cst_623 : f32 to vector<1x128xf32>
    %717 = arith.cmpf oge, %715, %716 : vector<1x128xf32>
    %cst_624 = arith.constant 2.000000e+00 : f32
    %cst_625 = arith.constant 0.000000e+00 : f32
    %718 = vector.broadcast %cst_624 : f32 to vector<1x128xf32>
    %719 = vector.broadcast %cst_625 : f32 to vector<1x128xf32>
    %720 = arith.select %717, %718, %719 : vector<1x128xi1>, vector<1x128xf32>
    %721 = arith.subf %715, %720 : vector<1x128xf32>
    %c0_626 = arith.constant 0 : index
    %c11_627 = arith.constant 11 : index
    %c0_628 = arith.constant 0 : index
    %722 = vector.load %arg11[%c0_626, %c11_627, %c0_628] : memref<1x16x128xf32, #tpu.memory_space<vmem>>, vector<1x1x128xf32>
    %723 = vector.shape_cast %722 : vector<1x1x128xf32> to vector<1x128xf32>
    %724 = vector.shape_cast %721 : vector<1x128xf32> to vector<1x1x128xf32>
    tpu.vector_store %arg11[%c0_626, %c11_627, %c0_628], %724 {strides = array<i32>} : memref<1x16x128xf32, #tpu.memory_space<vmem>>, vector<1x1x128xf32>,
    %c0_629 = arith.constant 0 : index
    %c0_630 = arith.constant 0 : index
    %c0_631 = arith.constant 0 : index
    %725 = vector.load %arg11[%c0_629, %c0_630, %c0_631] : memref<1x16x128xf32, #tpu.memory_space<vmem>>, vector<1x16x128xf32>
    %726 = vector.shape_cast %725 : vector<1x16x128xf32> to vector<16x128xf32>
    %c0_632 = arith.constant 0 : index
    %c12 = arith.constant 12 : index
    %c0_633 = arith.constant 0 : index
    %c0_634 = arith.constant 0 : index
    %727 = vector.load %arg3[%c0_632, %c12, %c0_633, %c0_634] : memref<1x16x12x16xf32, #tpu.memory_space<vmem>>, vector<1x1x12x16xf32>
    %728 = vector.shape_cast %727 : vector<1x1x12x16xf32> to vector<12x16xf32>
    %cst_635 = arith.constant dense<0.000000e+00> : vector<12x128xf32>
    %729 = tpu.matmul %728, %726, %cst_635 {dimension_numbers = #tpu.dot_dimension_numbers<[1], [0], [0], [1], [0, 0, 1, 1], [], []>} : vector<12x16xf32>, vector<16x128xf32>, vector<12x128xf32> -> vector<12x128xf32>
    %c0_636 = arith.constant 0 : index
    %c12_637 = arith.constant 12 : index
    %c0_638 = arith.constant 0 : index
    %c0_639 = arith.constant 0 : index
    %730 = vector.load %arg4[%c0_636, %c12_637, %c0_638, %c0_639] : memref<1x16x12x1xf32, #tpu.memory_space<vmem>>, vector<1x1x12x1xf32>
    %731 = vector.shape_cast %730 : vector<1x1x12x1xf32> to vector<12x1xf32>
    %732 = vector.broadcast %731 : vector<12x1xf32> to vector<12x128xf32>
    %733 = arith.addf %729, %732 : vector<12x128xf32>
    %cst_640 = arith.constant 0.000000e+00 : f32
    %734 = vector.broadcast %cst_640 : f32 to vector<12x128xf32>
    %735 = arith.cmpf ogt, %733, %734 : vector<12x128xf32>
    %cst_641 = arith.constant 0.00999999977 : f32
    %736 = vector.broadcast %cst_641 : f32 to vector<12x128xf32>
    %737 = arith.mulf %736, %733 : vector<12x128xf32>
    %738 = arith.select %735, %733, %737 : vector<12x128xi1>, vector<12x128xf32>
    %c0_642 = arith.constant 0 : index
    %c12_643 = arith.constant 12 : index
    %c0_644 = arith.constant 0 : index
    %c0_645 = arith.constant 0 : index
    %739 = vector.load %arg5[%c0_642, %c12_643, %c0_644, %c0_645] : memref<1x16x12x12xf32, #tpu.memory_space<vmem>>, vector<1x1x12x12xf32>
    %740 = vector.shape_cast %739 : vector<1x1x12x12xf32> to vector<12x12xf32>
    %cst_646 = arith.constant dense<0.000000e+00> : vector<12x128xf32>
    %741 = tpu.matmul %740, %738, %cst_646 {dimension_numbers = #tpu.dot_dimension_numbers<[1], [0], [0], [1], [0, 0, 1, 1], [], []>} : vector<12x12xf32>, vector<12x128xf32>, vector<12x128xf32> -> vector<12x128xf32>
    %c0_647 = arith.constant 0 : index
    %c12_648 = arith.constant 12 : index
    %c0_649 = arith.constant 0 : index
    %c0_650 = arith.constant 0 : index
    %742 = vector.load %arg6[%c0_647, %c12_648, %c0_649, %c0_650] : memref<1x16x12x1xf32, #tpu.memory_space<vmem>>, vector<1x1x12x1xf32>
    %743 = vector.shape_cast %742 : vector<1x1x12x1xf32> to vector<12x1xf32>
    %744 = vector.broadcast %743 : vector<12x1xf32> to vector<12x128xf32>
    %745 = arith.addf %741, %744 : vector<12x128xf32>
    %cst_651 = arith.constant 0.000000e+00 : f32
    %746 = vector.broadcast %cst_651 : f32 to vector<12x128xf32>
    %747 = arith.cmpf ogt, %745, %746 : vector<12x128xf32>
    %cst_652 = arith.constant 0.00999999977 : f32
    %748 = vector.broadcast %cst_652 : f32 to vector<12x128xf32>
    %749 = arith.mulf %748, %745 : vector<12x128xf32>
    %750 = arith.select %747, %745, %749 : vector<12x128xi1>, vector<12x128xf32>
    %c0_653 = arith.constant 0 : index
    %c12_654 = arith.constant 12 : index
    %c0_655 = arith.constant 0 : index
    %c0_656 = arith.constant 0 : index
    %751 = vector.load %arg7[%c0_653, %c12_654, %c0_655, %c0_656] : memref<1x16x12x12xf32, #tpu.memory_space<vmem>>, vector<1x1x12x12xf32>
    %752 = vector.shape_cast %751 : vector<1x1x12x12xf32> to vector<12x12xf32>
    %cst_657 = arith.constant dense<0.000000e+00> : vector<12x128xf32>
    %753 = tpu.matmul %752, %750, %cst_657 {dimension_numbers = #tpu.dot_dimension_numbers<[1], [0], [0], [1], [0, 0, 1, 1], [], []>} : vector<12x12xf32>, vector<12x128xf32>, vector<12x128xf32> -> vector<12x128xf32>
    %c0_658 = arith.constant 0 : index
    %c12_659 = arith.constant 12 : index
    %c0_660 = arith.constant 0 : index
    %c0_661 = arith.constant 0 : index
    %754 = vector.load %arg8[%c0_658, %c12_659, %c0_660, %c0_661] : memref<1x16x12x1xf32, #tpu.memory_space<vmem>>, vector<1x1x12x1xf32>
    %755 = vector.shape_cast %754 : vector<1x1x12x1xf32> to vector<12x1xf32>
    %756 = vector.broadcast %755 : vector<12x1xf32> to vector<12x128xf32>
    %757 = arith.addf %753, %756 : vector<12x128xf32>
    %cst_662 = arith.constant 0.000000e+00 : f32
    %758 = vector.broadcast %cst_662 : f32 to vector<12x128xf32>
    %759 = arith.cmpf ogt, %757, %758 : vector<12x128xf32>
    %cst_663 = arith.constant 0.00999999977 : f32
    %760 = vector.broadcast %cst_663 : f32 to vector<12x128xf32>
    %761 = arith.mulf %760, %757 : vector<12x128xf32>
    %762 = arith.select %759, %757, %761 : vector<12x128xi1>, vector<12x128xf32>
    %c0_664 = arith.constant 0 : index
    %c12_665 = arith.constant 12 : index
    %c0_666 = arith.constant 0 : index
    %c0_667 = arith.constant 0 : index
    %763 = vector.load %arg9[%c0_664, %c12_665, %c0_666, %c0_667] : memref<1x16x1x12xf32, #tpu.memory_space<vmem>>, vector<1x1x1x12xf32>
    %764 = vector.shape_cast %763 : vector<1x1x1x12xf32> to vector<1x12xf32>
    %cst_668 = arith.constant dense<0.000000e+00> : vector<1x128xf32>
    %765 = tpu.matmul %764, %762, %cst_668 {dimension_numbers = #tpu.dot_dimension_numbers<[1], [0], [0], [1], [0, 0, 1, 1], [], []>} : vector<1x12xf32>, vector<12x128xf32>, vector<1x128xf32> -> vector<1x128xf32>
    %c0_669 = arith.constant 0 : index
    %c12_670 = arith.constant 12 : index
    %c0_671 = arith.constant 0 : index
    %c0_672 = arith.constant 0 : index
    %766 = vector.load %arg10[%c0_669, %c12_670, %c0_671, %c0_672] : memref<1x16x1x1xf32, #tpu.memory_space<vmem>>, vector<1x1x1x1xf32>
    %767 = vector.shape_cast %766 : vector<1x1x1x1xf32> to vector<1x1xf32>
    %768 = vector.broadcast %767 : vector<1x1xf32> to vector<1x128xf32>
    %769 = arith.addf %765, %768 : vector<1x128xf32>
    %cst_673 = arith.constant -1.000000e+00 : f32
    %cst_674 = arith.constant 1.000000e+00 : f32
    %770 = vector.broadcast %cst_673 : f32 to vector<1x128xf32>
    %771 = arith.maximumf %770, %769 : vector<1x128xf32>
    %772 = vector.broadcast %cst_674 : f32 to vector<1x128xf32>
    %773 = arith.minimumf %772, %771 : vector<1x128xf32>
    %774 = vector.extract_strided_slice %726 {offsets = [12, 0], sizes = [1, 128], strides = [1, 1]} : vector<16x128xf32> to vector<1x128xf32>
    %775 = arith.subf %774, %773 : vector<1x128xf32>
    %cst_675 = arith.constant 1.000000e+00 : f32
    %776 = vector.broadcast %cst_675 : f32 to vector<1x128xf32>
    %777 = arith.cmpf oge, %775, %776 : vector<1x128xf32>
    %cst_676 = arith.constant 2.000000e+00 : f32
    %cst_677 = arith.constant 0.000000e+00 : f32
    %778 = vector.broadcast %cst_676 : f32 to vector<1x128xf32>
    %779 = vector.broadcast %cst_677 : f32 to vector<1x128xf32>
    %780 = arith.select %777, %778, %779 : vector<1x128xi1>, vector<1x128xf32>
    %781 = arith.subf %775, %780 : vector<1x128xf32>
    %c0_678 = arith.constant 0 : index
    %c12_679 = arith.constant 12 : index
    %c0_680 = arith.constant 0 : index
    %782 = vector.load %arg11[%c0_678, %c12_679, %c0_680] : memref<1x16x128xf32, #tpu.memory_space<vmem>>, vector<1x1x128xf32>
    %783 = vector.shape_cast %782 : vector<1x1x128xf32> to vector<1x128xf32>
    %784 = vector.shape_cast %781 : vector<1x128xf32> to vector<1x1x128xf32>
    tpu.vector_store %arg11[%c0_678, %c12_679, %c0_680], %784 {strides = array<i32>} : memref<1x16x128xf32, #tpu.memory_space<vmem>>, vector<1x1x128xf32>,
    %c0_681 = arith.constant 0 : index
    %c0_682 = arith.constant 0 : index
    %c0_683 = arith.constant 0 : index
    %785 = vector.load %arg11[%c0_681, %c0_682, %c0_683] : memref<1x16x128xf32, #tpu.memory_space<vmem>>, vector<1x16x128xf32>
    %786 = vector.shape_cast %785 : vector<1x16x128xf32> to vector<16x128xf32>
    %c0_684 = arith.constant 0 : index
    %c13 = arith.constant 13 : index
    %c0_685 = arith.constant 0 : index
    %c0_686 = arith.constant 0 : index
    %787 = vector.load %arg3[%c0_684, %c13, %c0_685, %c0_686] : memref<1x16x12x16xf32, #tpu.memory_space<vmem>>, vector<1x1x12x16xf32>
    %788 = vector.shape_cast %787 : vector<1x1x12x16xf32> to vector<12x16xf32>
    %cst_687 = arith.constant dense<0.000000e+00> : vector<12x128xf32>
    %789 = tpu.matmul %788, %786, %cst_687 {dimension_numbers = #tpu.dot_dimension_numbers<[1], [0], [0], [1], [0, 0, 1, 1], [], []>} : vector<12x16xf32>, vector<16x128xf32>, vector<12x128xf32> -> vector<12x128xf32>
    %c0_688 = arith.constant 0 : index
    %c13_689 = arith.constant 13 : index
    %c0_690 = arith.constant 0 : index
    %c0_691 = arith.constant 0 : index
    %790 = vector.load %arg4[%c0_688, %c13_689, %c0_690, %c0_691] : memref<1x16x12x1xf32, #tpu.memory_space<vmem>>, vector<1x1x12x1xf32>
    %791 = vector.shape_cast %790 : vector<1x1x12x1xf32> to vector<12x1xf32>
    %792 = vector.broadcast %791 : vector<12x1xf32> to vector<12x128xf32>
    %793 = arith.addf %789, %792 : vector<12x128xf32>
    %cst_692 = arith.constant 0.000000e+00 : f32
    %794 = vector.broadcast %cst_692 : f32 to vector<12x128xf32>
    %795 = arith.cmpf ogt, %793, %794 : vector<12x128xf32>
    %cst_693 = arith.constant 0.00999999977 : f32
    %796 = vector.broadcast %cst_693 : f32 to vector<12x128xf32>
    %797 = arith.mulf %796, %793 : vector<12x128xf32>
    %798 = arith.select %795, %793, %797 : vector<12x128xi1>, vector<12x128xf32>
    %c0_694 = arith.constant 0 : index
    %c13_695 = arith.constant 13 : index
    %c0_696 = arith.constant 0 : index
    %c0_697 = arith.constant 0 : index
    %799 = vector.load %arg5[%c0_694, %c13_695, %c0_696, %c0_697] : memref<1x16x12x12xf32, #tpu.memory_space<vmem>>, vector<1x1x12x12xf32>
    %800 = vector.shape_cast %799 : vector<1x1x12x12xf32> to vector<12x12xf32>
    %cst_698 = arith.constant dense<0.000000e+00> : vector<12x128xf32>
    %801 = tpu.matmul %800, %798, %cst_698 {dimension_numbers = #tpu.dot_dimension_numbers<[1], [0], [0], [1], [0, 0, 1, 1], [], []>} : vector<12x12xf32>, vector<12x128xf32>, vector<12x128xf32> -> vector<12x128xf32>
    %c0_699 = arith.constant 0 : index
    %c13_700 = arith.constant 13 : index
    %c0_701 = arith.constant 0 : index
    %c0_702 = arith.constant 0 : index
    %802 = vector.load %arg6[%c0_699, %c13_700, %c0_701, %c0_702] : memref<1x16x12x1xf32, #tpu.memory_space<vmem>>, vector<1x1x12x1xf32>
    %803 = vector.shape_cast %802 : vector<1x1x12x1xf32> to vector<12x1xf32>
    %804 = vector.broadcast %803 : vector<12x1xf32> to vector<12x128xf32>
    %805 = arith.addf %801, %804 : vector<12x128xf32>
    %cst_703 = arith.constant 0.000000e+00 : f32
    %806 = vector.broadcast %cst_703 : f32 to vector<12x128xf32>
    %807 = arith.cmpf ogt, %805, %806 : vector<12x128xf32>
    %cst_704 = arith.constant 0.00999999977 : f32
    %808 = vector.broadcast %cst_704 : f32 to vector<12x128xf32>
    %809 = arith.mulf %808, %805 : vector<12x128xf32>
    %810 = arith.select %807, %805, %809 : vector<12x128xi1>, vector<12x128xf32>
    %c0_705 = arith.constant 0 : index
    %c13_706 = arith.constant 13 : index
    %c0_707 = arith.constant 0 : index
    %c0_708 = arith.constant 0 : index
    %811 = vector.load %arg7[%c0_705, %c13_706, %c0_707, %c0_708] : memref<1x16x12x12xf32, #tpu.memory_space<vmem>>, vector<1x1x12x12xf32>
    %812 = vector.shape_cast %811 : vector<1x1x12x12xf32> to vector<12x12xf32>
    %cst_709 = arith.constant dense<0.000000e+00> : vector<12x128xf32>
    %813 = tpu.matmul %812, %810, %cst_709 {dimension_numbers = #tpu.dot_dimension_numbers<[1], [0], [0], [1], [0, 0, 1, 1], [], []>} : vector<12x12xf32>, vector<12x128xf32>, vector<12x128xf32> -> vector<12x128xf32>
    %c0_710 = arith.constant 0 : index
    %c13_711 = arith.constant 13 : index
    %c0_712 = arith.constant 0 : index
    %c0_713 = arith.constant 0 : index
    %814 = vector.load %arg8[%c0_710, %c13_711, %c0_712, %c0_713] : memref<1x16x12x1xf32, #tpu.memory_space<vmem>>, vector<1x1x12x1xf32>
    %815 = vector.shape_cast %814 : vector<1x1x12x1xf32> to vector<12x1xf32>
    %816 = vector.broadcast %815 : vector<12x1xf32> to vector<12x128xf32>
    %817 = arith.addf %813, %816 : vector<12x128xf32>
    %cst_714 = arith.constant 0.000000e+00 : f32
    %818 = vector.broadcast %cst_714 : f32 to vector<12x128xf32>
    %819 = arith.cmpf ogt, %817, %818 : vector<12x128xf32>
    %cst_715 = arith.constant 0.00999999977 : f32
    %820 = vector.broadcast %cst_715 : f32 to vector<12x128xf32>
    %821 = arith.mulf %820, %817 : vector<12x128xf32>
    %822 = arith.select %819, %817, %821 : vector<12x128xi1>, vector<12x128xf32>
    %c0_716 = arith.constant 0 : index
    %c13_717 = arith.constant 13 : index
    %c0_718 = arith.constant 0 : index
    %c0_719 = arith.constant 0 : index
    %823 = vector.load %arg9[%c0_716, %c13_717, %c0_718, %c0_719] : memref<1x16x1x12xf32, #tpu.memory_space<vmem>>, vector<1x1x1x12xf32>
    %824 = vector.shape_cast %823 : vector<1x1x1x12xf32> to vector<1x12xf32>
    %cst_720 = arith.constant dense<0.000000e+00> : vector<1x128xf32>
    %825 = tpu.matmul %824, %822, %cst_720 {dimension_numbers = #tpu.dot_dimension_numbers<[1], [0], [0], [1], [0, 0, 1, 1], [], []>} : vector<1x12xf32>, vector<12x128xf32>, vector<1x128xf32> -> vector<1x128xf32>
    %c0_721 = arith.constant 0 : index
    %c13_722 = arith.constant 13 : index
    %c0_723 = arith.constant 0 : index
    %c0_724 = arith.constant 0 : index
    %826 = vector.load %arg10[%c0_721, %c13_722, %c0_723, %c0_724] : memref<1x16x1x1xf32, #tpu.memory_space<vmem>>, vector<1x1x1x1xf32>
    %827 = vector.shape_cast %826 : vector<1x1x1x1xf32> to vector<1x1xf32>
    %828 = vector.broadcast %827 : vector<1x1xf32> to vector<1x128xf32>
    %829 = arith.addf %825, %828 : vector<1x128xf32>
    %cst_725 = arith.constant -1.000000e+00 : f32
    %cst_726 = arith.constant 1.000000e+00 : f32
    %830 = vector.broadcast %cst_725 : f32 to vector<1x128xf32>
    %831 = arith.maximumf %830, %829 : vector<1x128xf32>
    %832 = vector.broadcast %cst_726 : f32 to vector<1x128xf32>
    %833 = arith.minimumf %832, %831 : vector<1x128xf32>
    %834 = vector.extract_strided_slice %786 {offsets = [13, 0], sizes = [1, 128], strides = [1, 1]} : vector<16x128xf32> to vector<1x128xf32>
    %835 = arith.subf %834, %833 : vector<1x128xf32>
    %cst_727 = arith.constant 1.000000e+00 : f32
    %836 = vector.broadcast %cst_727 : f32 to vector<1x128xf32>
    %837 = arith.cmpf oge, %835, %836 : vector<1x128xf32>
    %cst_728 = arith.constant 2.000000e+00 : f32
    %cst_729 = arith.constant 0.000000e+00 : f32
    %838 = vector.broadcast %cst_728 : f32 to vector<1x128xf32>
    %839 = vector.broadcast %cst_729 : f32 to vector<1x128xf32>
    %840 = arith.select %837, %838, %839 : vector<1x128xi1>, vector<1x128xf32>
    %841 = arith.subf %835, %840 : vector<1x128xf32>
    %c0_730 = arith.constant 0 : index
    %c13_731 = arith.constant 13 : index
    %c0_732 = arith.constant 0 : index
    %842 = vector.load %arg11[%c0_730, %c13_731, %c0_732] : memref<1x16x128xf32, #tpu.memory_space<vmem>>, vector<1x1x128xf32>
    %843 = vector.shape_cast %842 : vector<1x1x128xf32> to vector<1x128xf32>
    %844 = vector.shape_cast %841 : vector<1x128xf32> to vector<1x1x128xf32>
    tpu.vector_store %arg11[%c0_730, %c13_731, %c0_732], %844 {strides = array<i32>} : memref<1x16x128xf32, #tpu.memory_space<vmem>>, vector<1x1x128xf32>,
    %c0_733 = arith.constant 0 : index
    %c0_734 = arith.constant 0 : index
    %c0_735 = arith.constant 0 : index
    %845 = vector.load %arg11[%c0_733, %c0_734, %c0_735] : memref<1x16x128xf32, #tpu.memory_space<vmem>>, vector<1x16x128xf32>
    %846 = vector.shape_cast %845 : vector<1x16x128xf32> to vector<16x128xf32>
    %c0_736 = arith.constant 0 : index
    %c14 = arith.constant 14 : index
    %c0_737 = arith.constant 0 : index
    %c0_738 = arith.constant 0 : index
    %847 = vector.load %arg3[%c0_736, %c14, %c0_737, %c0_738] : memref<1x16x12x16xf32, #tpu.memory_space<vmem>>, vector<1x1x12x16xf32>
    %848 = vector.shape_cast %847 : vector<1x1x12x16xf32> to vector<12x16xf32>
    %cst_739 = arith.constant dense<0.000000e+00> : vector<12x128xf32>
    %849 = tpu.matmul %848, %846, %cst_739 {dimension_numbers = #tpu.dot_dimension_numbers<[1], [0], [0], [1], [0, 0, 1, 1], [], []>} : vector<12x16xf32>, vector<16x128xf32>, vector<12x128xf32> -> vector<12x128xf32>
    %c0_740 = arith.constant 0 : index
    %c14_741 = arith.constant 14 : index
    %c0_742 = arith.constant 0 : index
    %c0_743 = arith.constant 0 : index
    %850 = vector.load %arg4[%c0_740, %c14_741, %c0_742, %c0_743] : memref<1x16x12x1xf32, #tpu.memory_space<vmem>>, vector<1x1x12x1xf32>
    %851 = vector.shape_cast %850 : vector<1x1x12x1xf32> to vector<12x1xf32>
    %852 = vector.broadcast %851 : vector<12x1xf32> to vector<12x128xf32>
    %853 = arith.addf %849, %852 : vector<12x128xf32>
    %cst_744 = arith.constant 0.000000e+00 : f32
    %854 = vector.broadcast %cst_744 : f32 to vector<12x128xf32>
    %855 = arith.cmpf ogt, %853, %854 : vector<12x128xf32>
    %cst_745 = arith.constant 0.00999999977 : f32
    %856 = vector.broadcast %cst_745 : f32 to vector<12x128xf32>
    %857 = arith.mulf %856, %853 : vector<12x128xf32>
    %858 = arith.select %855, %853, %857 : vector<12x128xi1>, vector<12x128xf32>
    %c0_746 = arith.constant 0 : index
    %c14_747 = arith.constant 14 : index
    %c0_748 = arith.constant 0 : index
    %c0_749 = arith.constant 0 : index
    %859 = vector.load %arg5[%c0_746, %c14_747, %c0_748, %c0_749] : memref<1x16x12x12xf32, #tpu.memory_space<vmem>>, vector<1x1x12x12xf32>
    %860 = vector.shape_cast %859 : vector<1x1x12x12xf32> to vector<12x12xf32>
    %cst_750 = arith.constant dense<0.000000e+00> : vector<12x128xf32>
    %861 = tpu.matmul %860, %858, %cst_750 {dimension_numbers = #tpu.dot_dimension_numbers<[1], [0], [0], [1], [0, 0, 1, 1], [], []>} : vector<12x12xf32>, vector<12x128xf32>, vector<12x128xf32> -> vector<12x128xf32>
    %c0_751 = arith.constant 0 : index
    %c14_752 = arith.constant 14 : index
    %c0_753 = arith.constant 0 : index
    %c0_754 = arith.constant 0 : index
    %862 = vector.load %arg6[%c0_751, %c14_752, %c0_753, %c0_754] : memref<1x16x12x1xf32, #tpu.memory_space<vmem>>, vector<1x1x12x1xf32>
    %863 = vector.shape_cast %862 : vector<1x1x12x1xf32> to vector<12x1xf32>
    %864 = vector.broadcast %863 : vector<12x1xf32> to vector<12x128xf32>
    %865 = arith.addf %861, %864 : vector<12x128xf32>
    %cst_755 = arith.constant 0.000000e+00 : f32
    %866 = vector.broadcast %cst_755 : f32 to vector<12x128xf32>
    %867 = arith.cmpf ogt, %865, %866 : vector<12x128xf32>
    %cst_756 = arith.constant 0.00999999977 : f32
    %868 = vector.broadcast %cst_756 : f32 to vector<12x128xf32>
    %869 = arith.mulf %868, %865 : vector<12x128xf32>
    %870 = arith.select %867, %865, %869 : vector<12x128xi1>, vector<12x128xf32>
    %c0_757 = arith.constant 0 : index
    %c14_758 = arith.constant 14 : index
    %c0_759 = arith.constant 0 : index
    %c0_760 = arith.constant 0 : index
    %871 = vector.load %arg7[%c0_757, %c14_758, %c0_759, %c0_760] : memref<1x16x12x12xf32, #tpu.memory_space<vmem>>, vector<1x1x12x12xf32>
    %872 = vector.shape_cast %871 : vector<1x1x12x12xf32> to vector<12x12xf32>
    %cst_761 = arith.constant dense<0.000000e+00> : vector<12x128xf32>
    %873 = tpu.matmul %872, %870, %cst_761 {dimension_numbers = #tpu.dot_dimension_numbers<[1], [0], [0], [1], [0, 0, 1, 1], [], []>} : vector<12x12xf32>, vector<12x128xf32>, vector<12x128xf32> -> vector<12x128xf32>
    %c0_762 = arith.constant 0 : index
    %c14_763 = arith.constant 14 : index
    %c0_764 = arith.constant 0 : index
    %c0_765 = arith.constant 0 : index
    %874 = vector.load %arg8[%c0_762, %c14_763, %c0_764, %c0_765] : memref<1x16x12x1xf32, #tpu.memory_space<vmem>>, vector<1x1x12x1xf32>
    %875 = vector.shape_cast %874 : vector<1x1x12x1xf32> to vector<12x1xf32>
    %876 = vector.broadcast %875 : vector<12x1xf32> to vector<12x128xf32>
    %877 = arith.addf %873, %876 : vector<12x128xf32>
    %cst_766 = arith.constant 0.000000e+00 : f32
    %878 = vector.broadcast %cst_766 : f32 to vector<12x128xf32>
    %879 = arith.cmpf ogt, %877, %878 : vector<12x128xf32>
    %cst_767 = arith.constant 0.00999999977 : f32
    %880 = vector.broadcast %cst_767 : f32 to vector<12x128xf32>
    %881 = arith.mulf %880, %877 : vector<12x128xf32>
    %882 = arith.select %879, %877, %881 : vector<12x128xi1>, vector<12x128xf32>
    %c0_768 = arith.constant 0 : index
    %c14_769 = arith.constant 14 : index
    %c0_770 = arith.constant 0 : index
    %c0_771 = arith.constant 0 : index
    %883 = vector.load %arg9[%c0_768, %c14_769, %c0_770, %c0_771] : memref<1x16x1x12xf32, #tpu.memory_space<vmem>>, vector<1x1x1x12xf32>
    %884 = vector.shape_cast %883 : vector<1x1x1x12xf32> to vector<1x12xf32>
    %cst_772 = arith.constant dense<0.000000e+00> : vector<1x128xf32>
    %885 = tpu.matmul %884, %882, %cst_772 {dimension_numbers = #tpu.dot_dimension_numbers<[1], [0], [0], [1], [0, 0, 1, 1], [], []>} : vector<1x12xf32>, vector<12x128xf32>, vector<1x128xf32> -> vector<1x128xf32>
    %c0_773 = arith.constant 0 : index
    %c14_774 = arith.constant 14 : index
    %c0_775 = arith.constant 0 : index
    %c0_776 = arith.constant 0 : index
    %886 = vector.load %arg10[%c0_773, %c14_774, %c0_775, %c0_776] : memref<1x16x1x1xf32, #tpu.memory_space<vmem>>, vector<1x1x1x1xf32>
    %887 = vector.shape_cast %886 : vector<1x1x1x1xf32> to vector<1x1xf32>
    %888 = vector.broadcast %887 : vector<1x1xf32> to vector<1x128xf32>
    %889 = arith.addf %885, %888 : vector<1x128xf32>
    %cst_777 = arith.constant -1.000000e+00 : f32
    %cst_778 = arith.constant 1.000000e+00 : f32
    %890 = vector.broadcast %cst_777 : f32 to vector<1x128xf32>
    %891 = arith.maximumf %890, %889 : vector<1x128xf32>
    %892 = vector.broadcast %cst_778 : f32 to vector<1x128xf32>
    %893 = arith.minimumf %892, %891 : vector<1x128xf32>
    %894 = vector.extract_strided_slice %846 {offsets = [14, 0], sizes = [1, 128], strides = [1, 1]} : vector<16x128xf32> to vector<1x128xf32>
    %895 = arith.subf %894, %893 : vector<1x128xf32>
    %cst_779 = arith.constant 1.000000e+00 : f32
    %896 = vector.broadcast %cst_779 : f32 to vector<1x128xf32>
    %897 = arith.cmpf oge, %895, %896 : vector<1x128xf32>
    %cst_780 = arith.constant 2.000000e+00 : f32
    %cst_781 = arith.constant 0.000000e+00 : f32
    %898 = vector.broadcast %cst_780 : f32 to vector<1x128xf32>
    %899 = vector.broadcast %cst_781 : f32 to vector<1x128xf32>
    %900 = arith.select %897, %898, %899 : vector<1x128xi1>, vector<1x128xf32>
    %901 = arith.subf %895, %900 : vector<1x128xf32>
    %c0_782 = arith.constant 0 : index
    %c14_783 = arith.constant 14 : index
    %c0_784 = arith.constant 0 : index
    %902 = vector.load %arg11[%c0_782, %c14_783, %c0_784] : memref<1x16x128xf32, #tpu.memory_space<vmem>>, vector<1x1x128xf32>
    %903 = vector.shape_cast %902 : vector<1x1x128xf32> to vector<1x128xf32>
    %904 = vector.shape_cast %901 : vector<1x128xf32> to vector<1x1x128xf32>
    tpu.vector_store %arg11[%c0_782, %c14_783, %c0_784], %904 {strides = array<i32>} : memref<1x16x128xf32, #tpu.memory_space<vmem>>, vector<1x1x128xf32>,
    %c0_785 = arith.constant 0 : index
    %c0_786 = arith.constant 0 : index
    %c0_787 = arith.constant 0 : index
    %905 = vector.load %arg11[%c0_785, %c0_786, %c0_787] : memref<1x16x128xf32, #tpu.memory_space<vmem>>, vector<1x16x128xf32>
    %906 = vector.shape_cast %905 : vector<1x16x128xf32> to vector<16x128xf32>
    %c0_788 = arith.constant 0 : index
    %c15 = arith.constant 15 : index
    %c0_789 = arith.constant 0 : index
    %c0_790 = arith.constant 0 : index
    %907 = vector.load %arg3[%c0_788, %c15, %c0_789, %c0_790] : memref<1x16x12x16xf32, #tpu.memory_space<vmem>>, vector<1x1x12x16xf32>
    %908 = vector.shape_cast %907 : vector<1x1x12x16xf32> to vector<12x16xf32>
    %cst_791 = arith.constant dense<0.000000e+00> : vector<12x128xf32>
    %909 = tpu.matmul %908, %906, %cst_791 {dimension_numbers = #tpu.dot_dimension_numbers<[1], [0], [0], [1], [0, 0, 1, 1], [], []>} : vector<12x16xf32>, vector<16x128xf32>, vector<12x128xf32> -> vector<12x128xf32>
    %c0_792 = arith.constant 0 : index
    %c15_793 = arith.constant 15 : index
    %c0_794 = arith.constant 0 : index
    %c0_795 = arith.constant 0 : index
    %910 = vector.load %arg4[%c0_792, %c15_793, %c0_794, %c0_795] : memref<1x16x12x1xf32, #tpu.memory_space<vmem>>, vector<1x1x12x1xf32>
    %911 = vector.shape_cast %910 : vector<1x1x12x1xf32> to vector<12x1xf32>
    %912 = vector.broadcast %911 : vector<12x1xf32> to vector<12x128xf32>
    %913 = arith.addf %909, %912 : vector<12x128xf32>
    %cst_796 = arith.constant 0.000000e+00 : f32
    %914 = vector.broadcast %cst_796 : f32 to vector<12x128xf32>
    %915 = arith.cmpf ogt, %913, %914 : vector<12x128xf32>
    %cst_797 = arith.constant 0.00999999977 : f32
    %916 = vector.broadcast %cst_797 : f32 to vector<12x128xf32>
    %917 = arith.mulf %916, %913 : vector<12x128xf32>
    %918 = arith.select %915, %913, %917 : vector<12x128xi1>, vector<12x128xf32>
    %c0_798 = arith.constant 0 : index
    %c15_799 = arith.constant 15 : index
    %c0_800 = arith.constant 0 : index
    %c0_801 = arith.constant 0 : index
    %919 = vector.load %arg5[%c0_798, %c15_799, %c0_800, %c0_801] : memref<1x16x12x12xf32, #tpu.memory_space<vmem>>, vector<1x1x12x12xf32>
    %920 = vector.shape_cast %919 : vector<1x1x12x12xf32> to vector<12x12xf32>
    %cst_802 = arith.constant dense<0.000000e+00> : vector<12x128xf32>
    %921 = tpu.matmul %920, %918, %cst_802 {dimension_numbers = #tpu.dot_dimension_numbers<[1], [0], [0], [1], [0, 0, 1, 1], [], []>} : vector<12x12xf32>, vector<12x128xf32>, vector<12x128xf32> -> vector<12x128xf32>
    %c0_803 = arith.constant 0 : index
    %c15_804 = arith.constant 15 : index
    %c0_805 = arith.constant 0 : index
    %c0_806 = arith.constant 0 : index
    %922 = vector.load %arg6[%c0_803, %c15_804, %c0_805, %c0_806] : memref<1x16x12x1xf32, #tpu.memory_space<vmem>>, vector<1x1x12x1xf32>
    %923 = vector.shape_cast %922 : vector<1x1x12x1xf32> to vector<12x1xf32>
    %924 = vector.broadcast %923 : vector<12x1xf32> to vector<12x128xf32>
    %925 = arith.addf %921, %924 : vector<12x128xf32>
    %cst_807 = arith.constant 0.000000e+00 : f32
    %926 = vector.broadcast %cst_807 : f32 to vector<12x128xf32>
    %927 = arith.cmpf ogt, %925, %926 : vector<12x128xf32>
    %cst_808 = arith.constant 0.00999999977 : f32
    %928 = vector.broadcast %cst_808 : f32 to vector<12x128xf32>
    %929 = arith.mulf %928, %925 : vector<12x128xf32>
    %930 = arith.select %927, %925, %929 : vector<12x128xi1>, vector<12x128xf32>
    %c0_809 = arith.constant 0 : index
    %c15_810 = arith.constant 15 : index
    %c0_811 = arith.constant 0 : index
    %c0_812 = arith.constant 0 : index
    %931 = vector.load %arg7[%c0_809, %c15_810, %c0_811, %c0_812] : memref<1x16x12x12xf32, #tpu.memory_space<vmem>>, vector<1x1x12x12xf32>
    %932 = vector.shape_cast %931 : vector<1x1x12x12xf32> to vector<12x12xf32>
    %cst_813 = arith.constant dense<0.000000e+00> : vector<12x128xf32>
    %933 = tpu.matmul %932, %930, %cst_813 {dimension_numbers = #tpu.dot_dimension_numbers<[1], [0], [0], [1], [0, 0, 1, 1], [], []>} : vector<12x12xf32>, vector<12x128xf32>, vector<12x128xf32> -> vector<12x128xf32>
    %c0_814 = arith.constant 0 : index
    %c15_815 = arith.constant 15 : index
    %c0_816 = arith.constant 0 : index
    %c0_817 = arith.constant 0 : index
    %934 = vector.load %arg8[%c0_814, %c15_815, %c0_816, %c0_817] : memref<1x16x12x1xf32, #tpu.memory_space<vmem>>, vector<1x1x12x1xf32>
    %935 = vector.shape_cast %934 : vector<1x1x12x1xf32> to vector<12x1xf32>
    %936 = vector.broadcast %935 : vector<12x1xf32> to vector<12x128xf32>
    %937 = arith.addf %933, %936 : vector<12x128xf32>
    %cst_818 = arith.constant 0.000000e+00 : f32
    %938 = vector.broadcast %cst_818 : f32 to vector<12x128xf32>
    %939 = arith.cmpf ogt, %937, %938 : vector<12x128xf32>
    %cst_819 = arith.constant 0.00999999977 : f32
    %940 = vector.broadcast %cst_819 : f32 to vector<12x128xf32>
    %941 = arith.mulf %940, %937 : vector<12x128xf32>
    %942 = arith.select %939, %937, %941 : vector<12x128xi1>, vector<12x128xf32>
    %c0_820 = arith.constant 0 : index
    %c15_821 = arith.constant 15 : index
    %c0_822 = arith.constant 0 : index
    %c0_823 = arith.constant 0 : index
    %943 = vector.load %arg9[%c0_820, %c15_821, %c0_822, %c0_823] : memref<1x16x1x12xf32, #tpu.memory_space<vmem>>, vector<1x1x1x12xf32>
    %944 = vector.shape_cast %943 : vector<1x1x1x12xf32> to vector<1x12xf32>
    %cst_824 = arith.constant dense<0.000000e+00> : vector<1x128xf32>
    %945 = tpu.matmul %944, %942, %cst_824 {dimension_numbers = #tpu.dot_dimension_numbers<[1], [0], [0], [1], [0, 0, 1, 1], [], []>} : vector<1x12xf32>, vector<12x128xf32>, vector<1x128xf32> -> vector<1x128xf32>
    %c0_825 = arith.constant 0 : index
    %c15_826 = arith.constant 15 : index
    %c0_827 = arith.constant 0 : index
    %c0_828 = arith.constant 0 : index
    %946 = vector.load %arg10[%c0_825, %c15_826, %c0_827, %c0_828] : memref<1x16x1x1xf32, #tpu.memory_space<vmem>>, vector<1x1x1x1xf32>
    %947 = vector.shape_cast %946 : vector<1x1x1x1xf32> to vector<1x1xf32>
    %948 = vector.broadcast %947 : vector<1x1xf32> to vector<1x128xf32>
    %949 = arith.addf %945, %948 : vector<1x128xf32>
    %cst_829 = arith.constant -1.000000e+00 : f32
    %cst_830 = arith.constant 1.000000e+00 : f32
    %950 = vector.broadcast %cst_829 : f32 to vector<1x128xf32>
    %951 = arith.maximumf %950, %949 : vector<1x128xf32>
    %952 = vector.broadcast %cst_830 : f32 to vector<1x128xf32>
    %953 = arith.minimumf %952, %951 : vector<1x128xf32>
    %954 = vector.extract_strided_slice %906 {offsets = [15, 0], sizes = [1, 128], strides = [1, 1]} : vector<16x128xf32> to vector<1x128xf32>
    %955 = arith.subf %954, %953 : vector<1x128xf32>
    %cst_831 = arith.constant 1.000000e+00 : f32
    %956 = vector.broadcast %cst_831 : f32 to vector<1x128xf32>
    %957 = arith.cmpf oge, %955, %956 : vector<1x128xf32>
    %cst_832 = arith.constant 2.000000e+00 : f32
    %cst_833 = arith.constant 0.000000e+00 : f32
    %958 = vector.broadcast %cst_832 : f32 to vector<1x128xf32>
    %959 = vector.broadcast %cst_833 : f32 to vector<1x128xf32>
    %960 = arith.select %957, %958, %959 : vector<1x128xi1>, vector<1x128xf32>
    %961 = arith.subf %955, %960 : vector<1x128xf32>
    %c0_834 = arith.constant 0 : index
    %c15_835 = arith.constant 15 : index
    %c0_836 = arith.constant 0 : index
    %962 = vector.load %arg11[%c0_834, %c15_835, %c0_836] : memref<1x16x128xf32, #tpu.memory_space<vmem>>, vector<1x1x128xf32>
    %963 = vector.shape_cast %962 : vector<1x1x128xf32> to vector<1x128xf32>
    %964 = vector.shape_cast %961 : vector<1x128xf32> to vector<1x1x128xf32>
    tpu.vector_store %arg11[%c0_834, %c15_835, %c0_836], %964 {strides = array<i32>} : memref<1x16x128xf32, #tpu.memory_space<vmem>>, vector<1x1x128xf32>,
    %c0_837 = arith.constant 0 : index
    %c0_838 = arith.constant 0 : index
    %c0_839 = arith.constant 0 : index
    %965 = vector.load %arg11[%c0_837, %c0_838, %c0_839] : memref<1x16x128xf32, #tpu.memory_space<vmem>>, vector<1x16x128xf32>
    %966 = vector.shape_cast %965 : vector<1x16x128xf32> to vector<16x128xf32>
    %967 = arith.mulf %966, %966 : vector<16x128xf32>
    %cst_840 = arith.constant dense<0.000000e+00> : vector<128xf32>
    %968 = vector.multi_reduction <add>, %967, %cst_840 [0] : vector<16x128xf32> to vector<128xf32>
    %969 = vector.shape_cast %968 : vector<128xf32> to vector<1x128xf32>
    %970 = tpu.iota {dimensions = array<i32: 1>} : vector<1x128xi32>
    %c128_i32 = arith.constant 128 : i32
    %971 = arith.muli %arg1, %c128_i32 : i32
    %972 = vector.broadcast %971 : i32 to vector<1x128xi32>
    %973 = arith.addi %970, %972 : vector<1x128xi32>
    %c32_i32 = arith.constant 32 : i32
    %974 = vector.broadcast %c32_i32 : i32 to vector<1x128xi32>
    %975 = arith.cmpi slt, %973, %974 : vector<1x128xi32>
    %cst_841 = arith.constant 0.000000e+00 : f32
    %976 = vector.broadcast %cst_841 : f32 to vector<1x128xf32>
    %977 = arith.select %975, %969, %976 : vector<1x128xi1>, vector<1x128xf32>
    %cst_842 = arith.constant dense<0.000000e+00> : vector<1xf32>
    %978 = vector.multi_reduction <add>, %977, %cst_842 [1] : vector<1x128xf32> to vector<1xf32>
    %979 = vector.shape_cast %978 : vector<1xf32> to vector<1x1xf32>
    %980 = vector.shape_cast %979 : vector<1x1xf32> to vector<1x1xf32>
    %981 = vector.broadcast %980 : vector<1x1xf32> to vector<8x128xf32>
    %c0_843 = arith.constant 0 : index
    %c0_844 = arith.constant 0 : index
    %c0_845 = arith.constant 0 : index
    %c0_846 = arith.constant 0 : index
    %982 = vector.load %arg12[%c0_843, %c0_844, %c0_845, %c0_846] : memref<1x1x8x128xf32, #tpu.memory_space<vmem>>, vector<1x1x8x128xf32>
    %983 = vector.shape_cast %982 : vector<1x1x8x128xf32> to vector<8x128xf32>
    %984 = vector.shape_cast %981 : vector<8x128xf32> to vector<1x1x8x128xf32>
    tpu.vector_store %arg12[%c0_843, %c0_844, %c0_845, %c0_846], %984 {strides = array<i32>} : memref<1x1x8x128xf32, #tpu.memory_space<vmem>>, vector<1x1x8x128xf32>,
    return
  }
  func.func @transform_0(%arg0: i32, %arg1: i32) -> (i32, i32, i32) {
    %c0_i32 = arith.constant 0 : i32
    %c0_i32_0 = arith.constant 0 : i32
    return %arg0, %c0_i32, %arg1 : i32, i32, i32
  }
  func.func @transform_1(%arg0: i32, %arg1: i32) -> (i32, i32, i32, i32) {
    %c0_i32 = arith.constant 0 : i32
    %c0_i32_0 = arith.constant 0 : i32
    %c0_i32_1 = arith.constant 0 : i32
    %c0_i32_2 = arith.constant 0 : i32
    return %arg0, %c0_i32, %c0_i32_0, %c0_i32_1 : i32, i32, i32, i32
  }
  func.func @transform_2(%arg0: i32, %arg1: i32) -> (i32, i32, i32, i32) {
    %c0_i32 = arith.constant 0 : i32
    %c0_i32_0 = arith.constant 0 : i32
    %c0_i32_1 = arith.constant 0 : i32
    %c0_i32_2 = arith.constant 0 : i32
    return %arg0, %c0_i32, %c0_i32_0, %c0_i32_1 : i32, i32, i32, i32
  }
  func.func @transform_3(%arg0: i32, %arg1: i32) -> (i32, i32, i32, i32) {
    %c0_i32 = arith.constant 0 : i32
    %c0_i32_0 = arith.constant 0 : i32
    %c0_i32_1 = arith.constant 0 : i32
    %c0_i32_2 = arith.constant 0 : i32
    return %arg0, %c0_i32, %c0_i32_0, %c0_i32_1 : i32, i32, i32, i32
  }
  func.func @transform_4(%arg0: i32, %arg1: i32) -> (i32, i32, i32, i32) {
    %c0_i32 = arith.constant 0 : i32
    %c0_i32_0 = arith.constant 0 : i32
    %c0_i32_1 = arith.constant 0 : i32
    %c0_i32_2 = arith.constant 0 : i32
    return %arg0, %c0_i32, %c0_i32_0, %c0_i32_1 : i32, i32, i32, i32
  }
  func.func @transform_5(%arg0: i32, %arg1: i32) -> (i32, i32, i32, i32) {
    %c0_i32 = arith.constant 0 : i32
    %c0_i32_0 = arith.constant 0 : i32
    %c0_i32_1 = arith.constant 0 : i32
    %c0_i32_2 = arith.constant 0 : i32
    return %arg0, %c0_i32, %c0_i32_0, %c0_i32_1 : i32, i32, i32, i32
  }
  func.func @transform_6(%arg0: i32, %arg1: i32) -> (i32, i32, i32, i32) {
    %c0_i32 = arith.constant 0 : i32
    %c0_i32_0 = arith.constant 0 : i32
    %c0_i32_1 = arith.constant 0 : i32
    %c0_i32_2 = arith.constant 0 : i32
    return %arg0, %c0_i32, %c0_i32_0, %c0_i32_1 : i32, i32, i32, i32
  }
  func.func @transform_7(%arg0: i32, %arg1: i32) -> (i32, i32, i32, i32) {
    %c0_i32 = arith.constant 0 : i32
    %c0_i32_0 = arith.constant 0 : i32
    %c0_i32_1 = arith.constant 0 : i32
    %c0_i32_2 = arith.constant 0 : i32
    return %arg0, %c0_i32, %c0_i32_0, %c0_i32_1 : i32, i32, i32, i32
  }
  func.func @transform_8(%arg0: i32, %arg1: i32) -> (i32, i32, i32, i32) {
    %c0_i32 = arith.constant 0 : i32
    %c0_i32_0 = arith.constant 0 : i32
    %c0_i32_1 = arith.constant 0 : i32
    %c0_i32_2 = arith.constant 0 : i32
    return %arg0, %c0_i32, %c0_i32_0, %c0_i32_1 : i32, i32, i32, i32
  }
  func.func @transform_9(%arg0: i32, %arg1: i32) -> (i32, i32, i32) {
    %c0_i32 = arith.constant 0 : i32
    %c0_i32_0 = arith.constant 0 : i32
    return %arg0, %c0_i32, %arg1 : i32, i32, i32
  }
  func.func @transform_10(%arg0: i32, %arg1: i32) -> (i32, i32, i32, i32) {
    %c0_i32 = arith.constant 0 : i32
    %c0_i32_0 = arith.constant 0 : i32
    %c0_i32_1 = arith.constant 0 : i32
    return %arg0, %arg1, %c0_i32, %c0_i32_0 : i32, i32, i32, i32
  }
}

</mosaic_0001>

<bundles_post_ra>
// kernel: codec_loss.1
= control target key start
LH: loop header
LB: loop body
LE: loop exit
PB: predicated region body
PF: predicated region fallthrough
CT: control target
= control target key end

     0   :  { %s4641_s13 = smov 0   ;;  %s4643_s14 = smov 0   ;;  %s5260_s0 = inlined_call_operand.vmem [shape: f32[3,16,128], index: 0, kind: input, shape index: {}]   ;;  %s5261_s1 = inlined_call_operand.vmem [shape: f32[3,16,12,16], index: 1, kind: input, shape index: {}]   ;;  %s5262_s2 = inlined_call_operand.vmem [shape: f32[3,16,12,1], index: 2, kind: input, shape index: {}]   ;;  %s5263_s3 = inlined_call_operand.vmem [shape: f32[3,16,12,12], index: 3, kind: input, shape index: {}]   ;;  %s5264_s4 = inlined_call_operand.vmem [shape: f32[3,16,12,1], index: 4, kind: input, shape index: {}]   ;;  %s5265_s5 = inlined_call_operand.vmem [shape: f32[3,16,12,12], index: 5, kind: input, shape index: {}]   ;;  %s5266_s6 = inlined_call_operand.vmem [shape: f32[3,16,12,1], index: 6, kind: input, shape index: {}]   ;;  %s5267_s7 = inlined_call_operand.vmem [shape: f32[3,16,1,12], index: 7, kind: input, shape index: {}]   ;;  %s5268_s8 = inlined_call_operand.vmem [shape: f32[3,16,1,1], index: 8, kind: input, shape index: {}]   ;;  %s5269_s9 = inlined_call_operand.vmem [shape: f32[3,16,128], index: 9, kind: output, shape index: {0}]   ;;  %s5270_s10 = inlined_call_operand.vmem [shape: f32[3,1,8,128], index: 10, kind: output, shape index: {1}]  }
   0x1   :  { %s4645_s15 = smov 0  }
   0x2 LB: > { %s33_s16 = sadd.s32 1, %s4578_s14  ;;  %p4114_p0 = scmp.ge.s32.totalorder %s4582_s15, 1  ;;  %s4582_s15 = sphi %s4645_s15, %s21_s15   ;;  %s4578_s14 = sphi %s4643_s14, %s5272_s14   ;;  %s4574_s13 = sphi %s4641_s13, %s5271_s13  }
   0x3   : > { %p35_p1 = scmp.ge.s32.totalorder %s33_s16, 3  ;;  %p414_p2 = scmp.lt.s32.totalorder %s4582_s15, 4 }
   0x5   : > { %s5274_s16 = smov (%p35_p1, %s33_s16), 0  ;;  %p415_p3 = pnand %p4114_p0, %p414_p2 }
   0x6   : > { %p503_p4 = scmp.lt.s32.totalorder (!%p415_p3), %s4574_s13, 2 }
   0x7   : > { %418 = sbr.rel (%p415_p3) target bundleno = 9524 (0x2534), region = 56 }
   0xc   : > { %v4584_v0 = vmov 0   ;;  %s5276_s13 = smov (!%p503_p4, %s4574_s13), 2  ;;  %vm584_vm0 = vcmask 130048   ;;  %vm641_vm2 = vcmask 1043456   ;;  %vm634_vm4 = vcmask 97280  }
   0xd   : > { %4557 = vset.pattern.permute.xlu1 %v4584_v0  ;;  %4556 = vset.pattern.permute.xlu0 %v4584_v0  ;;  %s4662_s17 = sshll.u32 %s5276_s13, 8  ;;  %s4665_s18 = sshll.u32 %s5276_s13, 4 }
   0xe   : > { %4558 = vset.pattern.permute.xlu2 %v4584_v0  ;;  %s4671_s21 = scalar_lea.vmem %s5264_s4, %s4662_s17  ;;  %s4677_s24 = scalar_lea.vmem %s5262_s2, %s4662_s17 }
   0xf   : > { %v623_v1 = vld [vmem:[%s4671_s21 + $0x8] sm:$0xf]  ;;  %s510_s27 = scalar_lea.vmem %s5260_s0, %s4665_s18  ;;  %s4689_s30 = scalar_lea.vmem %s5269_s9, %s4665_s18  ;;  %v622_v6 = vld [vmem:[%s4671_s21] sm:$0xff]  ;;  %v4148_v10 = vld [vmem:[%s4677_s24 + $0x18] sm:$0xf] }
  0x10   : > { %v573_v2 = vld [vmem:[%s4677_s24 + $0x8] sm:$0xf]  ;;  %631 = vperm.xlu1 %4557, %v623_v1   ;;  %v4691_v3 = vld [vmem:[%s510_s27] sm:$0xff]  ;;  %s4702_s19 = scalar_lea.vmem %s5261_s1, %s4662_s17  ;;  %s4716_s23 = scalar_lea.vmem %s5266_s6, %s4662_s17  ;;  %v4153_v13 = vld [vmem:[%s4671_s21 + $0x10] sm:$0xff] }
  0x11   : > { %581 = vperm.xlu0 %4556, %v573_v2   ;;  %v4693_v4 = vld [vmem:[%s510_s27 + $0x8] sm:$0xff]  ;;  %566 = vst [vmem:[%s4689_s30] sm:$0xff] %v4691_v3  ;;  %v570_v5 = vld [vmem:[%s4702_s19] sm:$0xff]  ;;  %s4722_s27 = scalar_lea.vmem %s5268_s8, %s4665_s18  ;;  %v4154_v14 = vld [vmem:[%s4671_s21 + $0x18] sm:$0xf]  ;;  %s4778_s11 = scalar_lea.vmem %s5263_s3, %s4662_s17 }
  0x12   : > { %605 = vmatpush.msra.mxu0 %v4693_v4  ;;  %567 = vst [vmem:[%s4689_s30 + $0x8] sm:$0xff] %v4693_v4  ;;  %v572_v7 = vld [vmem:[%s4677_s24] sm:$0xff]  ;;  %v571_v8 = vld [vmem:[%s4702_s19 + $0x8] sm:$0xf]  ;;  %v4147_v15 = vld [vmem:[%s4677_s24 + $0x10] sm:$0xff]  ;;  %s4842_s22 = scalar_lea.vmem %s5265_s5, %s4662_s17  ;;  %s4859_s25 = scalar_lea.vmem %s5267_s7, %s4665_s18 }
  0x13   : > { %v677_v9 = vld [vmem:[%s4716_s23 + $0x8] sm:$0xf]  ;;  %v727_v11 = vld [vmem:[%s4722_s27] sm:$0x1]  ;;  %v4166_v16 = vld [vmem:[%s4722_s27 + $0x1] sm:$0x1] }
  0x14   : > { %606 = vmatpush.msra.mxu0 %v4691_v3  ;;  %685 = vperm.xlu2 %4558, %v677_v9   ;;  %v676_v12 = vld [vmem:[%s4716_s23] sm:$0xff]  ;;  %v4160_v17 = vld [vmem:[%s4716_s23 + $0x10] sm:$0xff]  ;;  %v4161_v18 = vld [vmem:[%s4716_s23 + $0x18] sm:$0xf]  ;;  %s4133_s18 = sshll.u32 %s5276_s13, 3 }
  0x15   : > { %4134 = vmatmul.msk.f32.vlgmr.msra.gmra.mxu0 %vm584_vm0, %v570_v5  ;;  %v4179_v19 = vld [vmem:[%s4671_s21 + $0x28] sm:$0xf]  ;;  %v4172_v20 = vld [vmem:[%s4677_s24 + $0x20] sm:$0xff]  ;;  %v4197_v25 = vld [vmem:[%s4677_s24 + $0x30] sm:$0xff] }
  0x16   : > { %v4173_v21 = vld [vmem:[%s4677_s24 + $0x28] sm:$0xf]  ;;  %v4185_v22 = vld [vmem:[%s4716_s23 + $0x20] sm:$0xff]  ;;  %v4198_v26 = vld [vmem:[%s4677_s24 + $0x38] sm:$0xf] }
  0x17   : > { %v4186_v23 = vld [vmem:[%s4716_s23 + $0x28] sm:$0xf]  ;;  %v4178_v24 = vld [vmem:[%s4671_s21 + $0x20] sm:$0xff]  ;;  %v4211_v28 = vld [vmem:[%s4716_s23 + $0x38] sm:$0xf] }
  0x18   : > { %626 = vperm.xlu1 %4557, %v622_v6   ;;  %v4191_v27 = vld [vmem:[%s4722_s27 + $0x2] sm:$0x1]  ;;  %v4203_v29 = vld [vmem:[%s4671_s21 + $0x30] sm:$0xff]  ;;  %v4204_v30 = vld [vmem:[%s4671_s21 + $0x38] sm:$0xf] }
  0x19   : > { %576 = vperm.xlu0 %4556, %v572_v7   ;;  %v4223_v31 = vld [vmem:[%s4677_s24 + $0x48] sm:$0xf]  ;;  %v4216_v32 = vld [vmem:[%s4722_s27 + $0x3] sm:$0x1]  ;;  %v4210_v33 = vld [vmem:[%s4716_s23 + $0x30] sm:$0xff] }
  0x1a   : > { %v4228_v34 = vld [vmem:[%s4671_s21 + $0x40] sm:$0xff]  ;;  %v4229_v35 = vld [vmem:[%s4671_s21 + $0x48] sm:$0xf]  ;;  %v4254_v40 = vld [vmem:[%s4671_s21 + $0x58] sm:$0xf] }
  0x1b   : > { %v4222_v36 = vld [vmem:[%s4677_s24 + $0x40] sm:$0xff]  ;;  %v4236_v39 = vld [vmem:[%s4716_s23 + $0x48] sm:$0xf]  ;;  %v4247_v41 = vld [vmem:[%s4677_s24 + $0x50] sm:$0xff] }
  0x1c   : > { %680 = vperm.xlu2 %4558, %v676_v12   ;;  %v4241_v37 = vld [vmem:[%s4722_s27 + $0x4] sm:$0x1]  ;;  %v4248_v42 = vld [vmem:[%s4677_s24 + $0x58] sm:$0xf]  ;;  %v4260_v43 = vld [vmem:[%s4716_s23 + $0x50] sm:$0xff] }
  0x1d   : > { %4135 = vmatmul.msk.f32.gmra.mxu0 %vm584_vm0, %v571_v8  ;;  %v4235_v38 = vld [vmem:[%s4716_s23 + $0x40] sm:$0xff]  ;;  %v4261_v44 = vld [vmem:[%s4716_s23 + $0x58] sm:$0xf]  ;;  %v4253_v45 = vld [vmem:[%s4671_s21 + $0x50] sm:$0xff] }
  0x1e   : > { %v4272_v46 = vld [vmem:[%s4677_s24 + $0x60] sm:$0xff]  ;;  %v4273_v47 = vld [vmem:[%s4677_s24 + $0x68] sm:$0xf]  ;;  %v4298_v53 = vld [vmem:[%s4677_s24 + $0x78] sm:$0xf] }
  0x1f   : > { %v4266_v48 = vld [vmem:[%s4722_s27 + $0x5] sm:$0x1]  ;;  %v4286_v49 = vld [vmem:[%s4716_s23 + $0x68] sm:$0xf]  ;;  %v4291_v54 = vld [vmem:[%s4722_s27 + $0x6] sm:$0x1] }
  0x20   : > { %782 = vperm.xlu1 %4557, %v4148_v10   ;;  %v4278_v50 = vld [vmem:[%s4671_s21 + $0x60] sm:$0xff]  ;;  %v4279_v51 = vld [vmem:[%s4671_s21 + $0x68] sm:$0xf]  ;;  %v4303_v57 = vld [vmem:[%s4671_s21 + $0x70] sm:$0xff] }
  0x21   : > { %730 = vperm.xlu0 %4556, %v727_v11   ;;  %v4285_v56 = vld [vmem:[%s4716_s23 + $0x60] sm:$0xff]  ;;  %v4304_v58 = vld [vmem:[%s4671_s21 + $0x78] sm:$0xf]  ;;  %v4297_v63 = vld [vmem:[%s4677_s24 + $0x70] sm:$0xff] }
  0x22   : > { %v4316_v2 = vld [vmem:[%s4722_s27 + $0x7] sm:$0x1]  ;;  %v4310_v5 = vld [vmem:[%s4716_s23 + $0x70] sm:$0xff]  ;;  %v4311_v9 = vld [vmem:[%s4716_s23 + $0x78] sm:$0xf] }
  0x23   : > { %v620_v7 = vld [vmem:[%s4778_s11] sm:$0xff]  ;;  %v4329_v10 = vld [vmem:[%s4671_s21 + $0x88] sm:$0xf] }
  0x24   : > { %777 = vperm.xlu2 %4558, %v4147_v15   ;;  %v4322_v11 = vld [vmem:[%s4677_s24 + $0x80] sm:$0xff]  ;;  %v621_v12 = vld [vmem:[%s4778_s11 + $0x8] sm:$0xf] }
  0x25   : > { %v4336_v15 = vld [vmem:[%s4716_s23 + $0x88] sm:$0xf] }
  0x28   : > { %828 = vperm.xlu1 %4557, %v4153_v13   ;;  %v4323_v13 = vld [vmem:[%s4677_s24 + $0x88] sm:$0xf] }
  0x29   : > { %833 = vperm.xlu0 %4556, %v4154_v14   ;;  %v4335_v14 = vld [vmem:[%s4716_s23 + $0x80] sm:$0xff] }
  0x2c   : > { %887 = vperm.xlu2 %4558, %v4161_v18   ;;  %v4348_v18 = vld [vmem:[%s4677_s24 + $0x98] sm:$0xf] }
  0x30   : > { %934 = vperm.xlu1 %4557, %v4166_v16   ;;  %v4328_v16 = vld [vmem:[%s4671_s21 + $0x80] sm:$0xff] }
  0x31   : > { %882 = vperm.xlu0 %4556, %v4160_v17   ;;  %v4347_v17 = vld [vmem:[%s4677_s24 + $0x90] sm:$0xff] }
  0x34   : > { %989 = vperm.xlu2 %4558, %v4173_v21   ;;  %v4353_v21 = vld [vmem:[%s4671_s21 + $0x90] sm:$0xff] }
  0x38   : > { %1040 = vperm.xlu1 %4557, %v4179_v19   ;;  %v4341_v19 = vld [vmem:[%s4722_s27 + $0x8] sm:$0x1] }
  0x39   : > { %984 = vperm.xlu0 %4556, %v4172_v20   ;;  %v4361_v20 = vld [vmem:[%s4716_s23 + $0x98] sm:$0xf] }
  0x3c   : > { %1035 = vperm.xlu2 %4558, %v4178_v24   ;;  %v4366_v24 = vld [vmem:[%s4722_s27 + $0x9] sm:$0x1] }
  0x40   : > { %1089 = vperm.xlu1 %4557, %v4185_v22   ;;  %v4354_v22 = vld [vmem:[%s4671_s21 + $0x98] sm:$0xf] }
  0x41   : > { %1094 = vperm.xlu0 %4556, %v4186_v23   ;;  %v4373_v23 = vld [vmem:[%s4677_s24 + $0xa8] sm:$0xf] }
  0x44   : > { %1141 = vperm.xlu2 %4558, %v4191_v27   ;;  %v4379_v27 = vld [vmem:[%s4671_s21 + $0xa8] sm:$0xf] }
  0x48   : > { %1191 = vperm.xlu1 %4557, %v4197_v25   ;;  %v4360_v25 = vld [vmem:[%s4716_s23 + $0x90] sm:$0xff] }
  0x49   : > { %1196 = vperm.xlu0 %4556, %v4198_v26   ;;  %v4378_v26 = vld [vmem:[%s4671_s21 + $0xa0] sm:$0xff] }
  0x4c   : > { %1247 = vperm.xlu2 %4558, %v4204_v30   ;;  %v4385_v30 = vld [vmem:[%s4716_s23 + $0xa0] sm:$0xff] }
  0x50   : > { %1301 = vperm.xlu1 %4557, %v4211_v28   ;;  %v4372_v28 = vld [vmem:[%s4677_s24 + $0xa0] sm:$0xff] }
  0x51   : > { %1242 = vperm.xlu0 %4556, %v4203_v29   ;;  %v4391_v29 = vld [vmem:[%s4722_s27 + $0xa] sm:$0x1] }
  0x54   : > { %1296 = vperm.xlu2 %4558, %v4210_v33   ;;  %v4397_v33 = vld [vmem:[%s4677_s24 + $0xb0] sm:$0xff] }
  0x58   : > { %1403 = vperm.xlu1 %4557, %v4223_v31   ;;  %v4386_v31 = vld [vmem:[%s4716_s23 + $0xa8] sm:$0xf] }
  0x59   : > { %1348 = vperm.xlu0 %4556, %v4216_v32   ;;  %v4404_v32 = vld [vmem:[%s4671_s21 + $0xb8] sm:$0xf] }
  0x5c   : > { %1398 = vperm.xlu2 %4558, %v4222_v36   ;;  %v4411_v36 = vld [vmem:[%s4716_s23 + $0xb8] sm:$0xf] }
  0x60   : > { %1449 = vperm.xlu1 %4557, %v4228_v34   ;;  %v4398_v34 = vld [vmem:[%s4677_s24 + $0xb8] sm:$0xf] }
  0x61   : > { %1454 = vperm.xlu0 %4556, %v4229_v35   ;;  %v4410_v35 = vld [vmem:[%s4716_s23 + $0xb0] sm:$0xff] }
  0x64   : > { %1508 = vperm.xlu2 %4558, %v4236_v39   ;;  %v4423_v39 = vld [vmem:[%s4677_s24 + $0xc8] sm:$0xf] }
  0x68   : > { %1555 = vperm.xlu1 %4557, %v4241_v37   ;;  %v4403_v37 = vld [vmem:[%s4671_s21 + $0xb0] sm:$0xff] }
  0x69   : > { %1503 = vperm.xlu0 %4556, %v4235_v38   ;;  %v4422_v38 = vld [vmem:[%s4677_s24 + $0xc0] sm:$0xff] }
  0x6c   : > { %1610 = vperm.xlu2 %4558, %v4248_v42   ;;  %v4428_v42 = vld [vmem:[%s4671_s21 + $0xc0] sm:$0xff] }
  0x70   : > { %1661 = vperm.xlu1 %4557, %v4254_v40   ;;  %v4416_v40 = vld [vmem:[%s4722_s27 + $0xb] sm:$0x1] }
  0x71   : > { %1605 = vperm.xlu0 %4556, %v4247_v41   ;;  %v4436_v41 = vld [vmem:[%s4716_s23 + $0xc8] sm:$0xf] }
  0x74   : > { %1656 = vperm.xlu2 %4558, %v4253_v45   ;;  %v4441_v45 = vld [vmem:[%s4722_s27 + $0xc] sm:$0x1] }
  0x78   : > { %1710 = vperm.xlu1 %4557, %v4260_v43   ;;  %v4429_v43 = vld [vmem:[%s4671_s21 + $0xc8] sm:$0xf] }
  0x79   : > { %1715 = vperm.xlu0 %4556, %v4261_v44   ;;  %v4448_v44 = vld [vmem:[%s4677_s24 + $0xd8] sm:$0xf] }
  0x7c   : > { %1762 = vperm.xlu2 %4558, %v4266_v48   ;;  %v4454_v48 = vld [vmem:[%s4671_s21 + $0xd8] sm:$0xf] }
  0x80   : > { %1812 = vperm.xlu1 %4557, %v4272_v46   ;;  %v4435_v46 = vld [vmem:[%s4716_s23 + $0xc0] sm:$0xff] }
  0x81   : > { %1817 = vperm.xlu0 %4556, %v4273_v47   ;;  %v4453_v47 = vld [vmem:[%s4671_s21 + $0xd0] sm:$0xff] }
  0x83   : > { %v582_v52 = vpop.permute.xlu0 %581 }
  0x84   : > { %1868 = vperm.xlu2 %4558, %v4279_v51   ;;  %v4460_v51 = vld [vmem:[%s4716_s23 + $0xd0] sm:$0xff] }
  0x88   : > { %1922 = vperm.xlu1 %4557, %v4286_v49   ;;  %v4447_v49 = vld [vmem:[%s4677_s24 + $0xd0] sm:$0xff] }
  0x89   : > { %1863 = vperm.xlu0 %4556, %v4278_v50   ;;  %v4466_v50 = vld [vmem:[%s4722_s27 + $0xd] sm:$0x1] }
  0x8b   : > { %v577_v59 = vpop.permute.xlu0 %576 }
  0x8c   : > { %1917 = vperm.xlu2 %4558, %v4285_v56   ;;  %v4473_v56 = vld [vmem:[%s4677_s24 + $0xe8] sm:$0xf] }
  0x90   : > { %2024 = vperm.xlu1 %4557, %v4298_v53   ;;  %v4479_v53 = vld [vmem:[%s4671_s21 + $0xe8] sm:$0xf] }
  0x91   : > { %1969 = vperm.xlu0 %4556, %v4291_v54   ;;  %v4472_v54 = vld [vmem:[%s4677_s24 + $0xe0] sm:$0xff] }
  0x92   : > { %v608_v55 = vpop.f32.mrf.mxu0 }
  0x93   : > { %v609_v60 = vadd.f32 %v608_v55, %v577_v59  ;;  %v632_v55 = vpop.permute.xlu1 %631 }
  0x94   : > { %2019 = vperm.xlu2 %4558, %v4297_v63   ;;  %v4498_v63 = vld [vmem:[%s4677_s24 + $0xf8] sm:$0xf] }
  0x95   : > { %v616_v1 = vmul.f32 0.01, %v609_v60  ;;  %vm614_vm3 = vcmp.gt.f32.partialorder %v609_v60, 0.0 }
  0x97   : > { %v618_v8 = vsel %vm614_vm3, %v609_v60, %v616_v1  ;;  %v4478_v60 = vld [vmem:[%s4671_s21 + $0xe0] sm:$0xff] }
  0x98   : > { %2070 = vperm.xlu1 %4557, %v4303_v57   ;;  %v4485_v57 = vld [vmem:[%s4716_s23 + $0xe0] sm:$0xff] }
  0x99   : > { %2075 = vperm.xlu0 %4556, %v4304_v58   ;;  %v4486_v58 = vld [vmem:[%s4716_s23 + $0xe8] sm:$0xf] }
  0x9a   : > { %v611_v61 = vpop.f32.mrf.mxu0 }
  0x9b   : > { %v612_v62 = vadd.f32 %v611_v61, %v582_v52  ;;  %v4461_v52 = vld [vmem:[%s4716_s23 + $0xd8] sm:$0xf]  ;;  %v627_v61 = vpop.permute.xlu1 %626 }
  0x9c   : > { %2129 = vperm.xlu2 %4558, %v4311_v9   ;;  %v4511_v9 = vld [vmem:[%s4716_s23 + $0xf8] sm:$0xf] }
  0x9d   : > { %vm615_vm1 = vcmp.gt.f32.partialorder %v612_v62, 0.0  ;;  %v617_v0 = vmul.f32 0.01, %v612_v62 }
  0x9f   : > { %v619_v6 = vsel %vm615_vm1, %v612_v62, %v617_v0  ;;  %v4497_v62 = vld [vmem:[%s4677_s24 + $0xf0] sm:$0xff] }
  0xa0   : > { %4136 = vmatpush.msk.msra.mxu1 %vm641_vm2, %v619_v6  ;;  %2176 = vperm.xlu1 %4557, %v4316_v2  }
  0xa1   : > { %2124 = vperm.xlu0 %4556, %v4310_v5  }
  0xa2   : > { %660 = vmatpush.msra.mxu1 %v618_v8 }
  0xa3   : > { %4137 = vmatmul.msk.f32.vlgmr.msra.gmra.mxu1 %vm634_vm4, %v620_v7  ;;  %v4491_v7 = vld [vmem:[%s4722_s27 + $0xe] sm:$0x1] }
  0xa4   : > { %2231 = vperm.xlu2 %4558, %v4323_v13   ;;  %v4504_v13 = vld [vmem:[%s4671_s21 + $0xf8] sm:$0xf] }
  0xa8   : > { %2282 = vperm.xlu1 %4557, %v4329_v10   ;;  %v4503_v10 = vld [vmem:[%s4671_s21 + $0xf0] sm:$0xff] }
  0xa9   : > { %2226 = vperm.xlu0 %4556, %v4322_v11  }
  0xab   : > { %4138 = vmatmul.msk.f32.gmra.mxu1 %vm634_vm4, %v621_v12  ;;  %v674_v12 = vld [vmem:[%s4842_s22] sm:$0xff] }
  0xac   : > { %2277 = vperm.xlu2 %4558, %v4328_v16   ;;  %v4510_v16 = vld [vmem:[%s4716_s23 + $0xf0] sm:$0xff]  ;;  %s563_s23 = scalar_lea.vmem %s5270_s10, %s4133_s18 }
  0xb0   : > { %2331 = vperm.xlu1 %4557, %v4335_v14   ;;  %v4516_v14 = vld [vmem:[%s4722_s27 + $0xf] sm:$0x1] }
  0xb1   : > { %2336 = vperm.xlu0 %4556, %v4336_v15   ;;  %v675_v15 = vld [vmem:[%s4842_s22 + $0x8] sm:$0xf] }
  0xb4   : > { %2383 = vperm.xlu2 %4558, %v4341_v19  }
  0xb8   : > { %2430 = vperm.xlu1 %4557, %v4347_v17   ;;  %v686_v17 = vpop.permute.xlu2 %685 }
  0xb9   : > { %2435 = vperm.xlu0 %4556, %v4348_v18  }
  0xbc   : > { %2486 = vperm.xlu2 %4558, %v4354_v22  }
  0xc0   : > { %2540 = vperm.xlu1 %4557, %v4361_v20   ;;  %v681_v19 = vpop.permute.xlu2 %680 }
  0xc1   : > { %2481 = vperm.xlu0 %4556, %v4353_v21  }
  0xc4   : > { %2535 = vperm.xlu2 %4558, %v4360_v25  }
  0xc8   : > { %2642 = vperm.xlu1 %4557, %v4373_v23  }
  0xc9   : > { %2587 = vperm.xlu0 %4556, %v4366_v24  }
  0xcc   : > { %2637 = vperm.xlu2 %4558, %v4372_v28   ;;  %v731_v28 = vpop.permute.xlu0 %730 }
  0xd0   : > { %2688 = vperm.xlu1 %4557, %v4378_v26   ;;  %v726_v26 = vld [vmem:[%s4859_s25] sm:$0x1] }
  0xd1   : > { %2693 = vperm.xlu0 %4556, %v4379_v27  }
  0xd4   : > { %2747 = vperm.xlu2 %4558, %v4386_v31  }
  0xd8   : > { %2794 = vperm.xlu1 %4557, %v4391_v29   ;;  %v733_v29 = vperm.slane %v731_v28, 0 }
  0xd9   : > { %2742 = vperm.xlu0 %4556, %v4385_v30  }
  0xdc   : > { %2849 = vperm.xlu2 %4558, %v4398_v34   ;;  %v4585_v34 = vmov 0.0  }
  0xe0   : > { %2900 = vperm.xlu1 %4557, %v4404_v32  }
  0xe1   : > { %2844 = vperm.xlu0 %4556, %v4397_v33  }
  0xe4   : > { %2895 = vperm.xlu2 %4558, %v4403_v37   ;;  %v4145_v37 = vld [vmem:[%s4702_s19 + $0x10] sm:$0xff] }
  0xe8   : > { %2949 = vperm.xlu1 %4557, %v4410_v35  }
  0xe9   : > { %2954 = vperm.xlu0 %4556, %v4411_v36  }
  0xec   : > { %3001 = vperm.xlu2 %4558, %v4416_v40  }
  0xf0   : > { %3051 = vperm.xlu1 %4557, %v4422_v38  }
  0xf1   : > { %3056 = vperm.xlu0 %4556, %v4423_v39   ;;  %v4146_v39 = vld [vmem:[%s4702_s19 + $0x18] sm:$0xf] }
  0xf4   : > { %3107 = vperm.xlu2 %4558, %v4429_v43  }
  0xf8   : > { %3161 = vperm.xlu1 %4557, %v4436_v41  }
  0xf9   : > { %3102 = vperm.xlu0 %4556, %v4428_v42   ;;  %v783_v42 = vpop.permute.xlu1 %782 }
  0xfc   : > { %3156 = vperm.xlu2 %4558, %v4435_v46  }
 0x100   : > { %3263 = vperm.xlu1 %4557, %v4448_v44  }
 0x101   : > { %3208 = vperm.xlu0 %4556, %v4441_v45  }
 0x104   : > { %3258 = vperm.xlu2 %4558, %v4447_v49  }
 0x108   : > { %3309 = vperm.xlu1 %4557, %v4453_v47  }
 0x109   : > { %3314 = vperm.xlu0 %4556, %v4454_v48   ;;  %v4151_v48 = vld [vmem:[%s4778_s11 + $0x10] sm:$0xff] }
 0x10c   : > { %3368 = vperm.xlu2 %4558, %v4461_v52   ;;  %v829_v52 = vpop.permute.xlu1 %828 }
 0x110   : > { %3415 = vperm.xlu1 %4557, %v4466_v50   ;;  %v4152_v50 = vld [vmem:[%s4778_s11 + $0x18] sm:$0xf] }
 0x111   : > { %3363 = vperm.xlu0 %4556, %v4460_v51  }
 0x114   : > { %3470 = vperm.xlu2 %4558, %v4473_v56  }
 0x118   : > { %3521 = vperm.xlu1 %4557, %v4479_v53  }
 0x119   : > { %3465 = vperm.xlu0 %4556, %v4472_v54   ;;  %v834_v54 = vpop.permute.xlu0 %833 }
 0x11c   : > { %3516 = vperm.xlu2 %4558, %v4478_v60   ;;  %v4158_v60 = vld [vmem:[%s4842_s22 + $0x10] sm:$0xff] }
 0x120   : > { %v662_v59 = vpop.f32.mrf.mxu1  ;;  %3570 = vperm.xlu1 %4557, %v4485_v57  }
 0x121   : > { %3575 = vperm.xlu0 %4556, %v4486_v58   ;;  %v663_v0 = vadd.f32 %v662_v59, %v627_v61 }
 0x123   : > { %v670_v6 = vmul.f32 0.01, %v663_v0  ;;  %vm668_vm6 = vcmp.gt.f32.partialorder %v663_v0, 0.0 }
 0x124   : > { %3622 = vperm.xlu2 %4558, %v4491_v7  }
 0x125   : > { %v672_v11 = vsel %vm668_vm6, %v663_v0, %v670_v6  ;;  %v883_v0 = vpop.permute.xlu0 %882 }
 0x128   : > { %v665_v1 = vpop.f32.mrf.mxu1  ;;  %3672 = vperm.xlu1 %4557, %v4497_v62   ;;  %v4159_v62 = vld [vmem:[%s4842_s22 + $0x18] sm:$0xf] }
 0x129   : > { %3677 = vperm.xlu0 %4556, %v4498_v63   ;;  %v666_v2 = vadd.f32 %v665_v1, %v632_v55 }
 0x12b   : > { %vm669_vm5 = vcmp.gt.f32.partialorder %v666_v2, 0.0  ;;  %v671_v5 = vmul.f32 0.01, %v666_v2 }
 0x12c   : > { %3728 = vperm.xlu2 %4558, %v4504_v13  }
 0x12d   : > { %v673_v8 = vsel %vm669_vm5, %v666_v2, %v671_v5 }
 0x12e   : > { %4139 = vmatpush.msk.msra.mxu2 %vm641_vm2, %v673_v8 }
 0x130   : > { %712 = vmatpush.msra.mxu2 %v672_v11  ;;  %3782 = vperm.xlu1 %4557, %v4511_v9  }
 0x131   : > { %3723 = vperm.xlu0 %4556, %v4503_v10   ;;  %4140 = vmatmul.msk.f32.vlgmr.msra.gmra.mxu2 %vm634_vm4, %v674_v12  ;;  %v4165_v10 = vld [vmem:[%s4859_s25 + $0x1] sm:$0x1]  ;;  %v935_v12 = vpop.permute.xlu1 %934 }
 0x132   : > { %v937_v13 = vperm.slane %v935_v12, 0 }
 0x134   : > { %3777 = vperm.xlu2 %4558, %v4510_v16  }
 0x139   : > { %3829 = vperm.xlu0 %4556, %v4516_v14   ;;  %4141 = vmatmul.msk.f32.gmra.mxu2 %vm634_vm4, %v675_v15 }
 0x1b4   : > { %v714_v18 = vpop.f32.mrf.mxu2 }
 0x1b5   : > { %v715_v20 = vadd.f32 %v714_v18, %v681_v19 }
 0x1b7   : > { %v722_v24 = vmul.f32 0.01, %v715_v20  ;;  %vm720_vm8 = vcmp.gt.f32.partialorder %v715_v20, 0.0 }
 0x1b9   : > { %v724_v27 = vsel %vm720_vm8, %v715_v20, %v722_v24  ;;  %v985_v24 = vpop.permute.xlu0 %984 }
 0x1bc   : > { %v717_v21 = vpop.f32.mrf.mxu2 }
 0x1bd   : > { %v718_v22 = vadd.f32 %v717_v21, %v686_v17  ;;  %v4170_v21 = vld [vmem:[%s4702_s19 + $0x20] sm:$0xff] }
 0x1bf   : > { %vm721_vm7 = vcmp.gt.f32.partialorder %v718_v22, 0.0  ;;  %v723_v23 = vmul.f32 0.01, %v718_v22 }
 0x1c1   : > { %v725_v25 = vsel %vm721_vm7, %v718_v22, %v723_v23 }
 0x1c2   : > { %4142 = vmatpush.msk.msra.mxu3 %vm641_vm2, %v725_v25 }
 0x1c4   : > { %755 = vmatpush.msra.mxu3 %v724_v27 }
 0x1c5   : > { %4143 = vmatmul.msk.f32.vlgmr.msra.gmra.mxu3 %vm634_vm4, %v726_v26 }
 0x1c6   : > { %805 = vmatpush.msrb.mxu3 %v4693_v4 }
 0x248   : > { %v757_v30 = vpop.f32.mrf.mxu3 }
 0x249   : > { %v758_v31 = vadd.f32 %v757_v30, %v733_v29 }
 0x24b   : > { %v4144_v32 = vclamps-f32 %v758_v31, 1.0 }
 0x24d   : > { %v762_v33 = vsub.f32 %v4691_v3, %v4144_v32  ;;  %v778_v3 = vpop.permute.xlu2 %777  ;;  %v4176_v32 = vld [vmem:[%s4778_s11 + $0x20] sm:$0xff] }
 0x24f   : > { %vm763_vm9 = vcmp.ge.f32.partialorder %v762_v33, 1.0 }
 0x250   : > { %v764_v35 = vsel %vm763_vm9, 2.0, %v4585_v34 }
 0x251   : > { %v765_v36 = vsub.f32 %v762_v33, %v764_v35  ;;  %v4177_v35 = vld [vmem:[%s4778_s11 + $0x28] sm:$0xf] }
 0x253   : > { %766 = vst [vmem:[%s4689_s30] sm:$0x1] %v765_v36 }
 0x255   : > { %v888_v2 = vpop.permute.xlu2 %887 }
 0x25a   : > { %v4870_v38 = vld [vmem:[%s4689_s30] sm:$0xff] }
 0x25b   : > { %806 = vmatpush.msrb.mxu3 %v4870_v38 }
 0x25c   : > { %4149 = vmatmul.msk.f32.vlgmr.msrb.gmra.mxu3 %vm584_vm0, %v4145_v37 }
 0x25d   : > { %v990_v26 = vpop.permute.xlu2 %989 }
 0x264   : > { %4150 = vmatmul.msk.f32.gmra.mxu3 %vm584_vm0, %v4146_v39  ;;  %v1041_v39 = vpop.permute.xlu1 %1040 }
 0x265   : > { %v1036_v37 = vpop.permute.xlu2 %1035 }
 0x2df   : > { %v808_v40 = vpop.f32.mrf.mxu3 }
 0x2e0   : > { %v809_v41 = vadd.f32 %v808_v40, %v778_v3 }
 0x2e2   : > { %v816_v46 = vmul.f32 0.01, %v809_v41  ;;  %vm814_vm11 = vcmp.gt.f32.partialorder %v809_v41, 0.0 }
 0x2e4   : > { %v818_v49 = vsel %vm814_vm11, %v809_v41, %v816_v46  ;;  %v4184_v46 = vld [vmem:[%s4842_s22 + $0x28] sm:$0xf] }
 0x2e7   : > { %v811_v43 = vpop.f32.mrf.mxu3 }
 0x2e8   : > { %v812_v44 = vadd.f32 %v811_v43, %v783_v42 }
 0x2ea   : > { %vm815_vm10 = vcmp.gt.f32.partialorder %v812_v44, 0.0  ;;  %v817_v45 = vmul.f32 0.01, %v812_v44 }
 0x2ec   : > { %v819_v47 = vsel %vm815_vm10, %v812_v44, %v817_v45  ;;  %v4183_v44 = vld [vmem:[%s4842_s22 + $0x20] sm:$0xff] }
 0x2ed   : > { %4155 = vmatpush.msk.msrb.mxu0 %vm641_vm2, %v819_v47 }
 0x2ef   : > { %860 = vmatpush.msrb.mxu0 %v818_v49 }
 0x2f0   : > { %4156 = vmatmul.msk.f32.vlgmr.msrb.gmra.mxu0 %vm634_vm4, %v4151_v48  ;;  %v1090_v48 = vpop.permute.xlu1 %1089 }
 0x2f8   : > { %4157 = vmatmul.msk.f32.gmra.mxu0 %vm634_vm4, %v4152_v50  ;;  %v1095_v50 = vpop.permute.xlu0 %1094 }
 0x300   : > { %v1197_v12 = vpop.permute.xlu0 %1196 }
 0x36d   : > { %v862_v51 = vpop.f32.mrf.mxu0 }
 0x36e   : > { %v863_v53 = vadd.f32 %v862_v51, %v829_v52 }
 0x370   : > { %v870_v58 = vmul.f32 0.01, %v863_v53  ;;  %vm868_vm13 = vcmp.gt.f32.partialorder %v863_v53, 0.0 }
 0x372   : > { %v872_v61 = vsel %vm868_vm13, %v863_v53, %v870_v58  ;;  %v4915_v58 = vld [vmem:[%s4689_s30 + $0x8] sm:$0xff] }
 0x375   : > { %v865_v55 = vpop.f32.mrf.mxu0 }
 0x376   : > { %v866_v56 = vadd.f32 %v865_v55, %v834_v54 }
 0x378   : > { %vm869_vm12 = vcmp.gt.f32.partialorder %v866_v56, 0.0  ;;  %v871_v57 = vmul.f32 0.01, %v866_v56 }
 0x37a   : > { %v873_v59 = vsel %vm869_vm12, %v866_v56, %v871_v57  ;;  %v4190_v56 = vld [vmem:[%s4859_s25 + $0x2] sm:$0x1] }
 0x37b   : > { %4162 = vmatpush.msk.msrb.mxu1 %vm641_vm2, %v873_v59  ;;  %v1142_v59 = vpop.permute.xlu2 %1141 }
 0x37d   : > { %914 = vmatpush.msrb.mxu1 %v872_v61 }
 0x37e   : > { %4163 = vmatmul.msk.f32.vlgmr.msrb.gmra.mxu1 %vm634_vm4, %v4158_v60  ;;  %v1144_v60 = vperm.slane %v1142_v59, 0 }
 0x386   : > { %4164 = vmatmul.msk.f32.gmra.mxu1 %vm634_vm4, %v4159_v62 }
 0x3fb   : > { %v916_v63 = vpop.f32.mrf.mxu1 }
 0x3fc   : > { %v917_v1 = vadd.f32 %v916_v63, %v883_v0 }
 0x3fe   : > { %v924_v8 = vmul.f32 0.01, %v917_v1  ;;  %vm922_vm15 = vcmp.gt.f32.partialorder %v917_v1, 0.0 }
 0x400   : > { %v926_v11 = vsel %vm922_vm15, %v917_v1, %v924_v8  ;;  %v4196_v8 = vld [vmem:[%s4702_s19 + $0x38] sm:$0xf] }
 0x403   : > { %v919_v5 = vpop.f32.mrf.mxu1 }
 0x404   : > { %v920_v6 = vadd.f32 %v919_v5, %v888_v2 }
 0x406   : > { %vm923_vm14 = vcmp.gt.f32.partialorder %v920_v6, 0.0  ;;  %v925_v7 = vmul.f32 0.01, %v920_v6 }
 0x408   : > { %v927_v9 = vsel %vm923_vm14, %v920_v6, %v925_v7  ;;  %v4195_v6 = vld [vmem:[%s4702_s19 + $0x30] sm:$0xff] }
 0x409   : > { %4167 = vmatpush.msk.msrb.mxu2 %vm641_vm2, %v927_v9 }
 0x40b   : > { %959 = vmatpush.msrb.mxu2 %v926_v11 }
 0x40c   : > { %4168 = vmatmul.msk.f32.vlgmr.msrb.gmra.mxu2 %vm634_vm4, %v4165_v10  ;;  %v1192_v10 = vpop.permute.xlu1 %1191 }
 0x40d   : > { %1012 = vmatpush.msra.mxu2 %v4693_v4  ;;  %v4171_v4 = vld [vmem:[%s4702_s19 + $0x28] sm:$0xf] }
 0x48f   : > { %v961_v14 = vpop.f32.mrf.mxu2 }
 0x490   : > { %v962_v15 = vadd.f32 %v961_v14, %v937_v13 }
 0x492   : > { %v4169_v16 = vclamps-f32 %v962_v15, 1.0 }
 0x494   : > { %v967_v17 = vrot.slane %v4169_v16, 7 }
 0x496   : > { %v969_v18 = vsub.f32 %v4870_v38, %v967_v17 }
 0x498   : > { %vm970_vm1 = vcmp.ge.f32.partialorder %v969_v18, 1.0 }
 0x499   : > { %v971_v19 = vsel %vm970_vm1, 2.0, %v4585_v34 }
 0x49a   : > { %v972_v20 = vsub.f32 %v969_v18, %v971_v19  ;;  %v4201_v18 = vld [vmem:[%s4778_s11 + $0x30] sm:$0xff] }
 0x49c   : > { %973 = vst [vmem:[%s4689_s30] sm:$0x2] %v972_v20  ;;  %v4202_v20 = vld [vmem:[%s4778_s11 + $0x38] sm:$0xf] }
 0x4a3   : > { %v4895_v22 = vld [vmem:[%s4689_s30] sm:$0xff] }
 0x4a4   : > { %1013 = vmatpush.msra.mxu2 %v4895_v22 }
 0x4a5   : > { %4174 = vmatmul.msk.f32.vlgmr.msra.gmra.mxu2 %vm584_vm0, %v4170_v21 }
 0x4ad   : > { %4175 = vmatmul.msk.f32.gmra.mxu2 %vm584_vm0, %v4171_v4 }
 0x528   : > { %v1015_v23 = vpop.f32.mrf.mxu2 }
 0x529   : > { %v1016_v25 = vadd.f32 %v1015_v23, %v985_v24  ;;  %v1248_v23 = vpop.permute.xlu2 %1247 }
 0x52b   : > { %v1023_v30 = vmul.f32 0.01, %v1016_v25  ;;  %vm1021_vm5 = vcmp.gt.f32.partialorder %v1016_v25, 0.0 }
 0x52d   : > { %v1025_v33 = vsel %vm1021_vm5, %v1016_v25, %v1023_v30 }
 0x530   : > { %v1018_v27 = vpop.f32.mrf.mxu2 }
 0x531   : > { %v1019_v28 = vadd.f32 %v1018_v27, %v990_v26 }
 0x533   : > { %vm1022_vm3 = vcmp.gt.f32.partialorder %v1019_v28, 0.0  ;;  %v1024_v29 = vmul.f32 0.01, %v1019_v28 }
 0x535   : > { %v1026_v31 = vsel %vm1022_vm3, %v1019_v28, %v1024_v29  ;;  %v4208_v29 = vld [vmem:[%s4842_s22 + $0x30] sm:$0xff] }
 0x536   : > { %4180 = vmatpush.msk.msra.mxu3 %vm641_vm2, %v1026_v31  ;;  %v4209_v31 = vld [vmem:[%s4842_s22 + $0x38] sm:$0xf] }
 0x538   : > { %1067 = vmatpush.msra.mxu3 %v1025_v33  ;;  %v1297_v33 = vpop.permute.xlu2 %1296 }
 0x539   : > { %4181 = vmatmul.msk.f32.vlgmr.msra.gmra.mxu3 %vm634_vm4, %v4176_v32 }
 0x541   : > { %4182 = vmatmul.msk.f32.gmra.mxu3 %vm634_vm4, %v4177_v35 }
 0x5bc   : > { %v1069_v36 = vpop.f32.mrf.mxu3 }
 0x5bd   : > { %v1070_v38 = vadd.f32 %v1069_v36, %v1036_v37  ;;  %v1302_v36 = vpop.permute.xlu1 %1301 }
 0x5bf   : > { %v1077_v42 = vmul.f32 0.01, %v1070_v38  ;;  %vm1075_vm7 = vcmp.gt.f32.partialorder %v1070_v38, 0.0 }
 0x5c1   : > { %v1079_v45 = vsel %vm1075_vm7, %v1070_v38, %v1077_v42 }
 0x5c4   : > { %v1072_v40 = vpop.f32.mrf.mxu3 }
 0x5c5   : > { %v1073_v3 = vadd.f32 %v1072_v40, %v1041_v39  ;;  %v1404_v59 = vpop.permute.xlu1 %1403 }
 0x5c7   : > { %vm1076_vm6 = vcmp.gt.f32.partialorder %v1073_v3, 0.0  ;;  %v1078_v41 = vmul.f32 0.01, %v1073_v3 }
 0x5c9   : > { %v1080_v43 = vsel %vm1076_vm6, %v1073_v3, %v1078_v41  ;;  %v4215_v41 = vld [vmem:[%s4859_s25 + $0x3] sm:$0x1] }
 0x5ca   : > { %4187 = vmatpush.msk.msra.mxu0 %vm641_vm2, %v1080_v43 }
 0x5cc   : > { %1121 = vmatpush.msra.mxu0 %v1079_v45 }
 0x5cd   : > { %4188 = vmatmul.msk.f32.vlgmr.msra.gmra.mxu0 %vm634_vm4, %v4183_v44 }
 0x5d5   : > { %4189 = vmatmul.msk.f32.gmra.mxu0 %vm634_vm4, %v4184_v46 }
 0x64a   : > { %v1123_v47 = vpop.f32.mrf.mxu0 }
 0x64b   : > { %v1124_v49 = vadd.f32 %v1123_v47, %v1090_v48 }
 0x64d   : > { %v1131_v53 = vmul.f32 0.01, %v1124_v49  ;;  %vm1129_vm9 = vcmp.gt.f32.partialorder %v1124_v49, 0.0 }
 0x64f   : > { %v1133_v57 = vsel %vm1129_vm9, %v1124_v49, %v1131_v53 }
 0x652   : > { %v1126_v51 = vpop.f32.mrf.mxu0 }
 0x653   : > { %v1127_v52 = vadd.f32 %v1126_v51, %v1095_v50 }
 0x655   : > { %vm1130_vm8 = vcmp.gt.f32.partialorder %v1127_v52, 0.0  ;;  %v1132_v54 = vmul.f32 0.01, %v1127_v52 }
 0x657   : > { %v1134_v55 = vsel %vm1130_vm8, %v1127_v52, %v1132_v54  ;;  %v4220_v52 = vld [vmem:[%s4702_s19 + $0x40] sm:$0xff]  ;;  %v4221_v54 = vld [vmem:[%s4702_s19 + $0x48] sm:$0xf] }
 0x658   : > { %4192 = vmatpush.msk.msra.mxu1 %vm641_vm2, %v1134_v55 }
 0x65a   : > { %1166 = vmatpush.msra.mxu1 %v1133_v57 }
 0x65b   : > { %4193 = vmatmul.msk.f32.vlgmr.msra.gmra.mxu1 %vm634_vm4, %v4190_v56  ;;  %v1399_v56 = vpop.permute.xlu2 %1398 }
 0x65c   : > { %1219 = vmatpush.msrb.mxu1 %v4915_v58 }
 0x6d8   : > { %v1168_v61 = vpop.f32.mrf.mxu1 }
 0x6d9   : > { %v1169_v62 = vadd.f32 %v1168_v61, %v1144_v60 }
 0x6db   : > { %v4194_v63 = vclamps-f32 %v1169_v62, 1.0 }
 0x6dd   : > { %v1174_v0 = vrot.slane %v4194_v63, 6 }
 0x6df   : > { %v1176_v1 = vsub.f32 %v4895_v22, %v1174_v0  ;;  %v1243_v22 = vpop.permute.xlu0 %1242 }
 0x6e1   : > { %vm1177_vm10 = vcmp.ge.f32.partialorder %v1176_v1, 1.0 }
 0x6e2   : > { %v1178_v2 = vsel %vm1177_vm10, 2.0, %v4585_v34 }
 0x6e3   : > { %v1179_v5 = vsub.f32 %v1176_v1, %v1178_v2  ;;  %v4226_v1 = vld [vmem:[%s4778_s11 + $0x40] sm:$0xff] }
 0x6e5   : > { %1180 = vst [vmem:[%s4689_s30] sm:$0x4] %v1179_v5  ;;  %v4227_v5 = vld [vmem:[%s4778_s11 + $0x48] sm:$0xf] }
 0x6e7   : > { %v1349_v43 = vpop.permute.xlu0 %1348 }
 0x6e8   : > { %v1351_v44 = vperm.slane %v1349_v43, 0 }
 0x6ec   : > { %v4923_v7 = vld [vmem:[%s4689_s30] sm:$0xff] }
 0x6ed   : > { %1220 = vmatpush.msrb.mxu1 %v4923_v7 }
 0x6ee   : > { %4199 = vmatmul.msk.f32.vlgmr.msrb.gmra.mxu1 %vm584_vm0, %v4195_v6 }
 0x6f6   : > { %4200 = vmatmul.msk.f32.gmra.mxu1 %vm584_vm0, %v4196_v8 }
 0x76b   : > { %v1222_v9 = vpop.f32.mrf.mxu1 }
 0x76c   : > { %v1223_v11 = vadd.f32 %v1222_v9, %v1192_v10  ;;  %v1455_v9 = vpop.permute.xlu0 %1454 }
 0x76e   : > { %v1230_v15 = vmul.f32 0.01, %v1223_v11  ;;  %vm1228_vm12 = vcmp.gt.f32.partialorder %v1223_v11, 0.0 }
 0x770   : > { %v1232_v19 = vsel %vm1228_vm12, %v1223_v11, %v1230_v15  ;;  %v4233_v15 = vld [vmem:[%s4842_s22 + $0x40] sm:$0xff] }
 0x773   : > { %v1225_v13 = vpop.f32.mrf.mxu1 }
 0x774   : > { %v1226_v14 = vadd.f32 %v1225_v13, %v1197_v12 }
 0x776   : > { %vm1229_vm11 = vcmp.gt.f32.partialorder %v1226_v14, 0.0  ;;  %v1231_v16 = vmul.f32 0.01, %v1226_v14 }
 0x778   : > { %v1233_v17 = vsel %vm1229_vm11, %v1226_v14, %v1231_v16 }
 0x779   : > { %4205 = vmatpush.msk.msrb.mxu2 %vm641_vm2, %v1233_v17  ;;  %v4234_v17 = vld [vmem:[%s4842_s22 + $0x48] sm:$0xf] }
 0x77b   : > { %1274 = vmatpush.msrb.mxu2 %v1232_v19  ;;  %v1504_v19 = vpop.permute.xlu0 %1503 }
 0x77c   : > { %4206 = vmatmul.msk.f32.vlgmr.msrb.gmra.mxu2 %vm634_vm4, %v4201_v18 }
 0x784   : > { %4207 = vmatmul.msk.f32.gmra.mxu2 %vm634_vm4, %v4202_v20 }
 0x7ff   : > { %v1276_v21 = vpop.f32.mrf.mxu2 }
 0x800   : > { %v1277_v4 = vadd.f32 %v1276_v21, %v1243_v22  ;;  %v1509_v21 = vpop.permute.xlu2 %1508 }
 0x802   : > { %v1284_v26 = vmul.f32 0.01, %v1277_v4  ;;  %vm1282_vm14 = vcmp.gt.f32.partialorder %v1277_v4, 0.0 }
 0x804   : > { %v1286_v30 = vsel %vm1282_vm14, %v1277_v4, %v1284_v26  ;;  %v4240_v26 = vld [vmem:[%s4859_s25 + $0x4] sm:$0x1] }
 0x807   : > { %v1279_v24 = vpop.f32.mrf.mxu2 }
 0x808   : > { %v1280_v25 = vadd.f32 %v1279_v24, %v1248_v23  ;;  %v1611_v43 = vpop.permute.xlu2 %1610 }
 0x80a   : > { %vm1283_vm13 = vcmp.gt.f32.partialorder %v1280_v25, 0.0  ;;  %v1285_v27 = vmul.f32 0.01, %v1280_v25 }
 0x80c   : > { %v1287_v28 = vsel %vm1283_vm13, %v1280_v25, %v1285_v27 }
 0x80d   : > { %4212 = vmatpush.msk.msrb.mxu3 %vm641_vm2, %v1287_v28 }
 0x80f   : > { %1328 = vmatpush.msrb.mxu3 %v1286_v30 }
 0x810   : > { %4213 = vmatmul.msk.f32.vlgmr.msrb.gmra.mxu3 %vm634_vm4, %v4208_v29 }
 0x818   : > { %4214 = vmatmul.msk.f32.gmra.mxu3 %vm634_vm4, %v4209_v31 }
 0x893   : > { %v1330_v32 = vpop.f32.mrf.mxu3 }
 0x894   : > { %v1331_v35 = vadd.f32 %v1330_v32, %v1297_v33 }
 0x896   : > { %v1338_v39 = vmul.f32 0.01, %v1331_v35  ;;  %vm1336_vm1 = vcmp.gt.f32.partialorder %v1331_v35, 0.0 }
 0x898   : > { %v1340_v42 = vsel %vm1336_vm1, %v1331_v35, %v1338_v39 }
 0x89b   : > { %v1333_v37 = vpop.f32.mrf.mxu3 }
 0x89c   : > { %v1334_v38 = vadd.f32 %v1333_v37, %v1302_v36 }
 0x89e   : > { %vm1337_vm15 = vcmp.gt.f32.partialorder %v1334_v38, 0.0  ;;  %v1339_v40 = vmul.f32 0.01, %v1334_v38 }
 0x8a0   : > { %v1341_v3 = vsel %vm1337_vm15, %v1334_v38, %v1339_v40  ;;  %v4245_v38 = vld [vmem:[%s4702_s19 + $0x50] sm:$0xff]  ;;  %v4246_v40 = vld [vmem:[%s4702_s19 + $0x58] sm:$0xf] }
 0x8a1   : > { %4217 = vmatpush.msk.msrb.mxu0 %vm641_vm2, %v1341_v3 }
 0x8a3   : > { %1373 = vmatpush.msrb.mxu0 %v1340_v42 }
 0x8a4   : > { %4218 = vmatmul.msk.f32.vlgmr.msrb.gmra.mxu0 %vm634_vm4, %v4215_v41  ;;  %v1606_v41 = vpop.permute.xlu0 %1605 }
 0x8a5   : > { %1426 = vmatpush.msra.mxu0 %v4915_v58 }
 0x921   : > { %v1375_v45 = vpop.f32.mrf.mxu0 }
 0x922   : > { %v1376_v46 = vadd.f32 %v1375_v45, %v1351_v44 }
 0x924   : > { %v4219_v47 = vclamps-f32 %v1376_v46, 1.0 }
 0x926   : > { %v1381_v48 = vrot.slane %v4219_v47, 5 }
 0x928   : > { %v1383_v49 = vsub.f32 %v4923_v7, %v1381_v48  ;;  %v1450_v7 = vpop.permute.xlu1 %1449 }
 0x92a   : > { %vm1384_vm3 = vcmp.ge.f32.partialorder %v1383_v49, 1.0 }
 0x92b   : > { %v1385_v50 = vsel %vm1384_vm3, 2.0, %v4585_v34 }
 0x92c   : > { %v1386_v51 = vsub.f32 %v1383_v49, %v1385_v50  ;;  %v4251_v49 = vld [vmem:[%s4778_s11 + $0x50] sm:$0xff] }
 0x92e   : > { %1387 = vst [vmem:[%s4689_s30] sm:$0x8] %v1386_v51  ;;  %v4252_v51 = vld [vmem:[%s4778_s11 + $0x58] sm:$0xf] }
 0x930   : > { %v1556_v28 = vpop.permute.xlu1 %1555 }
 0x931   : > { %v1558_v29 = vperm.slane %v1556_v28, 0 }
 0x935   : > { %v4948_v53 = vld [vmem:[%s4689_s30] sm:$0xff] }
 0x936   : > { %1427 = vmatpush.msra.mxu0 %v4948_v53 }
 0x937   : > { %4224 = vmatmul.msk.f32.vlgmr.msra.gmra.mxu0 %vm584_vm0, %v4220_v52 }
 0x93f   : > { %4225 = vmatmul.msk.f32.gmra.mxu0 %vm584_vm0, %v4221_v54 }
 0x9b4   : > { %v1429_v55 = vpop.f32.mrf.mxu0 }
 0x9b5   : > { %v1430_v57 = vadd.f32 %v1429_v55, %v1399_v56  ;;  %v1662_v55 = vpop.permute.xlu1 %1661 }
 0x9b7   : > { %v1437_v62 = vmul.f32 0.01, %v1430_v57  ;;  %vm1435_vm6 = vcmp.gt.f32.partialorder %v1430_v57, 0.0 }
 0x9b9   : > { %v1439_v2 = vsel %vm1435_vm6, %v1430_v57, %v1437_v62  ;;  %v4258_v62 = vld [vmem:[%s4842_s22 + $0x50] sm:$0xff] }
 0x9bc   : > { %v1432_v60 = vpop.f32.mrf.mxu0 }
 0x9bd   : > { %v1433_v61 = vadd.f32 %v1432_v60, %v1404_v59 }
 0x9bf   : > { %vm1436_vm5 = vcmp.gt.f32.partialorder %v1433_v61, 0.0  ;;  %v1438_v63 = vmul.f32 0.01, %v1433_v61 }
 0x9c1   : > { %v1440_v0 = vsel %vm1436_vm5, %v1433_v61, %v1438_v63 }
 0x9c2   : > { %4230 = vmatpush.msk.msra.mxu1 %vm641_vm2, %v1440_v0  ;;  %v4259_v0 = vld [vmem:[%s4842_s22 + $0x58] sm:$0xf] }
 0x9c4   : > { %1481 = vmatpush.msra.mxu1 %v1439_v2  ;;  %v1711_v2 = vpop.permute.xlu1 %1710 }
 0x9c5   : > { %4231 = vmatmul.msk.f32.vlgmr.msra.gmra.mxu1 %vm634_vm4, %v4226_v1 }
 0x9cd   : > { %4232 = vmatmul.msk.f32.gmra.mxu1 %vm634_vm4, %v4227_v5 }
 0xa42   : > { %v1483_v6 = vpop.f32.mrf.mxu1 }
 0xa43   : > { %v1484_v8 = vadd.f32 %v1483_v6, %v1450_v7  ;;  %v1716_v6 = vpop.permute.xlu0 %1715 }
 0xa45   : > { %v1491_v12 = vmul.f32 0.01, %v1484_v8  ;;  %vm1489_vm8 = vcmp.gt.f32.partialorder %v1484_v8, 0.0 }
 0xa47   : > { %v1493_v16 = vsel %vm1489_vm8, %v1484_v8, %v1491_v12  ;;  %v4265_v12 = vld [vmem:[%s4859_s25 + $0x5] sm:$0x1] }
 0xa4a   : > { %v1486_v10 = vpop.f32.mrf.mxu1 }
 0xa4b   : > { %v1487_v11 = vadd.f32 %v1486_v10, %v1455_v9  ;;  %v1818_v28 = vpop.permute.xlu0 %1817 }
 0xa4d   : > { %vm1490_vm7 = vcmp.gt.f32.partialorder %v1487_v11, 0.0  ;;  %v1492_v13 = vmul.f32 0.01, %v1487_v11 }
 0xa4f   : > { %v1494_v14 = vsel %vm1490_vm7, %v1487_v11, %v1492_v13 }
 0xa50   : > { %4237 = vmatpush.msk.msra.mxu2 %vm641_vm2, %v1494_v14 }
 0xa52   : > { %1535 = vmatpush.msra.mxu2 %v1493_v16 }
 0xa53   : > { %4238 = vmatmul.msk.f32.vlgmr.msra.gmra.mxu2 %vm634_vm4, %v4233_v15 }
 0xa5b   : > { %4239 = vmatmul.msk.f32.gmra.mxu2 %vm634_vm4, %v4234_v17 }
 0xad6   : > { %v1537_v18 = vpop.f32.mrf.mxu2 }
 0xad7   : > { %v1538_v20 = vadd.f32 %v1537_v18, %v1504_v19 }
 0xad9   : > { %v1545_v23 = vmul.f32 0.01, %v1538_v20  ;;  %vm1543_vm10 = vcmp.gt.f32.partialorder %v1538_v20, 0.0 }
 0xadb   : > { %v1547_v27 = vsel %vm1543_vm10, %v1538_v20, %v1545_v23 }
 0xade   : > { %v1540_v22 = vpop.f32.mrf.mxu2 }
 0xadf   : > { %v1541_v4 = vadd.f32 %v1540_v22, %v1509_v21 }
 0xae1   : > { %vm1544_vm9 = vcmp.gt.f32.partialorder %v1541_v4, 0.0  ;;  %v1546_v24 = vmul.f32 0.01, %v1541_v4 }
 0xae3   : > { %v1548_v25 = vsel %vm1544_vm9, %v1541_v4, %v1546_v24  ;;  %v4270_v4 = vld [vmem:[%s4702_s19 + $0x60] sm:$0xff]  ;;  %v4271_v24 = vld [vmem:[%s4702_s19 + $0x68] sm:$0xf] }
 0xae4   : > { %4242 = vmatpush.msk.msra.mxu3 %vm641_vm2, %v1548_v25 }
 0xae6   : > { %1580 = vmatpush.msra.mxu3 %v1547_v27 }
 0xae7   : > { %4243 = vmatmul.msk.f32.vlgmr.msra.gmra.mxu3 %vm634_vm4, %v4240_v26  ;;  %v1813_v26 = vpop.permute.xlu1 %1812 }
 0xae8   : > { %1633 = vmatpush.msrb.mxu3 %v4915_v58 }
 0xb6a   : > { %v1582_v30 = vpop.f32.mrf.mxu3 }
 0xb6b   : > { %v1583_v31 = vadd.f32 %v1582_v30, %v1558_v29 }
 0xb6d   : > { %v4244_v32 = vclamps-f32 %v1583_v31, 1.0 }
 0xb6f   : > { %v1588_v33 = vrot.slane %v4244_v32, 4 }
 0xb71   : > { %v1590_v35 = vsub.f32 %v4948_v53, %v1588_v33  ;;  %v1657_v53 = vpop.permute.xlu2 %1656 }
 0xb73   : > { %vm1591_vm11 = vcmp.ge.f32.partialorder %v1590_v35, 1.0 }
 0xb74   : > { %v1592_v36 = vsel %vm1591_vm11, 2.0, %v4585_v34 }
 0xb75   : > { %v1593_v37 = vsub.f32 %v1590_v35, %v1592_v36  ;;  %v4276_v35 = vld [vmem:[%s4778_s11 + $0x60] sm:$0xff] }
 0xb77   : > { %1594 = vst [vmem:[%s4689_s30] sm:$0x10] %v1593_v37  ;;  %v4277_v37 = vld [vmem:[%s4778_s11 + $0x68] sm:$0xf] }
 0xb79   : > { %v1763_v14 = vpop.permute.xlu2 %1762 }
 0xb7a   : > { %v1765_v15 = vperm.slane %v1763_v14, 0 }
 0xb7e   : > { %v4973_v39 = vld [vmem:[%s4689_s30] sm:$0xff] }
 0xb7f   : > { %1634 = vmatpush.msrb.mxu3 %v4973_v39 }
 0xb80   : > { %4249 = vmatmul.msk.f32.vlgmr.msrb.gmra.mxu3 %vm584_vm0, %v4245_v38 }
 0xb88   : > { %4250 = vmatmul.msk.f32.gmra.mxu3 %vm584_vm0, %v4246_v40 }
 0xc03   : > { %v1636_v3 = vpop.f32.mrf.mxu3 }
 0xc04   : > { %v1637_v42 = vadd.f32 %v1636_v3, %v1606_v41  ;;  %v1869_v3 = vpop.permute.xlu2 %1868 }
 0xc06   : > { %v1644_v46 = vmul.f32 0.01, %v1637_v42  ;;  %vm1642_vm13 = vcmp.gt.f32.partialorder %v1637_v42, 0.0 }
 0xc08   : > { %v1646_v50 = vsel %vm1642_vm13, %v1637_v42, %v1644_v46  ;;  %v4283_v46 = vld [vmem:[%s4842_s22 + $0x60] sm:$0xff] }
 0xc0b   : > { %v1639_v44 = vpop.f32.mrf.mxu3 }
 0xc0c   : > { %v1640_v45 = vadd.f32 %v1639_v44, %v1611_v43 }
 0xc0e   : > { %vm1643_vm12 = vcmp.gt.f32.partialorder %v1640_v45, 0.0  ;;  %v1645_v47 = vmul.f32 0.01, %v1640_v45 }
 0xc10   : > { %v1647_v48 = vsel %vm1643_vm12, %v1640_v45, %v1645_v47 }
 0xc11   : > { %4255 = vmatpush.msk.msrb.mxu0 %vm641_vm2, %v1647_v48  ;;  %v4284_v48 = vld [vmem:[%s4842_s22 + $0x68] sm:$0xf] }
 0xc13   : > { %1688 = vmatpush.msrb.mxu0 %v1646_v50  ;;  %v1918_v50 = vpop.permute.xlu2 %1917 }
 0xc14   : > { %4256 = vmatmul.msk.f32.vlgmr.msrb.gmra.mxu0 %vm634_vm4, %v4251_v49 }
 0xc1c   : > { %4257 = vmatmul.msk.f32.gmra.mxu0 %vm634_vm4, %v4252_v51 }
 0xc91   : > { %v1690_v52 = vpop.f32.mrf.mxu0 }
 0xc92   : > { %v1691_v54 = vadd.f32 %v1690_v52, %v1657_v53  ;;  %v1923_v52 = vpop.permute.xlu1 %1922 }
 0xc94   : > { %v1698_v59 = vmul.f32 0.01, %v1691_v54  ;;  %vm1696_vm15 = vcmp.gt.f32.partialorder %v1691_v54, 0.0 }
 0xc96   : > { %v1700_v63 = vsel %vm1696_vm15, %v1691_v54, %v1698_v59  ;;  %v4290_v59 = vld [vmem:[%s4859_s25 + $0x6] sm:$0x1] }
 0xc99   : > { %v1693_v56 = vpop.f32.mrf.mxu0 }
 0xc9a   : > { %v1694_v57 = vadd.f32 %v1693_v56, %v1662_v55  ;;  %v2025_v14 = vpop.permute.xlu1 %2024 }
 0xc9c   : > { %vm1697_vm14 = vcmp.gt.f32.partialorder %v1694_v57, 0.0  ;;  %v1699_v60 = vmul.f32 0.01, %v1694_v57 }
 0xc9e   : > { %v1701_v61 = vsel %vm1697_vm14, %v1694_v57, %v1699_v60 }
 0xc9f   : > { %4262 = vmatpush.msk.msrb.mxu1 %vm641_vm2, %v1701_v61 }
 0xca1   : > { %1742 = vmatpush.msrb.mxu1 %v1700_v63 }
 0xca2   : > { %4263 = vmatmul.msk.f32.vlgmr.msrb.gmra.mxu1 %vm634_vm4, %v4258_v62 }
 0xcaa   : > { %4264 = vmatmul.msk.f32.gmra.mxu1 %vm634_vm4, %v4259_v0 }
 0xd1f   : > { %v1744_v1 = vpop.f32.mrf.mxu1 }
 0xd20   : > { %v1745_v5 = vadd.f32 %v1744_v1, %v1711_v2 }
 0xd22   : > { %v1752_v9 = vmul.f32 0.01, %v1745_v5  ;;  %vm1750_vm3 = vcmp.gt.f32.partialorder %v1745_v5, 0.0 }
 0xd24   : > { %v1754_v13 = vsel %vm1750_vm3, %v1745_v5, %v1752_v9 }
 0xd27   : > { %v1747_v7 = vpop.f32.mrf.mxu1 }
 0xd28   : > { %v1748_v8 = vadd.f32 %v1747_v7, %v1716_v6 }
 0xd2a   : > { %vm1751_vm1 = vcmp.gt.f32.partialorder %v1748_v8, 0.0  ;;  %v1753_v10 = vmul.f32 0.01, %v1748_v8 }
 0xd2c   : > { %v1755_v11 = vsel %vm1751_vm1, %v1748_v8, %v1753_v10  ;;  %v4295_v8 = vld [vmem:[%s4702_s19 + $0x70] sm:$0xff]  ;;  %v4296_v10 = vld [vmem:[%s4702_s19 + $0x78] sm:$0xf] }
 0xd2d   : > { %4267 = vmatpush.msk.msrb.mxu2 %vm641_vm2, %v1755_v11 }
 0xd2f   : > { %1787 = vmatpush.msrb.mxu2 %v1754_v13 }
 0xd30   : > { %4268 = vmatmul.msk.f32.vlgmr.msrb.gmra.mxu2 %vm634_vm4, %v4265_v12  ;;  %v2020_v12 = vpop.permute.xlu2 %2019 }
 0xd31   : > { %1840 = vmatpush.msra.mxu2 %v4915_v58 }
 0xdb3   : > { %v1789_v16 = vpop.f32.mrf.mxu2 }
 0xdb4   : > { %v1790_v17 = vadd.f32 %v1789_v16, %v1765_v15 }
 0xdb6   : > { %v4269_v18 = vclamps-f32 %v1790_v17, 1.0 }
 0xdb8   : > { %v1795_v19 = vrot.slane %v4269_v18, 3 }
 0xdba   : > { %v1797_v20 = vsub.f32 %v4973_v39, %v1795_v19  ;;  %v1864_v39 = vpop.permute.xlu0 %1863 }
 0xdbc   : > { %vm1798_vm5 = vcmp.ge.f32.partialorder %v1797_v20, 1.0 }
 0xdbd   : > { %v1799_v21 = vsel %vm1798_vm5, 2.0, %v4585_v34 }
 0xdbe   : > { %v1800_v22 = vsub.f32 %v1797_v20, %v1799_v21  ;;  %v4301_v20 = vld [vmem:[%s4778_s11 + $0x70] sm:$0xff] }
 0xdc0   : > { %1801 = vst [vmem:[%s4689_s30] sm:$0x20] %v1800_v22  ;;  %v4302_v22 = vld [vmem:[%s4778_s11 + $0x78] sm:$0xf] }
 0xdc2   : > { %v1970_v61 = vpop.permute.xlu0 %1969 }
 0xdc3   : > { %v1972_v62 = vperm.slane %v1970_v61, 0 }
 0xdc7   : > { %v4998_v23 = vld [vmem:[%s4689_s30] sm:$0xff] }
 0xdc8   : > { %1841 = vmatpush.msra.mxu2 %v4998_v23 }
 0xdc9   : > { %4274 = vmatmul.msk.f32.vlgmr.msra.gmra.mxu2 %vm584_vm0, %v4270_v4 }
 0xdd1   : > { %4275 = vmatmul.msk.f32.gmra.mxu2 %vm584_vm0, %v4271_v24 }
 0xe4c   : > { %v1843_v25 = vpop.f32.mrf.mxu2 }
 0xe4d   : > { %v1844_v27 = vadd.f32 %v1843_v25, %v1813_v26  ;;  %v2076_v25 = vpop.permute.xlu0 %2075 }
 0xe4f   : > { %v1851_v31 = vmul.f32 0.01, %v1844_v27  ;;  %vm1849_vm7 = vcmp.gt.f32.partialorder %v1844_v27, 0.0 }
 0xe51   : > { %v1853_v36 = vsel %vm1849_vm7, %v1844_v27, %v1851_v31  ;;  %v4308_v31 = vld [vmem:[%s4842_s22 + $0x70] sm:$0xff] }
 0xe54   : > { %v1846_v29 = vpop.f32.mrf.mxu2 }
 0xe55   : > { %v1847_v30 = vadd.f32 %v1846_v29, %v1818_v28 }
 0xe57   : > { %vm1850_vm6 = vcmp.gt.f32.partialorder %v1847_v30, 0.0  ;;  %v1852_v32 = vmul.f32 0.01, %v1847_v30 }
 0xe59   : > { %v1854_v33 = vsel %vm1850_vm6, %v1847_v30, %v1852_v32 }
 0xe5a   : > { %4280 = vmatpush.msk.msra.mxu3 %vm641_vm2, %v1854_v33  ;;  %v4309_v33 = vld [vmem:[%s4842_s22 + $0x78] sm:$0xf] }
 0xe5c   : > { %1895 = vmatpush.msra.mxu3 %v1853_v36  ;;  %v2125_v36 = vpop.permute.xlu0 %2124 }
 0xe5d   : > { %4281 = vmatmul.msk.f32.vlgmr.msra.gmra.mxu3 %vm634_vm4, %v4276_v35 }
 0xe65   : > { %4282 = vmatmul.msk.f32.gmra.mxu3 %vm634_vm4, %v4277_v37 }
 0xee0   : > { %v1897_v38 = vpop.f32.mrf.mxu3 }
 0xee1   : > { %v1898_v40 = vadd.f32 %v1897_v38, %v1864_v39  ;;  %v2130_v38 = vpop.permute.xlu2 %2129 }
 0xee3   : > { %v1905_v43 = vmul.f32 0.01, %v1898_v40  ;;  %vm1903_vm9 = vcmp.gt.f32.partialorder %v1898_v40, 0.0 }
 0xee5   : > { %v1907_v47 = vsel %vm1903_vm9, %v1898_v40, %v1905_v43  ;;  %v4315_v43 = vld [vmem:[%s4859_s25 + $0x7] sm:$0x1] }
 0xee8   : > { %v1900_v41 = vpop.f32.mrf.mxu3 }
 0xee9   : > { %v1901_v42 = vadd.f32 %v1900_v41, %v1869_v3  ;;  %v2232_v61 = vpop.permute.xlu2 %2231 }
 0xeeb   : > { %vm1904_vm8 = vcmp.gt.f32.partialorder %v1901_v42, 0.0  ;;  %v1906_v44 = vmul.f32 0.01, %v1901_v42 }
 0xeed   : > { %v1908_v45 = vsel %vm1904_vm8, %v1901_v42, %v1906_v44 }
 0xeee   : > { %4287 = vmatpush.msk.msra.mxu0 %vm641_vm2, %v1908_v45 }
 0xef0   : > { %1949 = vmatpush.msra.mxu0 %v1907_v47 }
 0xef1   : > { %4288 = vmatmul.msk.f32.vlgmr.msra.gmra.mxu0 %vm634_vm4, %v4283_v46 }
 0xef9   : > { %4289 = vmatmul.msk.f32.gmra.mxu0 %vm634_vm4, %v4284_v48 }
 0xf6e   : > { %v1951_v49 = vpop.f32.mrf.mxu0 }
 0xf6f   : > { %v1952_v51 = vadd.f32 %v1951_v49, %v1918_v50 }
 0xf71   : > { %v1959_v55 = vmul.f32 0.01, %v1952_v51  ;;  %vm1957_vm11 = vcmp.gt.f32.partialorder %v1952_v51, 0.0 }
 0xf73   : > { %v1961_v60 = vsel %vm1957_vm11, %v1952_v51, %v1959_v55 }
 0xf76   : > { %v1954_v53 = vpop.f32.mrf.mxu0 }
 0xf77   : > { %v1955_v54 = vadd.f32 %v1954_v53, %v1923_v52 }
 0xf79   : > { %vm1958_vm10 = vcmp.gt.f32.partialorder %v1955_v54, 0.0  ;;  %v1960_v56 = vmul.f32 0.01, %v1955_v54 }
 0xf7b   : > { %v1962_v57 = vsel %vm1958_vm10, %v1955_v54, %v1960_v56  ;;  %v4320_v54 = vld [vmem:[%s4702_s19 + $0x80] sm:$0xff]  ;;  %v4321_v56 = vld [vmem:[%s4702_s19 + $0x88] sm:$0xf] }
 0xf7c   : > { %4292 = vmatpush.msk.msra.mxu1 %vm641_vm2, %v1962_v57 }
 0xf7e   : > { %1994 = vmatpush.msra.mxu1 %v1961_v60 }
 0xf7f   : > { %4293 = vmatmul.msk.f32.vlgmr.msra.gmra.mxu1 %vm634_vm4, %v4290_v59  ;;  %v2227_v59 = vpop.permute.xlu0 %2226 }
 0xf80   : > { %2047 = vmatpush.msrb.mxu1 %v4915_v58 }
 0xffc   : > { %v1996_v63 = vpop.f32.mrf.mxu1 }
 0xffd   : > { %v1997_v0 = vadd.f32 %v1996_v63, %v1972_v62 }
 0xfff   : > { %v4294_v1 = vclamps-f32 %v1997_v0, 1.0 }
0x1001   : > { %v2002_v2 = vrot.slane %v4294_v1, 2 }
0x1003   : > { %v2004_v5 = vsub.f32 %v4998_v23, %v2002_v2  ;;  %v2071_v23 = vpop.permute.xlu1 %2070 }
0x1005   : > { %vm2005_vm12 = vcmp.ge.f32.partialorder %v2004_v5, 1.0 }
0x1006   : > { %v2006_v6 = vsel %vm2005_vm12, 2.0, %v4585_v34 }
0x1007   : > { %v2007_v7 = vsub.f32 %v2004_v5, %v2006_v6  ;;  %v4326_v5 = vld [vmem:[%s4778_s11 + $0x80] sm:$0xff] }
0x1009   : > { %2008 = vst [vmem:[%s4689_s30] sm:$0x40] %v2007_v7  ;;  %v4327_v7 = vld [vmem:[%s4778_s11 + $0x88] sm:$0xf] }
0x100b   : > { %v2177_v45 = vpop.permute.xlu1 %2176 }
0x100c   : > { %v2179_v46 = vperm.slane %v2177_v45, 0 }
0x1010   : > { %v5023_v9 = vld [vmem:[%s4689_s30] sm:$0xff] }
0x1011   : > { %2048 = vmatpush.msrb.mxu1 %v5023_v9 }
0x1012   : > { %4299 = vmatmul.msk.f32.vlgmr.msrb.gmra.mxu1 %vm584_vm0, %v4295_v8 }
0x101a   : > { %4300 = vmatmul.msk.f32.gmra.mxu1 %vm584_vm0, %v4296_v10 }
0x108f   : > { %v2050_v11 = vpop.f32.mrf.mxu1 }
0x1090   : > { %v2051_v13 = vadd.f32 %v2050_v11, %v2020_v12  ;;  %v2283_v11 = vpop.permute.xlu1 %2282 }
0x1092   : > { %v2058_v17 = vmul.f32 0.01, %v2051_v13  ;;  %vm2056_vm14 = vcmp.gt.f32.partialorder %v2051_v13, 0.0 }
0x1094   : > { %v2060_v21 = vsel %vm2056_vm14, %v2051_v13, %v2058_v17  ;;  %v4333_v17 = vld [vmem:[%s4842_s22 + $0x80] sm:$0xff] }
0x1097   : > { %v2053_v15 = vpop.f32.mrf.mxu1 }
0x1098   : > { %v2054_v16 = vadd.f32 %v2053_v15, %v2025_v14 }
0x109a   : > { %vm2057_vm13 = vcmp.gt.f32.partialorder %v2054_v16, 0.0  ;;  %v2059_v18 = vmul.f32 0.01, %v2054_v16 }
0x109c   : > { %v2061_v19 = vsel %vm2057_vm13, %v2054_v16, %v2059_v18 }
0x109d   : > { %4305 = vmatpush.msk.msrb.mxu2 %vm641_vm2, %v2061_v19  ;;  %v4334_v19 = vld [vmem:[%s4842_s22 + $0x88] sm:$0xf] }
0x109f   : > { %2102 = vmatpush.msrb.mxu2 %v2060_v21  ;;  %v2332_v21 = vpop.permute.xlu1 %2331 }
0x10a0   : > { %4306 = vmatmul.msk.f32.vlgmr.msrb.gmra.mxu2 %vm634_vm4, %v4301_v20 }
0x10a8   : > { %4307 = vmatmul.msk.f32.gmra.mxu2 %vm634_vm4, %v4302_v22 }
0x1123   : > { %v2104_v4 = vpop.f32.mrf.mxu2 }
0x1124   : > { %v2105_v24 = vadd.f32 %v2104_v4, %v2071_v23  ;;  %v2337_v4 = vpop.permute.xlu0 %2336 }
0x1126   : > { %v2112_v28 = vmul.f32 0.01, %v2105_v24  ;;  %vm2110_vm1 = vcmp.gt.f32.partialorder %v2105_v24, 0.0 }
0x1128   : > { %v2114_v32 = vsel %vm2110_vm1, %v2105_v24, %v2112_v28  ;;  %v4340_v28 = vld [vmem:[%s4859_s25 + $0x8] sm:$0x1] }
0x112b   : > { %v2107_v26 = vpop.f32.mrf.mxu2 }
0x112c   : > { %v2108_v27 = vadd.f32 %v2107_v26, %v2076_v25 }
0x112e   : > { %vm2111_vm15 = vcmp.gt.f32.partialorder %v2108_v27, 0.0  ;;  %v2113_v29 = vmul.f32 0.01, %v2108_v27 }
0x1130   : > { %v2115_v30 = vsel %vm2111_vm15, %v2108_v27, %v2113_v29 }
0x1131   : > { %4312 = vmatpush.msk.msrb.mxu3 %vm641_vm2, %v2115_v30 }
0x1133   : > { %2156 = vmatpush.msrb.mxu3 %v2114_v32 }
0x1134   : > { %4313 = vmatmul.msk.f32.vlgmr.msrb.gmra.mxu3 %vm634_vm4, %v4308_v31 }
0x113c   : > { %4314 = vmatmul.msk.f32.gmra.mxu3 %vm634_vm4, %v4309_v33 }
0x11b7   : > { %v2158_v35 = vpop.f32.mrf.mxu3 }
0x11b8   : > { %v2159_v37 = vadd.f32 %v2158_v35, %v2125_v36 }
0x11ba   : > { %v2166_v3 = vmul.f32 0.01, %v2159_v37  ;;  %vm2164_vm5 = vcmp.gt.f32.partialorder %v2159_v37, 0.0 }
0x11bc   : > { %v2168_v44 = vsel %vm2164_vm5, %v2159_v37, %v2166_v3  ;;  %v4346_v3 = vld [vmem:[%s4702_s19 + $0x98] sm:$0xf] }
0x11bf   : > { %v2161_v39 = vpop.f32.mrf.mxu3 }
0x11c0   : > { %v2162_v40 = vadd.f32 %v2161_v39, %v2130_v38 }
0x11c2   : > { %vm2165_vm3 = vcmp.gt.f32.partialorder %v2162_v40, 0.0  ;;  %v2167_v41 = vmul.f32 0.01, %v2162_v40 }
0x11c4   : > { %v2169_v42 = vsel %vm2165_vm3, %v2162_v40, %v2167_v41  ;;  %v4345_v40 = vld [vmem:[%s4702_s19 + $0x90] sm:$0xff] }
0x11c5   : > { %4317 = vmatpush.msk.msrb.mxu0 %vm641_vm2, %v2169_v42 }
0x11c7   : > { %2201 = vmatpush.msrb.mxu0 %v2168_v44 }
0x11c8   : > { %4318 = vmatmul.msk.f32.vlgmr.msrb.gmra.mxu0 %vm634_vm4, %v4315_v43  ;;  %v2436_v43 = vpop.permute.xlu0 %2435 }
0x11c9   : > { %2254 = vmatpush.msra.mxu0 %v4915_v58 }
0x1245   : > { %v2203_v47 = vpop.f32.mrf.mxu0 }
0x1246   : > { %v2204_v48 = vadd.f32 %v2203_v47, %v2179_v46 }
0x1248   : > { %v4319_v49 = vclamps-f32 %v2204_v48, 1.0 }
0x124a   : > { %v2209_v50 = vrot.slane %v4319_v49, 1  ;;  %v4351_v49 = vld [vmem:[%s4778_s11 + $0x90] sm:$0xff] }
0x124c   : > { %v2211_v51 = vsub.f32 %v5023_v9, %v2209_v50  ;;  %v2278_v9 = vpop.permute.xlu2 %2277 }
0x124e   : > { %vm2212_vm6 = vcmp.ge.f32.partialorder %v2211_v51, 1.0 }
0x124f   : > { %v2213_v52 = vsel %vm2212_vm6, 2.0, %v4585_v34 }
0x1250   : > { %v2214_v53 = vsub.f32 %v2211_v51, %v2213_v52  ;;  %v4352_v51 = vld [vmem:[%s4778_s11 + $0x98] sm:$0xf] }
0x1252   : > { %2215 = vst [vmem:[%s4689_s30] sm:$0x80] %v2214_v53  ;;  %v2482_v53 = vpop.permute.xlu0 %2481 }
0x1254   : > { %v2384_v30 = vpop.permute.xlu2 %2383 }
0x1255   : > { %v2386_v31 = vperm.slane %v2384_v30, 0 }
0x1259   : > { %v5048_v55 = vld [vmem:[%s4689_s30] sm:$0xff] }
0x125a   : > { %2255 = vmatpush.msra.mxu0 %v5048_v55 }
0x125b   : > { %4324 = vmatmul.msk.f32.vlgmr.msra.gmra.mxu0 %vm584_vm0, %v4320_v54 }
0x1263   : > { %4325 = vmatmul.msk.f32.gmra.mxu0 %vm584_vm0, %v4321_v56  ;;  %v2487_v56 = vpop.permute.xlu2 %2486 }
0x12d8   : > { %v2257_v57 = vpop.f32.mrf.mxu0 }
0x12d9   : > { %v2258_v60 = vadd.f32 %v2257_v57, %v2227_v59 }
0x12db   : > { %v2265_v0 = vmul.f32 0.01, %v2258_v60  ;;  %vm2263_vm8 = vcmp.gt.f32.partialorder %v2258_v60, 0.0 }
0x12dd   : > { %v2267_v6 = vsel %vm2263_vm8, %v2258_v60, %v2265_v0 }
0x12e0   : > { %v2260_v62 = vpop.f32.mrf.mxu0 }
0x12e1   : > { %v2261_v63 = vadd.f32 %v2260_v62, %v2232_v61 }
0x12e3   : > { %vm2264_vm7 = vcmp.gt.f32.partialorder %v2261_v63, 0.0  ;;  %v2266_v1 = vmul.f32 0.01, %v2261_v63 }
0x12e5   : > { %v2268_v2 = vsel %vm2264_vm7, %v2261_v63, %v2266_v1  ;;  %v4358_v63 = vld [vmem:[%s4842_s22 + $0x90] sm:$0xff]  ;;  %v4359_v1 = vld [vmem:[%s4842_s22 + $0x98] sm:$0xf] }
0x12e6   : > { %4330 = vmatpush.msk.msra.mxu1 %vm641_vm2, %v2268_v2 }
0x12e8   : > { %2309 = vmatpush.msra.mxu1 %v2267_v6 }
0x12e9   : > { %4331 = vmatmul.msk.f32.vlgmr.msra.gmra.mxu1 %vm634_vm4, %v4326_v5  ;;  %v2536_v5 = vpop.permute.xlu2 %2535 }
0x12f1   : > { %4332 = vmatmul.msk.f32.gmra.mxu1 %vm634_vm4, %v4327_v7 }
0x1366   : > { %v2311_v8 = vpop.f32.mrf.mxu1 }
0x1367   : > { %v2312_v10 = vadd.f32 %v2311_v8, %v2278_v9 }
0x1369   : > { %v2319_v14 = vmul.f32 0.01, %v2312_v10  ;;  %vm2317_vm10 = vcmp.gt.f32.partialorder %v2312_v10, 0.0 }
0x136b   : > { %v2321_v18 = vsel %vm2317_vm10, %v2312_v10, %v2319_v14 }
0x136e   : > { %v2314_v12 = vpop.f32.mrf.mxu1 }
0x136f   : > { %v2315_v13 = vadd.f32 %v2314_v12, %v2283_v11 }
0x1371   : > { %vm2318_vm9 = vcmp.gt.f32.partialorder %v2315_v13, 0.0  ;;  %v2320_v15 = vmul.f32 0.01, %v2315_v13 }
0x1373   : > { %v2322_v16 = vsel %vm2318_vm9, %v2315_v13, %v2320_v15  ;;  %v4365_v13 = vld [vmem:[%s4859_s25 + $0x9] sm:$0x1]  ;;  %v2588_v15 = vpop.permute.xlu0 %2587 }
0x1374   : > { %4337 = vmatpush.msk.msra.mxu2 %vm641_vm2, %v2322_v16  ;;  %v2590_v16 = vperm.slane %v2588_v15, 0 }
0x1376   : > { %2363 = vmatpush.msra.mxu2 %v2321_v18 }
0x1377   : > { %4338 = vmatmul.msk.f32.vlgmr.msra.gmra.mxu2 %vm634_vm4, %v4333_v17 }
0x137f   : > { %4339 = vmatmul.msk.f32.gmra.mxu2 %vm634_vm4, %v4334_v19 }
0x13fa   : > { %v2365_v20 = vpop.f32.mrf.mxu2 }
0x13fb   : > { %v2366_v22 = vadd.f32 %v2365_v20, %v2332_v21 }
0x13fd   : > { %v2373_v25 = vmul.f32 0.01, %v2366_v22  ;;  %vm2371_vm12 = vcmp.gt.f32.partialorder %v2366_v22, 0.0 }
0x13ff   : > { %v2375_v29 = vsel %vm2371_vm12, %v2366_v22, %v2373_v25  ;;  %v4371_v25 = vld [vmem:[%s4702_s19 + $0xa8] sm:$0xf] }
0x1402   : > { %v2368_v23 = vpop.f32.mrf.mxu2 }
0x1403   : > { %v2369_v24 = vadd.f32 %v2368_v23, %v2337_v4 }
0x1405   : > { %vm2372_vm11 = vcmp.gt.f32.partialorder %v2369_v24, 0.0  ;;  %v2374_v26 = vmul.f32 0.01, %v2369_v24 }
0x1407   : > { %v2376_v27 = vsel %vm2372_vm11, %v2369_v24, %v2374_v26  ;;  %v4370_v24 = vld [vmem:[%s4702_s19 + $0xa0] sm:$0xff] }
0x1408   : > { %4342 = vmatpush.msk.msra.mxu3 %vm641_vm2, %v2376_v27  ;;  %v2638_v27 = vpop.permute.xlu2 %2637 }
0x140a   : > { %2408 = vmatpush.msra.mxu3 %v2375_v29 }
0x140b   : > { %4343 = vmatmul.msk.f32.vlgmr.msra.gmra.mxu3 %vm634_vm4, %v4340_v28 }
0x148e   : > { %v2410_v32 = vpop.f32.mrf.mxu3 }
0x148f   : > { %v2411_v33 = vadd.f32 %v2410_v32, %v2386_v31 }
0x1491   : > { %v4344_v35 = vclamps-f32 %v2411_v33, 1.0 }
0x1493   : > { %v2415_v36 = vsub.f32 %v4915_v58, %v4344_v35  ;;  %v2431_v58 = vpop.permute.xlu1 %2430 }
0x1495   : > { %vm2416_vm13 = vcmp.ge.f32.partialorder %v2415_v36, 1.0 }
0x1496   : > { %v2417_v37 = vsel %vm2416_vm13, 2.0, %v4585_v34 }
0x1497   : > { %v2418_v38 = vsub.f32 %v2415_v36, %v2417_v37  ;;  %v4376_v36 = vld [vmem:[%s4778_s11 + $0xa0] sm:$0xff] }
0x1499   : > { %2419 = vst [vmem:[%s4689_s30 + $0x8] sm:$0x1] %v2418_v38  ;;  %v4377_v38 = vld [vmem:[%s4778_s11 + $0xa8] sm:$0xf] }
0x149b   : > { %v2541_v7 = vpop.permute.xlu1 %2540 }
0x14a0   : > { %v5071_v39 = vld [vmem:[%s4689_s30 + $0x8] sm:$0xff] }
0x14a1   : > { %2458 = vmatpush.msrb.mxu3 %v5071_v39 }
0x14a3   : > { %2459 = vmatpush.msrb.mxu3 %v5048_v55  ;;  %v2643_v29 = vpop.permute.xlu1 %2642 }
0x14a4   : > { %4349 = vmatmul.msk.f32.vlgmr.msrb.gmra.mxu3 %vm584_vm0, %v4345_v40 }
0x14ab   : > { %v2689_v40 = vpop.permute.xlu1 %2688 }
0x14ac   : > { %4350 = vmatmul.msk.f32.gmra.mxu3 %vm584_vm0, %v4346_v3 }
0x1527   : > { %v2461_v41 = vpop.f32.mrf.mxu3 }
0x1528   : > { %v2462_v42 = vadd.f32 %v2461_v41, %v2431_v58  ;;  %v2694_v41 = vpop.permute.xlu0 %2693 }
0x152a   : > { %v2469_v46 = vmul.f32 0.01, %v2462_v42  ;;  %vm2467_vm15 = vcmp.gt.f32.partialorder %v2462_v42, 0.0 }
0x152c   : > { %v2471_v50 = vsel %vm2467_vm15, %v2462_v42, %v2469_v46  ;;  %v4383_v46 = vld [vmem:[%s4842_s22 + $0xa0] sm:$0xff] }
0x152f   : > { %v2464_v44 = vpop.f32.mrf.mxu3 }
0x1530   : > { %v2465_v45 = vadd.f32 %v2464_v44, %v2436_v43 }
0x1532   : > { %vm2468_vm14 = vcmp.gt.f32.partialorder %v2465_v45, 0.0  ;;  %v2470_v47 = vmul.f32 0.01, %v2465_v45 }
0x1534   : > { %v2472_v48 = vsel %vm2468_vm14, %v2465_v45, %v2470_v47 }
0x1535   : > { %4355 = vmatpush.msk.msrb.mxu0 %vm641_vm2, %v2472_v48  ;;  %v4384_v48 = vld [vmem:[%s4842_s22 + $0xa8] sm:$0xf] }
0x1537   : > { %2513 = vmatpush.msrb.mxu0 %v2471_v50  ;;  %v2743_v50 = vpop.permute.xlu0 %2742 }
0x1538   : > { %4356 = vmatmul.msk.f32.vlgmr.msrb.gmra.mxu0 %vm634_vm4, %v4351_v49 }
0x1540   : > { %4357 = vmatmul.msk.f32.gmra.mxu0 %vm634_vm4, %v4352_v51 }
0x15b5   : > { %v2515_v52 = vpop.f32.mrf.mxu0 }
0x15b6   : > { %v2516_v54 = vadd.f32 %v2515_v52, %v2482_v53  ;;  %v2748_v52 = vpop.permute.xlu2 %2747 }
0x15b8   : > { %v2523_v60 = vmul.f32 0.01, %v2516_v54  ;;  %vm2521_vm3 = vcmp.gt.f32.partialorder %v2516_v54, 0.0 }
0x15ba   : > { %v2525_v0 = vsel %vm2521_vm3, %v2516_v54, %v2523_v60  ;;  %v4390_v60 = vld [vmem:[%s4859_s25 + $0xa] sm:$0x1] }
0x15bd   : > { %v2518_v57 = vpop.f32.mrf.mxu0 }
0x15be   : > { %v2519_v59 = vadd.f32 %v2518_v57, %v2487_v56  ;;  %v2850_v15 = vpop.permute.xlu2 %2849 }
0x15c0   : > { %vm2522_vm1 = vcmp.gt.f32.partialorder %v2519_v59, 0.0  ;;  %v2524_v61 = vmul.f32 0.01, %v2519_v59 }
0x15c2   : > { %v2526_v62 = vsel %vm2522_vm1, %v2519_v59, %v2524_v61 }
0x15c3   : > { %4362 = vmatpush.msk.msrb.mxu1 %vm641_vm2, %v2526_v62  ;;  %v2795_v62 = vpop.permute.xlu1 %2794 }
0x15c5   : > { %2567 = vmatpush.msrb.mxu1 %v2525_v0 }
0x15c6   : > { %4363 = vmatmul.msk.f32.vlgmr.msrb.gmra.mxu1 %vm634_vm4, %v4358_v63  ;;  %v2797_v63 = vperm.slane %v2795_v62, 0 }
0x15ce   : > { %4364 = vmatmul.msk.f32.gmra.mxu1 %vm634_vm4, %v4359_v1 }
0x1643   : > { %v2569_v2 = vpop.f32.mrf.mxu1 }
0x1644   : > { %v2570_v6 = vadd.f32 %v2569_v2, %v2536_v5 }
0x1646   : > { %v2577_v10 = vmul.f32 0.01, %v2570_v6  ;;  %vm2575_vm6 = vcmp.gt.f32.partialorder %v2570_v6, 0.0 }
0x1648   : > { %v2579_v14 = vsel %vm2575_vm6, %v2570_v6, %v2577_v10  ;;  %v4395_v10 = vld [vmem:[%s4702_s19 + $0xb0] sm:$0xff] }
0x164b   : > { %v2572_v8 = vpop.f32.mrf.mxu1 }
0x164c   : > { %v2573_v9 = vadd.f32 %v2572_v8, %v2541_v7 }
0x164e   : > { %vm2576_vm5 = vcmp.gt.f32.partialorder %v2573_v9, 0.0  ;;  %v2578_v11 = vmul.f32 0.01, %v2573_v9 }
0x1650   : > { %v2580_v12 = vsel %vm2576_vm5, %v2573_v9, %v2578_v11  ;;  %v4396_v11 = vld [vmem:[%s4702_s19 + $0xb8] sm:$0xf] }
0x1651   : > { %4367 = vmatpush.msk.msrb.mxu2 %vm641_vm2, %v2580_v12 }
0x1653   : > { %2612 = vmatpush.msrb.mxu2 %v2579_v14 }
0x1654   : > { %4368 = vmatmul.msk.f32.vlgmr.msrb.gmra.mxu2 %vm634_vm4, %v4365_v13  ;;  %v2845_v13 = vpop.permute.xlu0 %2844 }
0x16d7   : > { %v2614_v17 = vpop.f32.mrf.mxu2 }
0x16d8   : > { %v2615_v18 = vadd.f32 %v2614_v17, %v2590_v16 }
0x16da   : > { %v4369_v19 = vclamps-f32 %v2615_v18, 1.0 }
0x16dc   : > { %v2620_v20 = vrot.slane %v4369_v19, 7 }
0x16de   : > { %v2622_v21 = vsub.f32 %v5071_v39, %v2620_v20 }
0x16e0   : > { %vm2623_vm7 = vcmp.ge.f32.partialorder %v2622_v21, 1.0 }
0x16e1   : > { %v2624_v22 = vsel %vm2623_vm7, 2.0, %v4585_v34 }
0x16e2   : > { %v2625_v4 = vsub.f32 %v2622_v21, %v2624_v22  ;;  %v4401_v21 = vld [vmem:[%s4778_s11 + $0xb0] sm:$0xff] }
0x16e4   : > { %2626 = vst [vmem:[%s4689_s30 + $0x8] sm:$0x2] %v2625_v4  ;;  %v4402_v4 = vld [vmem:[%s4778_s11 + $0xb8] sm:$0xf] }
0x16eb   : > { %v5096_v23 = vld [vmem:[%s4689_s30 + $0x8] sm:$0xff] }
0x16ec   : > { %2665 = vmatpush.msra.mxu2 %v5096_v23 }
0x16ee   : > { %2666 = vmatpush.msra.mxu2 %v5048_v55 }
0x16ef   : > { %4374 = vmatmul.msk.f32.vlgmr.msra.gmra.mxu2 %vm584_vm0, %v4370_v24  ;;  %v2896_v24 = vpop.permute.xlu2 %2895 }
0x16f7   : > { %4375 = vmatmul.msk.f32.gmra.mxu2 %vm584_vm0, %v4371_v25 }
0x1772   : > { %v2668_v26 = vpop.f32.mrf.mxu2 }
0x1773   : > { %v2669_v28 = vadd.f32 %v2668_v26, %v2638_v27  ;;  %v2901_v26 = vpop.permute.xlu1 %2900 }
0x1775   : > { %v2676_v32 = vmul.f32 0.01, %v2669_v28  ;;  %vm2674_vm9 = vcmp.gt.f32.partialorder %v2669_v28, 0.0 }
0x1777   : > { %v2678_v37 = vsel %vm2674_vm9, %v2669_v28, %v2676_v32  ;;  %v4408_v32 = vld [vmem:[%s4842_s22 + $0xb0] sm:$0xff] }
0x177a   : > { %v2671_v30 = vpop.f32.mrf.mxu2 }
0x177b   : > { %v2672_v31 = vadd.f32 %v2671_v30, %v2643_v29 }
0x177d   : > { %vm2675_vm8 = vcmp.gt.f32.partialorder %v2672_v31, 0.0  ;;  %v2677_v33 = vmul.f32 0.01, %v2672_v31 }
0x177f   : > { %v2679_v35 = vsel %vm2675_vm8, %v2672_v31, %v2677_v33 }
0x1780   : > { %4380 = vmatpush.msk.msra.mxu3 %vm641_vm2, %v2679_v35  ;;  %v4409_v35 = vld [vmem:[%s4842_s22 + $0xb8] sm:$0xf] }
0x1782   : > { %2720 = vmatpush.msra.mxu3 %v2678_v37  ;;  %v2950_v37 = vpop.permute.xlu1 %2949 }
0x1783   : > { %4381 = vmatmul.msk.f32.vlgmr.msra.gmra.mxu3 %vm634_vm4, %v4376_v36 }
0x178b   : > { %4382 = vmatmul.msk.f32.gmra.mxu3 %vm634_vm4, %v4377_v38 }
0x1806   : > { %v2722_v39 = vpop.f32.mrf.mxu3 }
0x1807   : > { %v2723_v3 = vadd.f32 %v2722_v39, %v2689_v40  ;;  %v2955_v39 = vpop.permute.xlu0 %2954 }
0x1809   : > { %v2730_v43 = vmul.f32 0.01, %v2723_v3  ;;  %vm2728_vm11 = vcmp.gt.f32.partialorder %v2723_v3, 0.0 }
0x180b   : > { %v2732_v47 = vsel %vm2728_vm11, %v2723_v3, %v2730_v43  ;;  %v4415_v43 = vld [vmem:[%s4859_s25 + $0xb] sm:$0x1] }
0x180e   : > { %v2725_v58 = vpop.f32.mrf.mxu3 }
0x180f   : > { %v2726_v42 = vadd.f32 %v2725_v58, %v2694_v41  ;;  %v3057_v62 = vpop.permute.xlu0 %3056 }
0x1811   : > { %vm2729_vm10 = vcmp.gt.f32.partialorder %v2726_v42, 0.0  ;;  %v2731_v44 = vmul.f32 0.01, %v2726_v42 }
0x1813   : > { %v2733_v45 = vsel %vm2729_vm10, %v2726_v42, %v2731_v44 }
0x1814   : > { %4387 = vmatpush.msk.msra.mxu0 %vm641_vm2, %v2733_v45  ;;  %v3002_v45 = vpop.permute.xlu2 %3001 }
0x1816   : > { %2774 = vmatpush.msra.mxu0 %v2732_v47 }
0x1817   : > { %4388 = vmatmul.msk.f32.vlgmr.msra.gmra.mxu0 %vm634_vm4, %v4383_v46  ;;  %v3004_v46 = vperm.slane %v3002_v45, 0 }
0x181f   : > { %4389 = vmatmul.msk.f32.gmra.mxu0 %vm634_vm4, %v4384_v48 }
0x1894   : > { %v2776_v49 = vpop.f32.mrf.mxu0 }
0x1895   : > { %v2777_v51 = vadd.f32 %v2776_v49, %v2743_v50 }
0x1897   : > { %v2784_v56 = vmul.f32 0.01, %v2777_v51  ;;  %vm2782_vm13 = vcmp.gt.f32.partialorder %v2777_v51, 0.0 }
0x1899   : > { %v2786_v61 = vsel %vm2782_vm13, %v2777_v51, %v2784_v56  ;;  %v4420_v56 = vld [vmem:[%s4702_s19 + $0xc0] sm:$0xff] }
0x189c   : > { %v2779_v53 = vpop.f32.mrf.mxu0 }
0x189d   : > { %v2780_v54 = vadd.f32 %v2779_v53, %v2748_v52 }
0x189f   : > { %vm2783_vm12 = vcmp.gt.f32.partialorder %v2780_v54, 0.0  ;;  %v2785_v57 = vmul.f32 0.01, %v2780_v54 }
0x18a1   : > { %v2787_v59 = vsel %vm2783_vm12, %v2780_v54, %v2785_v57  ;;  %v4421_v57 = vld [vmem:[%s4702_s19 + $0xc8] sm:$0xf] }
0x18a2   : > { %4392 = vmatpush.msk.msra.mxu1 %vm641_vm2, %v2787_v59 }
0x18a4   : > { %2819 = vmatpush.msra.mxu1 %v2786_v61 }
0x18a5   : > { %4393 = vmatmul.msk.f32.vlgmr.msra.gmra.mxu1 %vm634_vm4, %v4390_v60  ;;  %v3052_v60 = vpop.permute.xlu1 %3051 }
0x1922   : > { %v2821_v0 = vpop.f32.mrf.mxu1 }
0x1923   : > { %v2822_v1 = vadd.f32 %v2821_v0, %v2797_v63 }
0x1925   : > { %v4394_v2 = vclamps-f32 %v2822_v1, 1.0 }
0x1927   : > { %v2827_v5 = vrot.slane %v4394_v2, 6 }
0x1929   : > { %v2829_v6 = vsub.f32 %v5096_v23, %v2827_v5 }
0x192b   : > { %vm2830_vm14 = vcmp.ge.f32.partialorder %v2829_v6, 1.0 }
0x192c   : > { %v2831_v7 = vsel %vm2830_vm14, 2.0, %v4585_v34 }
0x192d   : > { %v2832_v8 = vsub.f32 %v2829_v6, %v2831_v7  ;;  %v4426_v6 = vld [vmem:[%s4778_s11 + $0xc0] sm:$0xff] }
0x192f   : > { %2833 = vst [vmem:[%s4689_s30 + $0x8] sm:$0x4] %v2832_v8  ;;  %v4427_v8 = vld [vmem:[%s4778_s11 + $0xc8] sm:$0xf] }
0x1936   : > { %v5121_v9 = vld [vmem:[%s4689_s30 + $0x8] sm:$0xff] }
0x1937   : > { %2872 = vmatpush.msrb.mxu1 %v5121_v9 }
0x1939   : > { %2873 = vmatpush.msrb.mxu1 %v5048_v55 }
0x193a   : > { %4399 = vmatmul.msk.f32.vlgmr.msrb.gmra.mxu1 %vm584_vm0, %v4395_v10  ;;  %v3103_v10 = vpop.permute.xlu0 %3102 }
0x1942   : > { %4400 = vmatmul.msk.f32.gmra.mxu1 %vm584_vm0, %v4396_v11 }
0x19b7   : > { %v2875_v12 = vpop.f32.mrf.mxu1 }
0x19b8   : > { %v2876_v14 = vadd.f32 %v2875_v12, %v2845_v13  ;;  %v3108_v12 = vpop.permute.xlu2 %3107 }
0x19ba   : > { %v2883_v18 = vmul.f32 0.01, %v2876_v14  ;;  %vm2881_vm1 = vcmp.gt.f32.partialorder %v2876_v14, 0.0 }
0x19bc   : > { %v2885_v22 = vsel %vm2881_vm1, %v2876_v14, %v2883_v18  ;;  %v4433_v18 = vld [vmem:[%s4842_s22 + $0xc0] sm:$0xff] }
0x19bf   : > { %v2878_v16 = vpop.f32.mrf.mxu1 }
0x19c0   : > { %v2879_v17 = vadd.f32 %v2878_v16, %v2850_v15 }
0x19c2   : > { %vm2882_vm15 = vcmp.gt.f32.partialorder %v2879_v17, 0.0  ;;  %v2884_v19 = vmul.f32 0.01, %v2879_v17 }
0x19c4   : > { %v2886_v20 = vsel %vm2882_vm15, %v2879_v17, %v2884_v19 }
0x19c5   : > { %4405 = vmatpush.msk.msrb.mxu2 %vm641_vm2, %v2886_v20  ;;  %v4434_v20 = vld [vmem:[%s4842_s22 + $0xc8] sm:$0xf] }
0x19c7   : > { %2927 = vmatpush.msrb.mxu2 %v2885_v22  ;;  %v3157_v22 = vpop.permute.xlu2 %3156 }
0x19c8   : > { %4406 = vmatmul.msk.f32.vlgmr.msrb.gmra.mxu2 %vm634_vm4, %v4401_v21 }
0x19d0   : > { %4407 = vmatmul.msk.f32.gmra.mxu2 %vm634_vm4, %v4402_v4 }
0x1a4b   : > { %v2929_v23 = vpop.f32.mrf.mxu2 }
0x1a4c   : > { %v2930_v25 = vadd.f32 %v2929_v23, %v2896_v24  ;;  %v3162_v23 = vpop.permute.xlu1 %3161 }
0x1a4e   : > { %v2937_v29 = vmul.f32 0.01, %v2930_v25  ;;  %vm2935_vm5 = vcmp.gt.f32.partialorder %v2930_v25, 0.0 }
0x1a50   : > { %v2939_v33 = vsel %vm2935_vm5, %v2930_v25, %v2937_v29  ;;  %v4440_v29 = vld [vmem:[%s4859_s25 + $0xc] sm:$0x1] }
0x1a53   : > { %v2932_v27 = vpop.f32.mrf.mxu2 }
0x1a54   : > { %v2933_v28 = vadd.f32 %v2932_v27, %v2901_v26  ;;  %v3264_v45 = vpop.permute.xlu1 %3263 }
0x1a56   : > { %vm2936_vm3 = vcmp.gt.f32.partialorder %v2933_v28, 0.0  ;;  %v2938_v30 = vmul.f32 0.01, %v2933_v28 }
0x1a58   : > { %v2940_v31 = vsel %vm2936_vm3, %v2933_v28, %v2938_v30 }
0x1a59   : > { %4412 = vmatpush.msk.msrb.mxu3 %vm641_vm2, %v2940_v31  ;;  %v3209_v31 = vpop.permute.xlu0 %3208 }
0x1a5b   : > { %2981 = vmatpush.msrb.mxu3 %v2939_v33 }
0x1a5c   : > { %4413 = vmatmul.msk.f32.vlgmr.msrb.gmra.mxu3 %vm634_vm4, %v4408_v32  ;;  %v3211_v32 = vperm.slane %v3209_v31, 0 }
0x1a64   : > { %4414 = vmatmul.msk.f32.gmra.mxu3 %vm634_vm4, %v4409_v35 }
0x1adf   : > { %v2983_v36 = vpop.f32.mrf.mxu3 }
0x1ae0   : > { %v2984_v38 = vadd.f32 %v2983_v36, %v2950_v37 }
0x1ae2   : > { %v2991_v41 = vmul.f32 0.01, %v2984_v38  ;;  %vm2989_vm7 = vcmp.gt.f32.partialorder %v2984_v38, 0.0 }
0x1ae4   : > { %v2993_v44 = vsel %vm2989_vm7, %v2984_v38, %v2991_v41  ;;  %v4445_v41 = vld [vmem:[%s4702_s19 + $0xd0] sm:$0xff] }
0x1ae7   : > { %v2986_v40 = vpop.f32.mrf.mxu3 }
0x1ae8   : > { %v2987_v3 = vadd.f32 %v2986_v40, %v2955_v39 }
0x1aea   : > { %vm2990_vm6 = vcmp.gt.f32.partialorder %v2987_v3, 0.0  ;;  %v2992_v58 = vmul.f32 0.01, %v2987_v3 }
0x1aec   : > { %v2994_v42 = vsel %vm2990_vm6, %v2987_v3, %v2992_v58  ;;  %v4446_v58 = vld [vmem:[%s4702_s19 + $0xd8] sm:$0xf] }
0x1aed   : > { %4417 = vmatpush.msk.msrb.mxu0 %vm641_vm2, %v2994_v42 }
0x1aef   : > { %3026 = vmatpush.msrb.mxu0 %v2993_v44 }
0x1af0   : > { %4418 = vmatmul.msk.f32.vlgmr.msrb.gmra.mxu0 %vm634_vm4, %v4415_v43  ;;  %v3259_v43 = vpop.permute.xlu2 %3258 }
0x1b6d   : > { %v3028_v47 = vpop.f32.mrf.mxu0 }
0x1b6e   : > { %v3029_v48 = vadd.f32 %v3028_v47, %v3004_v46 }
0x1b70   : > { %v4419_v49 = vclamps-f32 %v3029_v48, 1.0 }
0x1b72   : > { %v3034_v50 = vrot.slane %v4419_v49, 5 }
0x1b74   : > { %v3036_v51 = vsub.f32 %v5121_v9, %v3034_v50 }
0x1b76   : > { %vm3037_vm8 = vcmp.ge.f32.partialorder %v3036_v51, 1.0 }
0x1b77   : > { %v3038_v52 = vsel %vm3037_vm8, 2.0, %v4585_v34 }
0x1b78   : > { %v3039_v53 = vsub.f32 %v3036_v51, %v3038_v52  ;;  %v4451_v51 = vld [vmem:[%s4778_s11 + $0xd0] sm:$0xff] }
0x1b7a   : > { %3040 = vst [vmem:[%s4689_s30 + $0x8] sm:$0x8] %v3039_v53  ;;  %v4452_v53 = vld [vmem:[%s4778_s11 + $0xd8] sm:$0xf] }
0x1b81   : > { %v5146_v54 = vld [vmem:[%s4689_s30 + $0x8] sm:$0xff] }
0x1b82   : > { %3079 = vmatpush.msra.mxu0 %v5146_v54 }
0x1b84   : > { %3080 = vmatpush.msra.mxu0 %v5048_v55 }
0x1b85   : > { %4424 = vmatmul.msk.f32.vlgmr.msra.gmra.mxu0 %vm584_vm0, %v4420_v56  ;;  %v3310_v56 = vpop.permute.xlu1 %3309 }
0x1b8d   : > { %4425 = vmatmul.msk.f32.gmra.mxu0 %vm584_vm0, %v4421_v57 }
0x1c02   : > { %v3082_v59 = vpop.f32.mrf.mxu0 }
0x1c03   : > { %v3083_v61 = vadd.f32 %v3082_v59, %v3052_v60  ;;  %v3315_v59 = vpop.permute.xlu0 %3314 }
0x1c05   : > { %v3090_v1 = vmul.f32 0.01, %v3083_v61  ;;  %vm3088_vm10 = vcmp.gt.f32.partialorder %v3083_v61, 0.0 }
0x1c07   : > { %v3092_v7 = vsel %vm3088_vm10, %v3083_v61, %v3090_v1  ;;  %v4458_v1 = vld [vmem:[%s4842_s22 + $0xd0] sm:$0xff] }
0x1c0a   : > { %v3085_v63 = vpop.f32.mrf.mxu0 }
0x1c0b   : > { %v3086_v0 = vadd.f32 %v3085_v63, %v3057_v62 }
0x1c0d   : > { %vm3089_vm9 = vcmp.gt.f32.partialorder %v3086_v0, 0.0  ;;  %v3091_v2 = vmul.f32 0.01, %v3086_v0 }
0x1c0f   : > { %v3093_v5 = vsel %vm3089_vm9, %v3086_v0, %v3091_v2 }
0x1c10   : > { %4430 = vmatpush.msk.msra.mxu1 %vm641_vm2, %v3093_v5  ;;  %v4459_v5 = vld [vmem:[%s4842_s22 + $0xd8] sm:$0xf] }
0x1c12   : > { %3134 = vmatpush.msra.mxu1 %v3092_v7  ;;  %v3364_v7 = vpop.permute.xlu0 %3363 }
0x1c13   : > { %4431 = vmatmul.msk.f32.vlgmr.msra.gmra.mxu1 %vm634_vm4, %v4426_v6 }
0x1c1b   : > { %4432 = vmatmul.msk.f32.gmra.mxu1 %vm634_vm4, %v4427_v8 }
0x1c90   : > { %v3136_v9 = vpop.f32.mrf.mxu1 }
0x1c91   : > { %v3137_v11 = vadd.f32 %v3136_v9, %v3103_v10  ;;  %v3369_v9 = vpop.permute.xlu2 %3368 }
0x1c93   : > { %v3144_v15 = vmul.f32 0.01, %v3137_v11  ;;  %vm3142_vm12 = vcmp.gt.f32.partialorder %v3137_v11, 0.0 }
0x1c95   : > { %v3146_v19 = vsel %vm3142_vm12, %v3137_v11, %v3144_v15  ;;  %v4465_v15 = vld [vmem:[%s4859_s25 + $0xd] sm:$0x1] }
0x1c98   : > { %v3139_v13 = vpop.f32.mrf.mxu1 }
0x1c99   : > { %v3140_v14 = vadd.f32 %v3139_v13, %v3108_v12  ;;  %v3471_v31 = vpop.permute.xlu2 %3470 }
0x1c9b   : > { %vm3143_vm11 = vcmp.gt.f32.partialorder %v3140_v14, 0.0  ;;  %v3145_v16 = vmul.f32 0.01, %v3140_v14 }
0x1c9d   : > { %v3147_v17 = vsel %vm3143_vm11, %v3140_v14, %v3145_v16 }
0x1c9e   : > { %4437 = vmatpush.msk.msra.mxu2 %vm641_vm2, %v3147_v17  ;;  %v3416_v17 = vpop.permute.xlu1 %3415 }
0x1ca0   : > { %3188 = vmatpush.msra.mxu2 %v3146_v19 }
0x1ca1   : > { %4438 = vmatmul.msk.f32.vlgmr.msra.gmra.mxu2 %vm634_vm4, %v4433_v18  ;;  %v3418_v18 = vperm.slane %v3416_v17, 0 }
0x1ca9   : > { %4439 = vmatmul.msk.f32.gmra.mxu2 %vm634_vm4, %v4434_v20 }
0x1d24   : > { %v3190_v21 = vpop.f32.mrf.mxu2 }
0x1d25   : > { %v3191_v4 = vadd.f32 %v3190_v21, %v3157_v22 }
0x1d27   : > { %v3198_v26 = vmul.f32 0.01, %v3191_v4  ;;  %vm3196_vm14 = vcmp.gt.f32.partialorder %v3191_v4, 0.0 }
0x1d29   : > { %v3200_v30 = vsel %vm3196_vm14, %v3191_v4, %v3198_v26  ;;  %v4470_v26 = vld [vmem:[%s4702_s19 + $0xe0] sm:$0xff] }
0x1d2c   : > { %v3193_v24 = vpop.f32.mrf.mxu2 }
0x1d2d   : > { %v3194_v25 = vadd.f32 %v3193_v24, %v3162_v23 }
0x1d2f   : > { %vm3197_vm13 = vcmp.gt.f32.partialorder %v3194_v25, 0.0  ;;  %v3199_v27 = vmul.f32 0.01, %v3194_v25 }
0x1d31   : > { %v3201_v28 = vsel %vm3197_vm13, %v3194_v25, %v3199_v27  ;;  %v4471_v27 = vld [vmem:[%s4702_s19 + $0xe8] sm:$0xf] }
0x1d32   : > { %4442 = vmatpush.msk.msra.mxu3 %vm641_vm2, %v3201_v28 }
0x1d34   : > { %3233 = vmatpush.msra.mxu3 %v3200_v30 }
0x1d35   : > { %4443 = vmatmul.msk.f32.vlgmr.msra.gmra.mxu3 %vm634_vm4, %v4440_v29  ;;  %v3466_v29 = vpop.permute.xlu0 %3465 }
0x1db8   : > { %v3235_v33 = vpop.f32.mrf.mxu3 }
0x1db9   : > { %v3236_v35 = vadd.f32 %v3235_v33, %v3211_v32 }
0x1dbb   : > { %v4444_v36 = vclamps-f32 %v3236_v35, 1.0 }
0x1dbd   : > { %v3241_v37 = vrot.slane %v4444_v36, 4 }
0x1dbf   : > { %v3243_v38 = vsub.f32 %v5146_v54, %v3241_v37 }
0x1dc1   : > { %vm3244_vm15 = vcmp.ge.f32.partialorder %v3243_v38, 1.0 }
0x1dc2   : > { %v3245_v39 = vsel %vm3244_vm15, 2.0, %v4585_v34 }
0x1dc3   : > { %v3246_v40 = vsub.f32 %v3243_v38, %v3245_v39  ;;  %v4476_v38 = vld [vmem:[%s4778_s11 + $0xe0] sm:$0xff] }
0x1dc5   : > { %3247 = vst [vmem:[%s4689_s30 + $0x8] sm:$0x10] %v3246_v40  ;;  %v4477_v40 = vld [vmem:[%s4778_s11 + $0xe8] sm:$0xf] }
0x1dcc   : > { %v5171_v3 = vld [vmem:[%s4689_s30 + $0x8] sm:$0xff] }
0x1dcd   : > { %3286 = vmatpush.msrb.mxu3 %v5171_v3 }
0x1dcf   : > { %3287 = vmatpush.msrb.mxu3 %v5048_v55 }
0x1dd0   : > { %4449 = vmatmul.msk.f32.vlgmr.msrb.gmra.mxu3 %vm584_vm0, %v4445_v41  ;;  %v3517_v41 = vpop.permute.xlu2 %3516 }
0x1dd8   : > { %4450 = vmatmul.msk.f32.gmra.mxu3 %vm584_vm0, %v4446_v58 }
0x1e53   : > { %v3289_v42 = vpop.f32.mrf.mxu3 }
0x1e54   : > { %v3290_v44 = vadd.f32 %v3289_v42, %v3259_v43  ;;  %v3522_v42 = vpop.permute.xlu1 %3521 }
0x1e56   : > { %v3297_v48 = vmul.f32 0.01, %v3290_v44  ;;  %vm3295_vm3 = vcmp.gt.f32.partialorder %v3290_v44, 0.0 }
0x1e58   : > { %v3299_v52 = vsel %vm3295_vm3, %v3290_v44, %v3297_v48  ;;  %v4483_v48 = vld [vmem:[%s4842_s22 + $0xe0] sm:$0xff] }
0x1e5b   : > { %v3292_v46 = vpop.f32.mrf.mxu3 }
0x1e5c   : > { %v3293_v47 = vadd.f32 %v3292_v46, %v3264_v45 }
0x1e5e   : > { %vm3296_vm1 = vcmp.gt.f32.partialorder %v3293_v47, 0.0  ;;  %v3298_v49 = vmul.f32 0.01, %v3293_v47 }
0x1e60   : > { %v3300_v50 = vsel %vm3296_vm1, %v3293_v47, %v3298_v49 }
0x1e61   : > { %4455 = vmatpush.msk.msrb.mxu0 %vm641_vm2, %v3300_v50  ;;  %v4484_v50 = vld [vmem:[%s4842_s22 + $0xe8] sm:$0xf] }
0x1e63   : > { %3341 = vmatpush.msrb.mxu0 %v3299_v52  ;;  %v3571_v52 = vpop.permute.xlu1 %3570 }
0x1e64   : > { %4456 = vmatmul.msk.f32.vlgmr.msrb.gmra.mxu0 %vm634_vm4, %v4451_v51 }
0x1e6c   : > { %4457 = vmatmul.msk.f32.gmra.mxu0 %vm634_vm4, %v4452_v53 }
0x1ee1   : > { %v3343_v54 = vpop.f32.mrf.mxu0 }
0x1ee2   : > { %v3344_v57 = vadd.f32 %v3343_v54, %v3310_v56  ;;  %v3576_v54 = vpop.permute.xlu0 %3575 }
0x1ee4   : > { %v3351_v62 = vmul.f32 0.01, %v3344_v57  ;;  %vm3349_vm6 = vcmp.gt.f32.partialorder %v3344_v57, 0.0 }
0x1ee6   : > { %v3353_v2 = vsel %vm3349_vm6, %v3344_v57, %v3351_v62  ;;  %v4490_v62 = vld [vmem:[%s4859_s25 + $0xe] sm:$0x1] }
0x1ee9   : > { %v3346_v60 = vpop.f32.mrf.mxu0 }
0x1eea   : > { %v3347_v61 = vadd.f32 %v3346_v60, %v3315_v59  ;;  %v3678_v17 = vpop.permute.xlu0 %3677 }
0x1eec   : > { %vm3350_vm5 = vcmp.gt.f32.partialorder %v3347_v61, 0.0  ;;  %v3352_v63 = vmul.f32 0.01, %v3347_v61 }
0x1eee   : > { %v3354_v0 = vsel %vm3350_vm5, %v3347_v61, %v3352_v63 }
0x1eef   : > { %4462 = vmatpush.msk.msrb.mxu1 %vm641_vm2, %v3354_v0  ;;  %v3623_v0 = vpop.permute.xlu2 %3622 }
0x1ef1   : > { %3395 = vmatpush.msrb.mxu1 %v3353_v2 }
0x1ef2   : > { %4463 = vmatmul.msk.f32.vlgmr.msrb.gmra.mxu1 %vm634_vm4, %v4458_v1  ;;  %v3625_v1 = vperm.slane %v3623_v0, 0 }
0x1efa   : > { %4464 = vmatmul.msk.f32.gmra.mxu1 %vm634_vm4, %v4459_v5 }
0x1f6f   : > { %v3397_v6 = vpop.f32.mrf.mxu1 }
0x1f70   : > { %v3398_v8 = vadd.f32 %v3397_v6, %v3364_v7 }
0x1f72   : > { %v3405_v12 = vmul.f32 0.01, %v3398_v8  ;;  %vm3403_vm8 = vcmp.gt.f32.partialorder %v3398_v8, 0.0 }
0x1f74   : > { %v3407_v16 = vsel %vm3403_vm8, %v3398_v8, %v3405_v12  ;;  %v4495_v12 = vld [vmem:[%s4702_s19 + $0xf0] sm:$0xff] }
0x1f77   : > { %v3400_v10 = vpop.f32.mrf.mxu1 }
0x1f78   : > { %v3401_v11 = vadd.f32 %v3400_v10, %v3369_v9 }
0x1f7a   : > { %vm3404_vm7 = vcmp.gt.f32.partialorder %v3401_v11, 0.0  ;;  %v3406_v13 = vmul.f32 0.01, %v3401_v11 }
0x1f7c   : > { %v3408_v14 = vsel %vm3404_vm7, %v3401_v11, %v3406_v13  ;;  %v4496_v13 = vld [vmem:[%s4702_s19 + $0xf8] sm:$0xf] }
0x1f7d   : > { %4467 = vmatpush.msk.msrb.mxu2 %vm641_vm2, %v3408_v14 }
0x1f7f   : > { %3440 = vmatpush.msrb.mxu2 %v3407_v16 }
0x1f80   : > { %4468 = vmatmul.msk.f32.vlgmr.msrb.gmra.mxu2 %vm634_vm4, %v4465_v15  ;;  %v3673_v15 = vpop.permute.xlu1 %3672 }
0x2003   : > { %v3442_v19 = vpop.f32.mrf.mxu2 }
0x2004   : > { %v3443_v20 = vadd.f32 %v3442_v19, %v3418_v18 }
0x2006   : > { %v4469_v21 = vclamps-f32 %v3443_v20, 1.0 }
0x2008   : > { %v3448_v22 = vrot.slane %v4469_v21, 3 }
0x200a   : > { %v3450_v4 = vsub.f32 %v5171_v3, %v3448_v22 }
0x200c   : > { %vm3451_vm9 = vcmp.ge.f32.partialorder %v3450_v4, 1.0 }
0x200d   : > { %v3452_v23 = vsel %vm3451_vm9, 2.0, %v4585_v34 }
0x200e   : > { %v3453_v24 = vsub.f32 %v3450_v4, %v3452_v23  ;;  %v4502_v23 = vld [vmem:[%s4778_s11 + $0xf8] sm:$0xf] }
0x2010   : > { %3454 = vst [vmem:[%s4689_s30 + $0x8] sm:$0x20] %v3453_v24 }
0x2017   : > { %v5196_v25 = vld [vmem:[%s4689_s30 + $0x8] sm:$0xff] }
0x2018   : > { %3493 = vmatpush.msra.mxu2 %v5196_v25 }
0x201a   : > { %3494 = vmatpush.msra.mxu2 %v5048_v55 }
0x201b   : > { %4474 = vmatmul.msk.f32.vlgmr.msra.gmra.mxu2 %vm584_vm0, %v4470_v26 }
0x2023   : > { %4475 = vmatmul.msk.f32.gmra.mxu2 %vm584_vm0, %v4471_v27  ;;  %v3729_v27 = vpop.permute.xlu2 %3728 }
0x209e   : > { %v3496_v28 = vpop.f32.mrf.mxu2 }
0x209f   : > { %v3497_v30 = vadd.f32 %v3496_v28, %v3466_v29 }
0x20a1   : > { %v3504_v35 = vmul.f32 0.01, %v3497_v30  ;;  %vm3502_vm11 = vcmp.gt.f32.partialorder %v3497_v30, 0.0 }
0x20a3   : > { %v3506_v39 = vsel %vm3502_vm11, %v3497_v30, %v3504_v35 }
0x20a6   : > { %v3499_v32 = vpop.f32.mrf.mxu2 }
0x20a7   : > { %v3500_v33 = vadd.f32 %v3499_v32, %v3471_v31 }
0x20a9   : > { %vm3503_vm10 = vcmp.gt.f32.partialorder %v3500_v33, 0.0  ;;  %v3505_v36 = vmul.f32 0.01, %v3500_v33 }
0x20ab   : > { %v3507_v37 = vsel %vm3503_vm10, %v3500_v33, %v3505_v36  ;;  %v4508_v33 = vld [vmem:[%s4842_s22 + $0xf0] sm:$0xff]  ;;  %v4509_v36 = vld [vmem:[%s4842_s22 + $0xf8] sm:$0xf] }
0x20ac   : > { %4480 = vmatpush.msk.msra.mxu3 %vm641_vm2, %v3507_v37 }
0x20ae   : > { %3548 = vmatpush.msra.mxu3 %v3506_v39 }
0x20af   : > { %4481 = vmatmul.msk.f32.vlgmr.msra.gmra.mxu3 %vm634_vm4, %v4476_v38  ;;  %v3778_v38 = vpop.permute.xlu2 %3777 }
0x20b7   : > { %4482 = vmatmul.msk.f32.gmra.mxu3 %vm634_vm4, %v4477_v40  ;;  %v3783_v40 = vpop.permute.xlu1 %3782 }
0x2132   : > { %v3550_v3 = vpop.f32.mrf.mxu3 }
0x2133   : > { %v3551_v58 = vadd.f32 %v3550_v3, %v3517_v41 }
0x2135   : > { %v3558_v45 = vmul.f32 0.01, %v3551_v58  ;;  %vm3556_vm13 = vcmp.gt.f32.partialorder %v3551_v58, 0.0 }
0x2137   : > { %v3560_v49 = vsel %vm3556_vm13, %v3551_v58, %v3558_v45 }
0x213a   : > { %v3553_v43 = vpop.f32.mrf.mxu3 }
0x213b   : > { %v3554_v44 = vadd.f32 %v3553_v43, %v3522_v42 }
0x213d   : > { %vm3557_vm12 = vcmp.gt.f32.partialorder %v3554_v44, 0.0  ;;  %v3559_v46 = vmul.f32 0.01, %v3554_v44 }
0x213f   : > { %v3561_v47 = vsel %vm3557_vm12, %v3554_v44, %v3559_v46  ;;  %v4515_v44 = vld [vmem:[%s4859_s25 + $0xf] sm:$0x1] }
0x2140   : > { %4487 = vmatpush.msk.msra.mxu0 %vm641_vm2, %v3561_v47 }
0x2142   : > { %3602 = vmatpush.msra.mxu0 %v3560_v49 }
0x2143   : > { %4488 = vmatmul.msk.f32.vlgmr.msra.gmra.mxu0 %vm634_vm4, %v4483_v48 }
0x214b   : > { %4489 = vmatmul.msk.f32.gmra.mxu0 %vm634_vm4, %v4484_v50 }
0x21c0   : > { %v3604_v51 = vpop.f32.mrf.mxu0 }
0x21c1   : > { %v3605_v53 = vadd.f32 %v3604_v51, %v3571_v52 }
0x21c3   : > { %v3612_v59 = vmul.f32 0.01, %v3605_v53  ;;  %vm3610_vm15 = vcmp.gt.f32.partialorder %v3605_v53, 0.0 }
0x21c5   : > { %v3614_v63 = vsel %vm3610_vm15, %v3605_v53, %v3612_v59 }
0x21c8   : > { %v3607_v56 = vpop.f32.mrf.mxu0 }
0x21c9   : > { %v3608_v57 = vadd.f32 %v3607_v56, %v3576_v54 }
0x21cb   : > { %vm3611_vm14 = vcmp.gt.f32.partialorder %v3608_v57, 0.0  ;;  %v3613_v60 = vmul.f32 0.01, %v3608_v57 }
0x21cd   : > { %v3615_v61 = vsel %vm3611_vm14, %v3608_v57, %v3613_v60  ;;  %v4559_v57 = vld [vmem:[%s4689_s30] sm:$0xff] }
0x21ce   : > { %4492 = vmatpush.msk.msra.mxu1 %vm641_vm2, %v3615_v61  ;;  %v3871_v59 = vmul.f32 %v4559_v57, %v4559_v57 }
0x21d0   : > { %3647 = vmatpush.msra.mxu1 %v3614_v63  ;;  %v3880_v63 = vlaneseq }
0x21d1   : > { %4493 = vmatmul.msk.f32.vlgmr.msra.gmra.mxu1 %vm634_vm4, %v4490_v62 }
0x224e   : > { %v3649_v2 = vpop.f32.mrf.mxu1 }
0x224f   : > { %v3650_v5 = vadd.f32 %v3649_v2, %v3625_v1  ;;  %v3881_v2 = vand.u32 127, %v3880_v63 }
0x2251   : > { %v4494_v6 = vclamps-f32 %v3650_v5, 1.0 }
0x2253   : > { %v3655_v7 = vrot.slane %v4494_v6, 2 }
0x2255   : > { %v3657_v8 = vsub.f32 %v5196_v25, %v3655_v7  ;;  %v3724_v25 = vpop.permute.xlu0 %3723 }
0x2257   : > { %vm3658_vm1 = vcmp.ge.f32.partialorder %v3657_v8, 1.0 }
0x2258   : > { %v3659_v9 = vsel %vm3658_vm1, 2.0, %v4585_v34 }
0x2259   : > { %v3660_v10 = vsub.f32 %v3657_v8, %v3659_v9 }
0x225b   : > { %3661 = vst [vmem:[%s4689_s30 + $0x8] sm:$0x40] %v3660_v10 }
0x225d   : > { %v3830_v46 = vpop.permute.xlu0 %3829 }
0x225e   : > { %v3832_v47 = vperm.slane %v3830_v46, 0 }
0x2262   : > { %v5221_v11 = vld [vmem:[%s4689_s30 + $0x8] sm:$0xff] }
0x2263   : > { %3700 = vmatpush.msrb.mxu1 %v5221_v11 }
0x2265   : > { %3701 = vmatpush.msrb.mxu1 %v5048_v55  ;;  %v4501_v55 = vld [vmem:[%s4778_s11 + $0xf0] sm:$0xff] }
0x2266   : > { %4499 = vmatmul.msk.f32.vlgmr.msrb.gmra.mxu1 %vm584_vm0, %v4495_v12 }
0x226e   : > { %4500 = vmatmul.msk.f32.gmra.mxu1 %vm584_vm0, %v4496_v13 }
0x22e3   : > { %v3703_v14 = vpop.f32.mrf.mxu1 }
0x22e4   : > { %v3704_v16 = vadd.f32 %v3703_v14, %v3673_v15 }
0x22e6   : > { %v3711_v20 = vmul.f32 0.01, %v3704_v16  ;;  %vm3709_vm5 = vcmp.gt.f32.partialorder %v3704_v16, 0.0 }
0x22e8   : > { %v3713_v4 = vsel %vm3709_vm5, %v3704_v16, %v3711_v20 }
0x22eb   : > { %v3706_v18 = vpop.f32.mrf.mxu1 }
0x22ec   : > { %v3707_v19 = vadd.f32 %v3706_v18, %v3678_v17 }
0x22ee   : > { %vm3710_vm3 = vcmp.gt.f32.partialorder %v3707_v19, 0.0  ;;  %v3712_v21 = vmul.f32 0.01, %v3707_v19 }
0x22f0   : > { %v3714_v22 = vsel %vm3710_vm3, %v3707_v19, %v3712_v21 }
0x22f1   : > { %4505 = vmatpush.msk.msrb.mxu2 %vm641_vm2, %v3714_v22 }
0x22f3   : > { %3755 = vmatpush.msrb.mxu2 %v3713_v4 }
0x22f4   : > { %4506 = vmatmul.msk.f32.vlgmr.msrb.gmra.mxu2 %vm634_vm4, %v4501_v55 }
0x22fc   : > { %4507 = vmatmul.msk.f32.gmra.mxu2 %vm634_vm4, %v4502_v23 }
0x2377   : > { %v3757_v24 = vpop.f32.mrf.mxu2 }
0x2378   : > { %v3758_v26 = vadd.f32 %v3757_v24, %v3724_v25 }
0x237a   : > { %v3765_v30 = vmul.f32 0.01, %v3758_v26  ;;  %vm3763_vm6 = vcmp.gt.f32.partialorder %v3758_v26, 0.0 }
0x237c   : > { %v3767_v35 = vsel %vm3763_vm6, %v3758_v26, %v3765_v30 }
0x237f   : > { %v3760_v28 = vpop.f32.mrf.mxu2 }
0x2380   : > { %v3761_v29 = vadd.f32 %v3760_v28, %v3729_v27 }
0x2382   : > { %vm3764_vm0 = vcmp.gt.f32.partialorder %v3761_v29, 0.0  ;;  %v3766_v31 = vmul.f32 0.01, %v3761_v29 }
0x2384   : > { %v3768_v32 = vsel %vm3764_vm0, %v3761_v29, %v3766_v31 }
0x2385   : > { %4512 = vmatpush.msk.msrb.mxu3 %vm641_vm2, %v3768_v32 }
0x2387   : > { %3809 = vmatpush.msrb.mxu3 %v3767_v35 }
0x2388   : > { %4513 = vmatmul.msk.f32.vlgmr.msrb.gmra.mxu3 %vm634_vm4, %v4508_v33 }
0x2390   : > { %4514 = vmatmul.msk.f32.gmra.mxu3 %vm634_vm4, %v4509_v36 }
0x240b   : > { %v3811_v37 = vpop.f32.mrf.mxu3 }
0x240c   : > { %v3812_v39 = vadd.f32 %v3811_v37, %v3778_v38 }
0x240e   : > { %v3819_v58 = vmul.f32 0.01, %v3812_v39  ;;  %vm3817_vm8 = vcmp.gt.f32.partialorder %v3812_v39, 0.0 }
0x2410   : > { %v3821_v45 = vsel %vm3817_vm8, %v3812_v39, %v3819_v58 }
0x2413   : > { %v3814_v3 = vpop.f32.mrf.mxu3 }
0x2414   : > { %v3815_v41 = vadd.f32 %v3814_v3, %v3783_v40 }
0x2416   : > { %vm3818_vm7 = vcmp.gt.f32.partialorder %v3815_v41, 0.0  ;;  %v3820_v42 = vmul.f32 0.01, %v3815_v41 }
0x2418   : > { %v3822_v43 = vsel %vm3818_vm7, %v3815_v41, %v3820_v42 }
0x2419   : > { %4517 = vmatpush.msk.msrb.mxu0 %vm641_vm2, %v3822_v43  ;;  %vm3885_vm2 = vcmp.lt.s32.totalorder %v3881_v2, 32 }
0x241b   : > { %3854 = vmatpush.msrb.mxu0 %v3821_v45 }
0x241c   : > { %4518 = vmatmul.msk.f32.vlgmr.msrb.gmra.mxu0 %vm634_vm4, %v4515_v44 }
0x2499   : > { %v3856_v48 = vpop.f32.mrf.mxu0 }
0x249a   : > { %v3857_v49 = vadd.f32 %v3856_v48, %v3832_v47 }
0x249c   : > { %v4519_v50 = vclamps-f32 %v3857_v49, 1.0 }
0x249e   : > { %v3862_v51 = vrot.slane %v4519_v50, 1 }
0x24a0   : > { %v3864_v52 = vsub.f32 %v5221_v11, %v3862_v51 }
0x24a2   : > { %vm3865_vm9 = vcmp.ge.f32.partialorder %v3864_v52, 1.0 }
0x24a3   : > { %v3866_v53 = vsel %vm3865_vm9, 2.0, %v4585_v34 }
0x24a4   : > { %v3867_v54 = vsub.f32 %v3864_v52, %v3866_v53 }
0x24a6   : > { %3868 = vst [vmem:[%s4689_s30 + $0x8] sm:$0x80] %v3867_v54 }
0x24ad   : > { %v3870_v56 = vld [vmem:[%s4689_s30 + $0x8] sm:$0xff] }
0x24ae   : > { %v3872_v60 = vmul.f32 %v3870_v56, %v3870_v56 }
0x24b0   : > { %v3873_v61 = vadd.f32 %v3872_v60, %v3871_v59 }
0x24b2   : > { %v3874_v62 = vrot.slane %v3873_v61, 4 }
0x24b4   : > { %v3875_v0 = vadd.f32 %v3874_v62, %v3873_v61 }
0x24b6   : > { %v3876_v1 = vrot.slane %v3875_v0, 2 }
0x24b8   : > { %v3877_v5 = vadd.f32 %v3876_v1, %v3875_v0 }
0x24ba   : > { %v3878_v6 = vrot.slane %v3877_v5, 1 }
0x24bc   : > { %v3879_v7 = vadd.f32 %v3878_v6, %v3877_v5 }
0x24be   : > { %v3886_v8 = vsel %vm3885_vm2, %v3879_v7, 0.0 }
0x24bf   : > { %3887 = vadd.xlane.f32.xlu1 %v3886_v8 }
0x2532   : > { %v3888_v34 = vpop.xlane.xlu1 %3887 }
0x2533   : > { %3889 = vst [vmem:[%s563_s23] sm:$0xff] %v3888_v34 }
0x2534 PF: > { %s21_s15 = sadd.s32 1, %s4582_s15   ;;  %s5271_s13 = smov %s4578_s14 }
0x2535   : > { %p18_p5 = scmp.ge.s32.totalorder %s21_s15, 5   ;;  %s5272_s14 = smov %s5274_s16 }
0x2537   :  { %20 = sbr.rel (!%p18_p5) target bundleno = 2 (0x2), region = 242 }

</bundles_post_ra>
